<compile_context>
chip_gen: v5e
topology: v5e:2x2
jax: 0.10.0
libtpu: 0.0.40
codegen_flags: <defaults>
</compile_context>

<pallas_src>
import functools
import math

import jax
import jax.numpy as jnp
from jax.experimental import pallas as pl

# ---- small config consistent with an E5-small-style encoder ----
VOCAB = 100          # ids drawn from [1, VOCAB)
VOCAB_PAD = 128      # embedding table padded to 128 rows (lane/MXU friendly)
HIDDEN = 128
N_LAYERS = 2
N_HEADS = 4
HEAD_DIM = HIDDEN // N_HEADS
FFN = 512
MAX_POS = 128
LN_EPS = 1e-12

# ---- packed "smalls" parameter layout (one f32 (SM_ROWS, SM_W) array) ----
SM_W = FFN                      # widest small vector (FFN bias)
ROW_EMB_G, ROW_EMB_B, ROW_TYPE0 = 0, 1, 2
LAYER_ROW0 = 3
ROWS_PER_LAYER = 8              # bqkv, bo, ln1_g, ln1_b, b1, b2, ln2_g, ln2_b
SM_ROWS = 24                    # 3 + 2*8 = 19 used, padded to a multiple of 8


# ---------------- fused Pallas kernel: embeddings + LN + N layers + masked avg pool ----------------

def _pearl_encoder_kernel(ids_ref, mask_ref, wemb_ref, pemb_ref, smalls_ref,
                          wqkv_ref, wo_ref, w1_ref, w2_ref, o_ref, *, batch, seq):
    D = HIDDEN
    M = batch * seq
    scale = 1.0 / math.sqrt(HEAD_DIM)

    def sm(row, width):
        # static (1, width) slice of the packed small-parameter array
        return smalls_ref[row:row + 1, 0:width]

    def ln(x, g, b):
        mu = jnp.mean(x, axis=-1, keepdims=True)
        var = jnp.mean((x - mu) ** 2, axis=-1, keepdims=True)
        return (x - mu) * jax.lax.rsqrt(var + LN_EPS) * g + b

    def matmul(x, w):
        # bf16 MXU operands, f32 accumulation
        return jnp.dot(x.astype(jnp.bfloat16), w.astype(jnp.bfloat16),
                       preferred_element_type=jnp.float32)

    mask = mask_ref[...].astype(jnp.float32)             # (B, S), {0,1}
    mask_bias = (mask - 1.0)[:, None, :] * 1e9            # (B, 1, S): 0 valid, -1e9 pad

    # ---- embeddings (fused): word gather as one-hot MXU matmul (exact, f32) ----
    ids = ids_ref[...]                                     # (M, 1) int32
    iota = jax.lax.broadcasted_iota(jnp.int32, (M, VOCAB_PAD), 1)
    onehot = (iota == ids).astype(jnp.float32)             # (M, VOCAB_PAD)
    word = jnp.dot(onehot, wemb_ref[...],
                   preferred_element_type=jnp.float32)     # (M, D)
    pos = pemb_ref[0:seq, :]                               # (S, D), static slice
    pos_rows = jnp.concatenate([pos] * batch, axis=0)      # (M, D)
    emb = word + pos_rows + sm(ROW_TYPE0, D)               # + token-type-0 embedding

    # BERT embedding LayerNorm
    h = ln(emb, sm(ROW_EMB_G, D), sm(ROW_EMB_B, D))        # (M, D)

    for li in range(N_LAYERS):
        base = LAYER_ROW0 + li * ROWS_PER_LAYER

        # ---- self-attention ----
        qkv = matmul(h, wqkv_ref[li]) + sm(base + 0, 3 * D)   # (M, 3D), fused Q|K|V
        q = qkv[:, 0 * D:1 * D].astype(jnp.bfloat16)
        k = qkv[:, 1 * D:2 * D].astype(jnp.bfloat16)
        v = qkv[:, 2 * D:3 * D].astype(jnp.bfloat16)

        head_outs = []
        for hd in range(N_HEADS):
            c0 = hd * HEAD_DIM
            qh = q[:, c0:c0 + HEAD_DIM].reshape(batch, seq, HEAD_DIM)
            kh = k[:, c0:c0 + HEAD_DIM].reshape(batch, seq, HEAD_DIM)
            vh = v[:, c0:c0 + HEAD_DIM].reshape(batch, seq, HEAD_DIM)
            s = jnp.einsum('bqd,bkd->bqk', qh, kh,
                           preferred_element_type=jnp.float32) * scale
            s = s + mask_bias
            s = s - jnp.max(s, axis=-1, keepdims=True)      # stable softmax
            p = jnp.exp(s)
            p = p * pl.reciprocal(jnp.sum(p, axis=-1, keepdims=True), approx=True)
            oh = jnp.einsum('bqk,bkd->bqd', p.astype(jnp.bfloat16), vh,
                            preferred_element_type=jnp.float32)
            head_outs.append(oh.reshape(M, HEAD_DIM))
        attn = jnp.concatenate(head_outs, axis=-1)           # (M, D) lane-dense

        o = matmul(attn, wo_ref[li]) + sm(base + 1, D)
        h1 = ln(h + o, sm(base + 2, D), sm(base + 3, D))

        # ---- feed-forward ----
        f = matmul(h1, w1_ref[li]) + sm(base + 4, FFN)
        # TODO(synk): BERT/E5 checkpoints use erf-GELU; tanh approximation kept for
        # simple Mosaic lowering (numerically very close).
        f = jax.nn.gelu(f)
        f = matmul(f, w2_ref[li]) + sm(base + 5, D)
        h = ln(h1 + f, sm(base + 6, D), sm(base + 7, D))

    # ---- masked average pool (== PearlSmallModel.average_pool), exact divide ----
    h3 = h.reshape(batch, seq, D)
    summed = jnp.sum(h3 * mask[:, :, None], axis=1)          # (B, D)
    cnt = jnp.sum(mask, axis=1, keepdims=True)               # (B, 1)
    cnt = jnp.maximum(cnt, 1.0)                              # guard all-pad rows
    o_ref[...] = (summed / cnt).astype(o_ref.dtype)


# ---------------- parameters (deterministic synthetic init, layer-stacked) ----------------

def init_params(key):
    def norm(k, shape):
        return 0.02 * jax.random.normal(k, shape, dtype=jnp.float32)

    ks = jax.random.split(key, 7)
    word_emb = norm(ks[0], (VOCAB_PAD, HIDDEN))              # rows >= VOCAB unused
    pos_emb = norm(ks[1], (MAX_POS, HIDDEN))
    type_emb = norm(ks[2], (2, HIDDEN))

    # matmul weights stored bf16 (MXU operands)
    wqkv = norm(ks[3], (N_LAYERS, HIDDEN, 3 * HIDDEN)).astype(jnp.bfloat16)
    wo = norm(ks[4], (N_LAYERS, HIDDEN, HIDDEN)).astype(jnp.bfloat16)
    w1 = norm(ks[5], (N_LAYERS, HIDDEN, FFN)).astype(jnp.bfloat16)
    w2 = norm(ks[6], (N_LAYERS, FFN, HIDDEN)).astype(jnp.bfloat16)

    # pack every small f32 vector (biases / LN params / token-type-0 embedding) into
    # one (SM_ROWS, SM_W) array -> single DMA instead of ~16.
    def row(v):
        v = jnp.asarray(v, jnp.float32).reshape(1, -1)
        return jnp.pad(v, ((0, 0), (0, SM_W - v.shape[1])))

    rows = [row(jnp.ones(HIDDEN)),        # emb LN gamma
            row(jnp.zeros(HIDDEN)),       # emb LN beta
            row(type_emb[0])]             # token-type-0 embedding
    for _ in range(N_LAYERS):
        rows += [row(jnp.zeros(3 * HIDDEN)),   # bqkv
                 row(jnp.zeros(HIDDEN)),       # bo
                 row(jnp.ones(HIDDEN)),        # ln1 gamma
                 row(jnp.zeros(HIDDEN)),       # ln1 beta
                 row(jnp.zeros(FFN)),          # b1
                 row(jnp.zeros(HIDDEN)),       # b2
                 row(jnp.ones(HIDDEN)),        # ln2 gamma
                 row(jnp.zeros(HIDDEN))]       # ln2 beta
    smalls = jnp.concatenate(rows, axis=0)
    smalls = jnp.pad(smalls, ((0, SM_ROWS - smalls.shape[0]), (0, 0)))

    return {'word_emb': word_emb, 'pos_emb': pos_emb, 'smalls': smalls,
            'wqkv': wqkv, 'wo': wo, 'w1': w1, 'w2': w2}


# ---------------- forward: everything post-tokenizer in ONE Pallas kernel ----------------

def pearl_small_forward(params, input_ids, attention_mask):
    B, S = input_ids.shape
    M = B * S
    ids = input_ids.astype(jnp.int32).reshape(M, 1)          # (M, 1) for in-kernel gather
    mask_f = attention_mask.astype(jnp.float32)

    kernel = functools.partial(_pearl_encoder_kernel, batch=B, seq=S)
    # Single fused grid-less invocation: all weights (~0.9 MB) + activations stay
    # VMEM-resident.  If B*S grows, add a leading "parallel" grid axis over batch /
    # M row-tiles (weights index_maps returning block 0) so v7x's two TensorCores
    # both get work; cap M tiles at ~256-512 rows for v7x's 64 MiB VMEM, larger on
    # v5e/v6e's 128 MiB.
    return pl.pallas_call(
        kernel,
        out_shape=jax.ShapeDtypeStruct((B, HIDDEN), jnp.float32),
    )(ids, mask_f, params['word_emb'], params['pos_emb'], params['smalls'],
      params['wqkv'], params['wo'], params['w1'], params['w2'])


if __name__ == "__main__":
    key = jax.random.PRNGKey(0)
    kp, kt = jax.random.split(key)
    params = init_params(kp)

    B, S = 2, 8
    # TODO(synk): HF AutoTokenizer has no Pallas equivalent; synthesize deterministic
    # token ids + attention mask (second sequence padded to length 5) in its place.
    input_ids = jax.random.randint(kt, (B, S), 1, VOCAB)
    attention_mask = jnp.array([[1, 1, 1, 1, 1, 1, 1, 1],
                                [1, 1, 1, 1, 1, 0, 0, 0]], dtype=jnp.int32)

    fwd = jax.jit(pearl_small_forward)
    phrase_vec = fwd(params, input_ids, attention_mask)
    jax.block_until_ready(phrase_vec)
    assert phrase_vec.shape == (B, HIDDEN)
    assert bool(jnp.all(jnp.isfinite(phrase_vec)))
    print("KERNEL_OK")
</pallas_src>

<mosaic_0001>
module attributes {stable_mosaic.version = 11 : i64} {
  func.func @_pearl_encoder_kernel(%arg0: memref<16x1xi32, #tpu.memory_space<vmem>>, %arg1: memref<2x8xf32, #tpu.memory_space<vmem>>, %arg2: memref<128x128xf32, #tpu.memory_space<vmem>>, %arg3: memref<128x128xf32, #tpu.memory_space<vmem>>, %arg4: memref<24x512xf32, #tpu.memory_space<vmem>>, %arg5: memref<2x128x384xbf16, #tpu.memory_space<vmem>>, %arg6: memref<2x128x128xbf16, #tpu.memory_space<vmem>>, %arg7: memref<2x128x512xbf16, #tpu.memory_space<vmem>>, %arg8: memref<2x512x128xbf16, #tpu.memory_space<vmem>>, %arg9: memref<2x128xf32, #tpu.memory_space<vmem>>) attributes {dimension_semantics = [], scalar_prefetch = 0 : i64, scratch_operands = 0 : i64, tpu.core_type = #tpu.core_type<tc>} {
    %c0 = arith.constant 0 : index
    %c0_0 = arith.constant 0 : index
    %0 = vector.load %arg1[%c0, %c0_0] : memref<2x8xf32, #tpu.memory_space<vmem>>, vector<2x8xf32>
    %cst = arith.constant 1.000000e+00 : f32
    %1 = vector.broadcast %cst : f32 to vector<2x8xf32>
    %2 = arith.subf %0, %1 : vector<2x8xf32>
    %3 = vector.shape_cast %2 : vector<2x8xf32> to vector<2x1x8xf32>
    %cst_1 = arith.constant 1.000000e+09 : f32
    %4 = vector.broadcast %cst_1 : f32 to vector<2x1x8xf32>
    %5 = arith.mulf %3, %4 : vector<2x1x8xf32>
    %c0_2 = arith.constant 0 : index
    %c0_3 = arith.constant 0 : index
    %6 = vector.load %arg0[%c0_2, %c0_3] : memref<16x1xi32, #tpu.memory_space<vmem>>, vector<16x1xi32>
    %7 = tpu.iota {dimensions = array<i32: 1>} : vector<16x128xi32>
    %8 = vector.broadcast %6 : vector<16x1xi32> to vector<16x128xi32>
    %9 = arith.cmpi eq, %7, %8 : vector<16x128xi32>
    %10 = arith.extui %9 : vector<16x128xi1> to vector<16x128xi32>
    %11 = arith.sitofp %10 : vector<16x128xi32> to vector<16x128xf32>
    %c0_4 = arith.constant 0 : index
    %c0_5 = arith.constant 0 : index
    %12 = vector.load %arg2[%c0_4, %c0_5] : memref<128x128xf32, #tpu.memory_space<vmem>>, vector<128x128xf32>
    %cst_6 = arith.constant dense<0.000000e+00> : vector<16x128xf32>
    %13 = tpu.matmul %11, %12, %cst_6 {dimension_numbers = #tpu.dot_dimension_numbers<[1], [0], [0], [1], [0, 0, 1, 1], [], []>} : vector<16x128xf32>, vector<128x128xf32>, vector<16x128xf32> -> vector<16x128xf32>
    %c0_7 = arith.constant 0 : index
    %c0_8 = arith.constant 0 : index
    %14 = vector.load %arg3[%c0_7, %c0_8] : memref<128x128xf32, #tpu.memory_space<vmem>>, vector<8x128xf32>
    %15 = tpu.concatenate %14, %14 in 0 : vector<8x128xf32>, vector<8x128xf32> -> vector<16x128xf32>
    %16 = arith.addf %13, %15 : vector<16x128xf32>
    %c2 = arith.constant 2 : index
    %c0_9 = arith.constant 0 : index
    %17 = vector.load %arg4[%c2, %c0_9] : memref<24x512xf32, #tpu.memory_space<vmem>>, vector<1x128xf32>
    %18 = vector.broadcast %17 : vector<1x128xf32> to vector<16x128xf32>
    %19 = arith.addf %16, %18 : vector<16x128xf32>
    %c0_10 = arith.constant 0 : index
    %c0_11 = arith.constant 0 : index
    %20 = vector.load %arg4[%c0_10, %c0_11] : memref<24x512xf32, #tpu.memory_space<vmem>>, vector<1x128xf32>
    %c1 = arith.constant 1 : index
    %c0_12 = arith.constant 0 : index
    %21 = vector.load %arg4[%c1, %c0_12] : memref<24x512xf32, #tpu.memory_space<vmem>>, vector<1x128xf32>
    %cst_13 = arith.constant dense<0.000000e+00> : vector<16xf32>
    %22 = vector.multi_reduction <add>, %19, %cst_13 [1] : vector<16x128xf32> to vector<16xf32>
    %23 = vector.shape_cast %22 : vector<16xf32> to vector<16x1xf32>
    %cst_14 = arith.constant 1.280000e+02 : f32
    %24 = vector.broadcast %cst_14 : f32 to vector<16x1xf32>
    %25 = arith.divf %23, %24 : vector<16x1xf32>
    %26 = vector.broadcast %25 : vector<16x1xf32> to vector<16x128xf32>
    %27 = arith.subf %19, %26 : vector<16x128xf32>
    %28 = arith.mulf %27, %27 : vector<16x128xf32>
    %cst_15 = arith.constant dense<0.000000e+00> : vector<16xf32>
    %29 = vector.multi_reduction <add>, %28, %cst_15 [1] : vector<16x128xf32> to vector<16xf32>
    %30 = vector.shape_cast %29 : vector<16xf32> to vector<16x1xf32>
    %cst_16 = arith.constant 1.280000e+02 : f32
    %31 = vector.broadcast %cst_16 : f32 to vector<16x1xf32>
    %32 = arith.divf %30, %31 : vector<16x1xf32>
    %33 = vector.broadcast %25 : vector<16x1xf32> to vector<16x128xf32>
    %34 = arith.subf %19, %33 : vector<16x128xf32>
    %cst_17 = arith.constant 9.99999996E-13 : f32
    %35 = vector.broadcast %cst_17 : f32 to vector<16x1xf32>
    %36 = arith.addf %32, %35 : vector<16x1xf32>
    %37 = math.rsqrt %36 : vector<16x1xf32>
    %38 = vector.broadcast %37 : vector<16x1xf32> to vector<16x128xf32>
    %39 = arith.mulf %34, %38 : vector<16x128xf32>
    %40 = vector.broadcast %20 : vector<1x128xf32> to vector<16x128xf32>
    %41 = arith.mulf %39, %40 : vector<16x128xf32>
    %42 = vector.broadcast %21 : vector<1x128xf32> to vector<16x128xf32>
    %43 = arith.addf %41, %42 : vector<16x128xf32>
    %c0_18 = arith.constant 0 : index
    %c0_19 = arith.constant 0 : index
    %c0_20 = arith.constant 0 : index
    %44 = vector.load %arg5[%c0_18, %c0_19, %c0_20] : memref<2x128x384xbf16, #tpu.memory_space<vmem>>, vector<1x128x384xbf16>
    %45 = vector.shape_cast %44 : vector<1x128x384xbf16> to vector<128x384xbf16>
    %46 = arith.truncf %43 : vector<16x128xf32> to vector<16x128xbf16>
    %cst_21 = arith.constant dense<0.000000e+00> : vector<16x384xf32>
    %47 = tpu.matmul %46, %45, %cst_21 {dimension_numbers = #tpu.dot_dimension_numbers<[1], [0], [0], [1], [0, 0, 1, 1], [], []>} : vector<16x128xbf16>, vector<128x384xbf16>, vector<16x384xf32> -> vector<16x384xf32>
    %c3 = arith.constant 3 : index
    %c0_22 = arith.constant 0 : index
    %48 = vector.load %arg4[%c3, %c0_22] : memref<24x512xf32, #tpu.memory_space<vmem>>, vector<1x384xf32>
    %49 = vector.broadcast %48 : vector<1x384xf32> to vector<16x384xf32>
    %50 = arith.addf %47, %49 : vector<16x384xf32>
    %51 = vector.extract_strided_slice %50 {offsets = [0, 0], sizes = [16, 128], strides = [1, 1]} : vector<16x384xf32> to vector<16x128xf32>
    %52 = arith.truncf %51 : vector<16x128xf32> to vector<16x128xbf16>
    %53 = vector.extract_strided_slice %50 {offsets = [0, 128], sizes = [16, 128], strides = [1, 1]} : vector<16x384xf32> to vector<16x128xf32>
    %54 = arith.truncf %53 : vector<16x128xf32> to vector<16x128xbf16>
    %55 = vector.extract_strided_slice %50 {offsets = [0, 256], sizes = [16, 128], strides = [1, 1]} : vector<16x384xf32> to vector<16x128xf32>
    %56 = arith.truncf %55 : vector<16x128xf32> to vector<16x128xbf16>
    %57 = vector.extract_strided_slice %52 {offsets = [0, 0], sizes = [16, 32], strides = [1, 1]} : vector<16x128xbf16> to vector<16x32xbf16>
    %58 = vector.shape_cast %57 : vector<16x32xbf16> to vector<2x8x32xbf16>
    %59 = vector.extract_strided_slice %54 {offsets = [0, 0], sizes = [16, 32], strides = [1, 1]} : vector<16x128xbf16> to vector<16x32xbf16>
    %60 = vector.shape_cast %59 : vector<16x32xbf16> to vector<2x8x32xbf16>
    %61 = vector.extract_strided_slice %56 {offsets = [0, 0], sizes = [16, 32], strides = [1, 1]} : vector<16x128xbf16> to vector<16x32xbf16>
    %62 = vector.shape_cast %61 : vector<16x32xbf16> to vector<2x8x32xbf16>
    "tpu.trace_start"() <{level = 10 : i32, message = "bqd,bkd->bqk"}> : () -> ()
    %cst_23 = arith.constant dense<0.000000e+00> : vector<2x8x8xf32>
    %63 = tpu.matmul %58, %60, %cst_23 {dimension_numbers = #tpu.dot_dimension_numbers<[2], [2], [1], [1], [0, 0, 0, 1, 1, 1], [0], [0]>} : vector<2x8x32xbf16>, vector<2x8x32xbf16>, vector<2x8x8xf32> -> vector<2x8x8xf32>
    "tpu.trace_stop"() : () -> ()
    %cst_24 = arith.constant 0.176776692 : f32
    %64 = vector.broadcast %cst_24 : f32 to vector<2x8x8xf32>
    %65 = arith.mulf %63, %64 : vector<2x8x8xf32>
    %66 = vector.broadcast %5 : vector<2x1x8xf32> to vector<2x8x8xf32>
    %67 = arith.addf %65, %66 : vector<2x8x8xf32>
    %cst_25 = arith.constant dense<0xFF800000> : vector<2x8xf32>
    %68 = vector.multi_reduction <maximumf>, %67, %cst_25 [2] : vector<2x8x8xf32> to vector<2x8xf32>
    %69 = vector.shape_cast %68 : vector<2x8xf32> to vector<2x8x1xf32>
    %70 = vector.broadcast %69 : vector<2x8x1xf32> to vector<2x8x8xf32>
    %71 = arith.subf %67, %70 : vector<2x8x8xf32>
    %72 = math.exp %71 : vector<2x8x8xf32>
    %cst_26 = arith.constant dense<0.000000e+00> : vector<2x8xf32>
    %73 = vector.multi_reduction <add>, %72, %cst_26 [2] : vector<2x8x8xf32> to vector<2x8xf32>
    %74 = vector.shape_cast %73 : vector<2x8xf32> to vector<2x8x1xf32>
    %75 = tpu.reciprocal %74 {approx = true} : vector<2x8x1xf32> -> vector<2x8x1xf32>
    %76 = vector.broadcast %75 : vector<2x8x1xf32> to vector<2x8x8xf32>
    %77 = arith.mulf %72, %76 : vector<2x8x8xf32>
    %78 = arith.truncf %77 : vector<2x8x8xf32> to vector<2x8x8xbf16>
    "tpu.trace_start"() <{level = 10 : i32, message = "bqk,bkd->bqd"}> : () -> ()
    %cst_27 = arith.constant dense<0.000000e+00> : vector<2x8x32xf32>
    %79 = tpu.matmul %78, %62, %cst_27 {dimension_numbers = #tpu.dot_dimension_numbers<[2], [1], [1], [2], [0, 0, 0, 1, 1, 2], [0], [0]>} : vector<2x8x8xbf16>, vector<2x8x32xbf16>, vector<2x8x32xf32> -> vector<2x8x32xf32>
    "tpu.trace_stop"() : () -> ()
    %80 = vector.shape_cast %79 : vector<2x8x32xf32> to vector<16x32xf32>
    %81 = vector.extract_strided_slice %52 {offsets = [0, 32], sizes = [16, 32], strides = [1, 1]} : vector<16x128xbf16> to vector<16x32xbf16>
    %82 = vector.shape_cast %81 : vector<16x32xbf16> to vector<2x8x32xbf16>
    %83 = vector.extract_strided_slice %54 {offsets = [0, 32], sizes = [16, 32], strides = [1, 1]} : vector<16x128xbf16> to vector<16x32xbf16>
    %84 = vector.shape_cast %83 : vector<16x32xbf16> to vector<2x8x32xbf16>
    %85 = vector.extract_strided_slice %56 {offsets = [0, 32], sizes = [16, 32], strides = [1, 1]} : vector<16x128xbf16> to vector<16x32xbf16>
    %86 = vector.shape_cast %85 : vector<16x32xbf16> to vector<2x8x32xbf16>
    "tpu.trace_start"() <{level = 10 : i32, message = "bqd,bkd->bqk"}> : () -> ()
    %cst_28 = arith.constant dense<0.000000e+00> : vector<2x8x8xf32>
    %87 = tpu.matmul %82, %84, %cst_28 {dimension_numbers = #tpu.dot_dimension_numbers<[2], [2], [1], [1], [0, 0, 0, 1, 1, 1], [0], [0]>} : vector<2x8x32xbf16>, vector<2x8x32xbf16>, vector<2x8x8xf32> -> vector<2x8x8xf32>
    "tpu.trace_stop"() : () -> ()
    %cst_29 = arith.constant 0.176776692 : f32
    %88 = vector.broadcast %cst_29 : f32 to vector<2x8x8xf32>
    %89 = arith.mulf %87, %88 : vector<2x8x8xf32>
    %90 = vector.broadcast %5 : vector<2x1x8xf32> to vector<2x8x8xf32>
    %91 = arith.addf %89, %90 : vector<2x8x8xf32>
    %cst_30 = arith.constant dense<0xFF800000> : vector<2x8xf32>
    %92 = vector.multi_reduction <maximumf>, %91, %cst_30 [2] : vector<2x8x8xf32> to vector<2x8xf32>
    %93 = vector.shape_cast %92 : vector<2x8xf32> to vector<2x8x1xf32>
    %94 = vector.broadcast %93 : vector<2x8x1xf32> to vector<2x8x8xf32>
    %95 = arith.subf %91, %94 : vector<2x8x8xf32>
    %96 = math.exp %95 : vector<2x8x8xf32>
    %cst_31 = arith.constant dense<0.000000e+00> : vector<2x8xf32>
    %97 = vector.multi_reduction <add>, %96, %cst_31 [2] : vector<2x8x8xf32> to vector<2x8xf32>
    %98 = vector.shape_cast %97 : vector<2x8xf32> to vector<2x8x1xf32>
    %99 = tpu.reciprocal %98 {approx = true} : vector<2x8x1xf32> -> vector<2x8x1xf32>
    %100 = vector.broadcast %99 : vector<2x8x1xf32> to vector<2x8x8xf32>
    %101 = arith.mulf %96, %100 : vector<2x8x8xf32>
    %102 = arith.truncf %101 : vector<2x8x8xf32> to vector<2x8x8xbf16>
    "tpu.trace_start"() <{level = 10 : i32, message = "bqk,bkd->bqd"}> : () -> ()
    %cst_32 = arith.constant dense<0.000000e+00> : vector<2x8x32xf32>
    %103 = tpu.matmul %102, %86, %cst_32 {dimension_numbers = #tpu.dot_dimension_numbers<[2], [1], [1], [2], [0, 0, 0, 1, 1, 2], [0], [0]>} : vector<2x8x8xbf16>, vector<2x8x32xbf16>, vector<2x8x32xf32> -> vector<2x8x32xf32>
    "tpu.trace_stop"() : () -> ()
    %104 = vector.shape_cast %103 : vector<2x8x32xf32> to vector<16x32xf32>
    %105 = vector.extract_strided_slice %52 {offsets = [0, 64], sizes = [16, 32], strides = [1, 1]} : vector<16x128xbf16> to vector<16x32xbf16>
    %106 = vector.shape_cast %105 : vector<16x32xbf16> to vector<2x8x32xbf16>
    %107 = vector.extract_strided_slice %54 {offsets = [0, 64], sizes = [16, 32], strides = [1, 1]} : vector<16x128xbf16> to vector<16x32xbf16>
    %108 = vector.shape_cast %107 : vector<16x32xbf16> to vector<2x8x32xbf16>
    %109 = vector.extract_strided_slice %56 {offsets = [0, 64], sizes = [16, 32], strides = [1, 1]} : vector<16x128xbf16> to vector<16x32xbf16>
    %110 = vector.shape_cast %109 : vector<16x32xbf16> to vector<2x8x32xbf16>
    "tpu.trace_start"() <{level = 10 : i32, message = "bqd,bkd->bqk"}> : () -> ()
    %cst_33 = arith.constant dense<0.000000e+00> : vector<2x8x8xf32>
    %111 = tpu.matmul %106, %108, %cst_33 {dimension_numbers = #tpu.dot_dimension_numbers<[2], [2], [1], [1], [0, 0, 0, 1, 1, 1], [0], [0]>} : vector<2x8x32xbf16>, vector<2x8x32xbf16>, vector<2x8x8xf32> -> vector<2x8x8xf32>
    "tpu.trace_stop"() : () -> ()
    %cst_34 = arith.constant 0.176776692 : f32
    %112 = vector.broadcast %cst_34 : f32 to vector<2x8x8xf32>
    %113 = arith.mulf %111, %112 : vector<2x8x8xf32>
    %114 = vector.broadcast %5 : vector<2x1x8xf32> to vector<2x8x8xf32>
    %115 = arith.addf %113, %114 : vector<2x8x8xf32>
    %cst_35 = arith.constant dense<0xFF800000> : vector<2x8xf32>
    %116 = vector.multi_reduction <maximumf>, %115, %cst_35 [2] : vector<2x8x8xf32> to vector<2x8xf32>
    %117 = vector.shape_cast %116 : vector<2x8xf32> to vector<2x8x1xf32>
    %118 = vector.broadcast %117 : vector<2x8x1xf32> to vector<2x8x8xf32>
    %119 = arith.subf %115, %118 : vector<2x8x8xf32>
    %120 = math.exp %119 : vector<2x8x8xf32>
    %cst_36 = arith.constant dense<0.000000e+00> : vector<2x8xf32>
    %121 = vector.multi_reduction <add>, %120, %cst_36 [2] : vector<2x8x8xf32> to vector<2x8xf32>
    %122 = vector.shape_cast %121 : vector<2x8xf32> to vector<2x8x1xf32>
    %123 = tpu.reciprocal %122 {approx = true} : vector<2x8x1xf32> -> vector<2x8x1xf32>
    %124 = vector.broadcast %123 : vector<2x8x1xf32> to vector<2x8x8xf32>
    %125 = arith.mulf %120, %124 : vector<2x8x8xf32>
    %126 = arith.truncf %125 : vector<2x8x8xf32> to vector<2x8x8xbf16>
    "tpu.trace_start"() <{level = 10 : i32, message = "bqk,bkd->bqd"}> : () -> ()
    %cst_37 = arith.constant dense<0.000000e+00> : vector<2x8x32xf32>
    %127 = tpu.matmul %126, %110, %cst_37 {dimension_numbers = #tpu.dot_dimension_numbers<[2], [1], [1], [2], [0, 0, 0, 1, 1, 2], [0], [0]>} : vector<2x8x8xbf16>, vector<2x8x32xbf16>, vector<2x8x32xf32> -> vector<2x8x32xf32>
    "tpu.trace_stop"() : () -> ()
    %128 = vector.shape_cast %127 : vector<2x8x32xf32> to vector<16x32xf32>
    %129 = vector.extract_strided_slice %52 {offsets = [0, 96], sizes = [16, 32], strides = [1, 1]} : vector<16x128xbf16> to vector<16x32xbf16>
    %130 = vector.shape_cast %129 : vector<16x32xbf16> to vector<2x8x32xbf16>
    %131 = vector.extract_strided_slice %54 {offsets = [0, 96], sizes = [16, 32], strides = [1, 1]} : vector<16x128xbf16> to vector<16x32xbf16>
    %132 = vector.shape_cast %131 : vector<16x32xbf16> to vector<2x8x32xbf16>
    %133 = vector.extract_strided_slice %56 {offsets = [0, 96], sizes = [16, 32], strides = [1, 1]} : vector<16x128xbf16> to vector<16x32xbf16>
    %134 = vector.shape_cast %133 : vector<16x32xbf16> to vector<2x8x32xbf16>
    "tpu.trace_start"() <{level = 10 : i32, message = "bqd,bkd->bqk"}> : () -> ()
    %cst_38 = arith.constant dense<0.000000e+00> : vector<2x8x8xf32>
    %135 = tpu.matmul %130, %132, %cst_38 {dimension_numbers = #tpu.dot_dimension_numbers<[2], [2], [1], [1], [0, 0, 0, 1, 1, 1], [0], [0]>} : vector<2x8x32xbf16>, vector<2x8x32xbf16>, vector<2x8x8xf32> -> vector<2x8x8xf32>
    "tpu.trace_stop"() : () -> ()
    %cst_39 = arith.constant 0.176776692 : f32
    %136 = vector.broadcast %cst_39 : f32 to vector<2x8x8xf32>
    %137 = arith.mulf %135, %136 : vector<2x8x8xf32>
    %138 = vector.broadcast %5 : vector<2x1x8xf32> to vector<2x8x8xf32>
    %139 = arith.addf %137, %138 : vector<2x8x8xf32>
    %cst_40 = arith.constant dense<0xFF800000> : vector<2x8xf32>
    %140 = vector.multi_reduction <maximumf>, %139, %cst_40 [2] : vector<2x8x8xf32> to vector<2x8xf32>
    %141 = vector.shape_cast %140 : vector<2x8xf32> to vector<2x8x1xf32>
    %142 = vector.broadcast %141 : vector<2x8x1xf32> to vector<2x8x8xf32>
    %143 = arith.subf %139, %142 : vector<2x8x8xf32>
    %144 = math.exp %143 : vector<2x8x8xf32>
    %cst_41 = arith.constant dense<0.000000e+00> : vector<2x8xf32>
    %145 = vector.multi_reduction <add>, %144, %cst_41 [2] : vector<2x8x8xf32> to vector<2x8xf32>
    %146 = vector.shape_cast %145 : vector<2x8xf32> to vector<2x8x1xf32>
    %147 = tpu.reciprocal %146 {approx = true} : vector<2x8x1xf32> -> vector<2x8x1xf32>
    %148 = vector.broadcast %147 : vector<2x8x1xf32> to vector<2x8x8xf32>
    %149 = arith.mulf %144, %148 : vector<2x8x8xf32>
    %150 = arith.truncf %149 : vector<2x8x8xf32> to vector<2x8x8xbf16>
    "tpu.trace_start"() <{level = 10 : i32, message = "bqk,bkd->bqd"}> : () -> ()
    %cst_42 = arith.constant dense<0.000000e+00> : vector<2x8x32xf32>
    %151 = tpu.matmul %150, %134, %cst_42 {dimension_numbers = #tpu.dot_dimension_numbers<[2], [1], [1], [2], [0, 0, 0, 1, 1, 2], [0], [0]>} : vector<2x8x8xbf16>, vector<2x8x32xbf16>, vector<2x8x32xf32> -> vector<2x8x32xf32>
    "tpu.trace_stop"() : () -> ()
    %152 = vector.shape_cast %151 : vector<2x8x32xf32> to vector<16x32xf32>
    %153 = tpu.concatenate %80, %104, %128, %152 in 1 : vector<16x32xf32>, vector<16x32xf32>, vector<16x32xf32>, vector<16x32xf32> -> vector<16x128xf32>
    %c0_43 = arith.constant 0 : index
    %c0_44 = arith.constant 0 : index
    %c0_45 = arith.constant 0 : index
    %154 = vector.load %arg6[%c0_43, %c0_44, %c0_45] : memref<2x128x128xbf16, #tpu.memory_space<vmem>>, vector<1x128x128xbf16>
    %155 = vector.shape_cast %154 : vector<1x128x128xbf16> to vector<128x128xbf16>
    %156 = arith.truncf %153 : vector<16x128xf32> to vector<16x128xbf16>
    %cst_46 = arith.constant dense<0.000000e+00> : vector<16x128xf32>
    %157 = tpu.matmul %156, %155, %cst_46 {dimension_numbers = #tpu.dot_dimension_numbers<[1], [0], [0], [1], [0, 0, 1, 1], [], []>} : vector<16x128xbf16>, vector<128x128xbf16>, vector<16x128xf32> -> vector<16x128xf32>
    %c4 = arith.constant 4 : index
    %c0_47 = arith.constant 0 : index
    %158 = vector.load %arg4[%c4, %c0_47] : memref<24x512xf32, #tpu.memory_space<vmem>>, vector<1x128xf32>
    %159 = vector.broadcast %158 : vector<1x128xf32> to vector<16x128xf32>
    %160 = arith.addf %157, %159 : vector<16x128xf32>
    %161 = arith.addf %43, %160 : vector<16x128xf32>
    %c5 = arith.constant 5 : index
    %c0_48 = arith.constant 0 : index
    %162 = vector.load %arg4[%c5, %c0_48] : memref<24x512xf32, #tpu.memory_space<vmem>>, vector<1x128xf32>
    %c6 = arith.constant 6 : index
    %c0_49 = arith.constant 0 : index
    %163 = vector.load %arg4[%c6, %c0_49] : memref<24x512xf32, #tpu.memory_space<vmem>>, vector<1x128xf32>
    %cst_50 = arith.constant dense<0.000000e+00> : vector<16xf32>
    %164 = vector.multi_reduction <add>, %161, %cst_50 [1] : vector<16x128xf32> to vector<16xf32>
    %165 = vector.shape_cast %164 : vector<16xf32> to vector<16x1xf32>
    %cst_51 = arith.constant 1.280000e+02 : f32
    %166 = vector.broadcast %cst_51 : f32 to vector<16x1xf32>
    %167 = arith.divf %165, %166 : vector<16x1xf32>
    %168 = vector.broadcast %167 : vector<16x1xf32> to vector<16x128xf32>
    %169 = arith.subf %161, %168 : vector<16x128xf32>
    %170 = arith.mulf %169, %169 : vector<16x128xf32>
    %cst_52 = arith.constant dense<0.000000e+00> : vector<16xf32>
    %171 = vector.multi_reduction <add>, %170, %cst_52 [1] : vector<16x128xf32> to vector<16xf32>
    %172 = vector.shape_cast %171 : vector<16xf32> to vector<16x1xf32>
    %cst_53 = arith.constant 1.280000e+02 : f32
    %173 = vector.broadcast %cst_53 : f32 to vector<16x1xf32>
    %174 = arith.divf %172, %173 : vector<16x1xf32>
    %175 = vector.broadcast %167 : vector<16x1xf32> to vector<16x128xf32>
    %176 = arith.subf %161, %175 : vector<16x128xf32>
    %cst_54 = arith.constant 9.99999996E-13 : f32
    %177 = vector.broadcast %cst_54 : f32 to vector<16x1xf32>
    %178 = arith.addf %174, %177 : vector<16x1xf32>
    %179 = math.rsqrt %178 : vector<16x1xf32>
    %180 = vector.broadcast %179 : vector<16x1xf32> to vector<16x128xf32>
    %181 = arith.mulf %176, %180 : vector<16x128xf32>
    %182 = vector.broadcast %162 : vector<1x128xf32> to vector<16x128xf32>
    %183 = arith.mulf %181, %182 : vector<16x128xf32>
    %184 = vector.broadcast %163 : vector<1x128xf32> to vector<16x128xf32>
    %185 = arith.addf %183, %184 : vector<16x128xf32>
    %c0_55 = arith.constant 0 : index
    %c0_56 = arith.constant 0 : index
    %c0_57 = arith.constant 0 : index
    %186 = vector.load %arg7[%c0_55, %c0_56, %c0_57] : memref<2x128x512xbf16, #tpu.memory_space<vmem>>, vector<1x128x512xbf16>
    %187 = vector.shape_cast %186 : vector<1x128x512xbf16> to vector<128x512xbf16>
    %188 = arith.truncf %185 : vector<16x128xf32> to vector<16x128xbf16>
    %cst_58 = arith.constant dense<0.000000e+00> : vector<16x512xf32>
    %189 = tpu.matmul %188, %187, %cst_58 {dimension_numbers = #tpu.dot_dimension_numbers<[1], [0], [0], [1], [0, 0, 1, 1], [], []>} : vector<16x128xbf16>, vector<128x512xbf16>, vector<16x512xf32> -> vector<16x512xf32>
    %c7 = arith.constant 7 : index
    %c0_59 = arith.constant 0 : index
    %190 = vector.load %arg4[%c7, %c0_59] : memref<24x512xf32, #tpu.memory_space<vmem>>, vector<1x512xf32>
    %191 = vector.broadcast %190 : vector<1x512xf32> to vector<16x512xf32>
    %192 = arith.addf %189, %191 : vector<16x512xf32>
    %193 = arith.mulf %192, %192 : vector<16x512xf32>
    %194 = arith.mulf %192, %193 : vector<16x512xf32>
    %cst_60 = arith.constant 4.471500e-02 : f32
    %195 = vector.broadcast %cst_60 : f32 to vector<16x512xf32>
    %196 = arith.mulf %195, %194 : vector<16x512xf32>
    %197 = arith.addf %192, %196 : vector<16x512xf32>
    %cst_61 = arith.constant 0.797884583 : f32
    %198 = vector.broadcast %cst_61 : f32 to vector<16x512xf32>
    %199 = arith.mulf %198, %197 : vector<16x512xf32>
    %200 = math.tanh %199 : vector<16x512xf32>
    %cst_62 = arith.constant 1.000000e+00 : f32
    %201 = vector.broadcast %cst_62 : f32 to vector<16x512xf32>
    %202 = arith.addf %201, %200 : vector<16x512xf32>
    %cst_63 = arith.constant 5.000000e-01 : f32
    %203 = vector.broadcast %cst_63 : f32 to vector<16x512xf32>
    %204 = arith.mulf %203, %202 : vector<16x512xf32>
    %205 = arith.mulf %192, %204 : vector<16x512xf32>
    %c0_64 = arith.constant 0 : index
    %c0_65 = arith.constant 0 : index
    %c0_66 = arith.constant 0 : index
    %206 = vector.load %arg8[%c0_64, %c0_65, %c0_66] : memref<2x512x128xbf16, #tpu.memory_space<vmem>>, vector<1x512x128xbf16>
    %207 = vector.shape_cast %206 : vector<1x512x128xbf16> to vector<512x128xbf16>
    %208 = arith.truncf %205 : vector<16x512xf32> to vector<16x512xbf16>
    %cst_67 = arith.constant dense<0.000000e+00> : vector<16x128xf32>
    %209 = tpu.matmul %208, %207, %cst_67 {dimension_numbers = #tpu.dot_dimension_numbers<[1], [0], [0], [1], [0, 0, 1, 1], [], []>} : vector<16x512xbf16>, vector<512x128xbf16>, vector<16x128xf32> -> vector<16x128xf32>
    %c8 = arith.constant 8 : index
    %c0_68 = arith.constant 0 : index
    %210 = vector.load %arg4[%c8, %c0_68] : memref<24x512xf32, #tpu.memory_space<vmem>>, vector<1x128xf32>
    %211 = vector.broadcast %210 : vector<1x128xf32> to vector<16x128xf32>
    %212 = arith.addf %209, %211 : vector<16x128xf32>
    %213 = arith.addf %185, %212 : vector<16x128xf32>
    %c9 = arith.constant 9 : index
    %c0_69 = arith.constant 0 : index
    %214 = vector.load %arg4[%c9, %c0_69] : memref<24x512xf32, #tpu.memory_space<vmem>>, vector<1x128xf32>
    %c10 = arith.constant 10 : index
    %c0_70 = arith.constant 0 : index
    %215 = vector.load %arg4[%c10, %c0_70] : memref<24x512xf32, #tpu.memory_space<vmem>>, vector<1x128xf32>
    %cst_71 = arith.constant dense<0.000000e+00> : vector<16xf32>
    %216 = vector.multi_reduction <add>, %213, %cst_71 [1] : vector<16x128xf32> to vector<16xf32>
    %217 = vector.shape_cast %216 : vector<16xf32> to vector<16x1xf32>
    %cst_72 = arith.constant 1.280000e+02 : f32
    %218 = vector.broadcast %cst_72 : f32 to vector<16x1xf32>
    %219 = arith.divf %217, %218 : vector<16x1xf32>
    %220 = vector.broadcast %219 : vector<16x1xf32> to vector<16x128xf32>
    %221 = arith.subf %213, %220 : vector<16x128xf32>
    %222 = arith.mulf %221, %221 : vector<16x128xf32>
    %cst_73 = arith.constant dense<0.000000e+00> : vector<16xf32>
    %223 = vector.multi_reduction <add>, %222, %cst_73 [1] : vector<16x128xf32> to vector<16xf32>
    %224 = vector.shape_cast %223 : vector<16xf32> to vector<16x1xf32>
    %cst_74 = arith.constant 1.280000e+02 : f32
    %225 = vector.broadcast %cst_74 : f32 to vector<16x1xf32>
    %226 = arith.divf %224, %225 : vector<16x1xf32>
    %227 = vector.broadcast %219 : vector<16x1xf32> to vector<16x128xf32>
    %228 = arith.subf %213, %227 : vector<16x128xf32>
    %cst_75 = arith.constant 9.99999996E-13 : f32
    %229 = vector.broadcast %cst_75 : f32 to vector<16x1xf32>
    %230 = arith.addf %226, %229 : vector<16x1xf32>
    %231 = math.rsqrt %230 : vector<16x1xf32>
    %232 = vector.broadcast %231 : vector<16x1xf32> to vector<16x128xf32>
    %233 = arith.mulf %228, %232 : vector<16x128xf32>
    %234 = vector.broadcast %214 : vector<1x128xf32> to vector<16x128xf32>
    %235 = arith.mulf %233, %234 : vector<16x128xf32>
    %236 = vector.broadcast %215 : vector<1x128xf32> to vector<16x128xf32>
    %237 = arith.addf %235, %236 : vector<16x128xf32>
    %c1_76 = arith.constant 1 : index
    %c0_77 = arith.constant 0 : index
    %c0_78 = arith.constant 0 : index
    %238 = vector.load %arg5[%c1_76, %c0_77, %c0_78] : memref<2x128x384xbf16, #tpu.memory_space<vmem>>, vector<1x128x384xbf16>
    %239 = vector.shape_cast %238 : vector<1x128x384xbf16> to vector<128x384xbf16>
    %240 = arith.truncf %237 : vector<16x128xf32> to vector<16x128xbf16>
    %cst_79 = arith.constant dense<0.000000e+00> : vector<16x384xf32>
    %241 = tpu.matmul %240, %239, %cst_79 {dimension_numbers = #tpu.dot_dimension_numbers<[1], [0], [0], [1], [0, 0, 1, 1], [], []>} : vector<16x128xbf16>, vector<128x384xbf16>, vector<16x384xf32> -> vector<16x384xf32>
    %c11 = arith.constant 11 : index
    %c0_80 = arith.constant 0 : index
    %242 = vector.load %arg4[%c11, %c0_80] : memref<24x512xf32, #tpu.memory_space<vmem>>, vector<1x384xf32>
    %243 = vector.broadcast %242 : vector<1x384xf32> to vector<16x384xf32>
    %244 = arith.addf %241, %243 : vector<16x384xf32>
    %245 = vector.extract_strided_slice %244 {offsets = [0, 0], sizes = [16, 128], strides = [1, 1]} : vector<16x384xf32> to vector<16x128xf32>
    %246 = arith.truncf %245 : vector<16x128xf32> to vector<16x128xbf16>
    %247 = vector.extract_strided_slice %244 {offsets = [0, 128], sizes = [16, 128], strides = [1, 1]} : vector<16x384xf32> to vector<16x128xf32>
    %248 = arith.truncf %247 : vector<16x128xf32> to vector<16x128xbf16>
    %249 = vector.extract_strided_slice %244 {offsets = [0, 256], sizes = [16, 128], strides = [1, 1]} : vector<16x384xf32> to vector<16x128xf32>
    %250 = arith.truncf %249 : vector<16x128xf32> to vector<16x128xbf16>
    %251 = vector.extract_strided_slice %246 {offsets = [0, 0], sizes = [16, 32], strides = [1, 1]} : vector<16x128xbf16> to vector<16x32xbf16>
    %252 = vector.shape_cast %251 : vector<16x32xbf16> to vector<2x8x32xbf16>
    %253 = vector.extract_strided_slice %248 {offsets = [0, 0], sizes = [16, 32], strides = [1, 1]} : vector<16x128xbf16> to vector<16x32xbf16>
    %254 = vector.shape_cast %253 : vector<16x32xbf16> to vector<2x8x32xbf16>
    %255 = vector.extract_strided_slice %250 {offsets = [0, 0], sizes = [16, 32], strides = [1, 1]} : vector<16x128xbf16> to vector<16x32xbf16>
    %256 = vector.shape_cast %255 : vector<16x32xbf16> to vector<2x8x32xbf16>
    "tpu.trace_start"() <{level = 10 : i32, message = "bqd,bkd->bqk"}> : () -> ()
    %cst_81 = arith.constant dense<0.000000e+00> : vector<2x8x8xf32>
    %257 = tpu.matmul %252, %254, %cst_81 {dimension_numbers = #tpu.dot_dimension_numbers<[2], [2], [1], [1], [0, 0, 0, 1, 1, 1], [0], [0]>} : vector<2x8x32xbf16>, vector<2x8x32xbf16>, vector<2x8x8xf32> -> vector<2x8x8xf32>
    "tpu.trace_stop"() : () -> ()
    %cst_82 = arith.constant 0.176776692 : f32
    %258 = vector.broadcast %cst_82 : f32 to vector<2x8x8xf32>
    %259 = arith.mulf %257, %258 : vector<2x8x8xf32>
    %260 = vector.broadcast %5 : vector<2x1x8xf32> to vector<2x8x8xf32>
    %261 = arith.addf %259, %260 : vector<2x8x8xf32>
    %cst_83 = arith.constant dense<0xFF800000> : vector<2x8xf32>
    %262 = vector.multi_reduction <maximumf>, %261, %cst_83 [2] : vector<2x8x8xf32> to vector<2x8xf32>
    %263 = vector.shape_cast %262 : vector<2x8xf32> to vector<2x8x1xf32>
    %264 = vector.broadcast %263 : vector<2x8x1xf32> to vector<2x8x8xf32>
    %265 = arith.subf %261, %264 : vector<2x8x8xf32>
    %266 = math.exp %265 : vector<2x8x8xf32>
    %cst_84 = arith.constant dense<0.000000e+00> : vector<2x8xf32>
    %267 = vector.multi_reduction <add>, %266, %cst_84 [2] : vector<2x8x8xf32> to vector<2x8xf32>
    %268 = vector.shape_cast %267 : vector<2x8xf32> to vector<2x8x1xf32>
    %269 = tpu.reciprocal %268 {approx = true} : vector<2x8x1xf32> -> vector<2x8x1xf32>
    %270 = vector.broadcast %269 : vector<2x8x1xf32> to vector<2x8x8xf32>
    %271 = arith.mulf %266, %270 : vector<2x8x8xf32>
    %272 = arith.truncf %271 : vector<2x8x8xf32> to vector<2x8x8xbf16>
    "tpu.trace_start"() <{level = 10 : i32, message = "bqk,bkd->bqd"}> : () -> ()
    %cst_85 = arith.constant dense<0.000000e+00> : vector<2x8x32xf32>
    %273 = tpu.matmul %272, %256, %cst_85 {dimension_numbers = #tpu.dot_dimension_numbers<[2], [1], [1], [2], [0, 0, 0, 1, 1, 2], [0], [0]>} : vector<2x8x8xbf16>, vector<2x8x32xbf16>, vector<2x8x32xf32> -> vector<2x8x32xf32>
    "tpu.trace_stop"() : () -> ()
    %274 = vector.shape_cast %273 : vector<2x8x32xf32> to vector<16x32xf32>
    %275 = vector.extract_strided_slice %246 {offsets = [0, 32], sizes = [16, 32], strides = [1, 1]} : vector<16x128xbf16> to vector<16x32xbf16>
    %276 = vector.shape_cast %275 : vector<16x32xbf16> to vector<2x8x32xbf16>
    %277 = vector.extract_strided_slice %248 {offsets = [0, 32], sizes = [16, 32], strides = [1, 1]} : vector<16x128xbf16> to vector<16x32xbf16>
    %278 = vector.shape_cast %277 : vector<16x32xbf16> to vector<2x8x32xbf16>
    %279 = vector.extract_strided_slice %250 {offsets = [0, 32], sizes = [16, 32], strides = [1, 1]} : vector<16x128xbf16> to vector<16x32xbf16>
    %280 = vector.shape_cast %279 : vector<16x32xbf16> to vector<2x8x32xbf16>
    "tpu.trace_start"() <{level = 10 : i32, message = "bqd,bkd->bqk"}> : () -> ()
    %cst_86 = arith.constant dense<0.000000e+00> : vector<2x8x8xf32>
    %281 = tpu.matmul %276, %278, %cst_86 {dimension_numbers = #tpu.dot_dimension_numbers<[2], [2], [1], [1], [0, 0, 0, 1, 1, 1], [0], [0]>} : vector<2x8x32xbf16>, vector<2x8x32xbf16>, vector<2x8x8xf32> -> vector<2x8x8xf32>
    "tpu.trace_stop"() : () -> ()
    %cst_87 = arith.constant 0.176776692 : f32
    %282 = vector.broadcast %cst_87 : f32 to vector<2x8x8xf32>
    %283 = arith.mulf %281, %282 : vector<2x8x8xf32>
    %284 = vector.broadcast %5 : vector<2x1x8xf32> to vector<2x8x8xf32>
    %285 = arith.addf %283, %284 : vector<2x8x8xf32>
    %cst_88 = arith.constant dense<0xFF800000> : vector<2x8xf32>
    %286 = vector.multi_reduction <maximumf>, %285, %cst_88 [2] : vector<2x8x8xf32> to vector<2x8xf32>
    %287 = vector.shape_cast %286 : vector<2x8xf32> to vector<2x8x1xf32>
    %288 = vector.broadcast %287 : vector<2x8x1xf32> to vector<2x8x8xf32>
    %289 = arith.subf %285, %288 : vector<2x8x8xf32>
    %290 = math.exp %289 : vector<2x8x8xf32>
    %cst_89 = arith.constant dense<0.000000e+00> : vector<2x8xf32>
    %291 = vector.multi_reduction <add>, %290, %cst_89 [2] : vector<2x8x8xf32> to vector<2x8xf32>
    %292 = vector.shape_cast %291 : vector<2x8xf32> to vector<2x8x1xf32>
    %293 = tpu.reciprocal %292 {approx = true} : vector<2x8x1xf32> -> vector<2x8x1xf32>
    %294 = vector.broadcast %293 : vector<2x8x1xf32> to vector<2x8x8xf32>
    %295 = arith.mulf %290, %294 : vector<2x8x8xf32>
    %296 = arith.truncf %295 : vector<2x8x8xf32> to vector<2x8x8xbf16>
    "tpu.trace_start"() <{level = 10 : i32, message = "bqk,bkd->bqd"}> : () -> ()
    %cst_90 = arith.constant dense<0.000000e+00> : vector<2x8x32xf32>
    %297 = tpu.matmul %296, %280, %cst_90 {dimension_numbers = #tpu.dot_dimension_numbers<[2], [1], [1], [2], [0, 0, 0, 1, 1, 2], [0], [0]>} : vector<2x8x8xbf16>, vector<2x8x32xbf16>, vector<2x8x32xf32> -> vector<2x8x32xf32>
    "tpu.trace_stop"() : () -> ()
    %298 = vector.shape_cast %297 : vector<2x8x32xf32> to vector<16x32xf32>
    %299 = vector.extract_strided_slice %246 {offsets = [0, 64], sizes = [16, 32], strides = [1, 1]} : vector<16x128xbf16> to vector<16x32xbf16>
    %300 = vector.shape_cast %299 : vector<16x32xbf16> to vector<2x8x32xbf16>
    %301 = vector.extract_strided_slice %248 {offsets = [0, 64], sizes = [16, 32], strides = [1, 1]} : vector<16x128xbf16> to vector<16x32xbf16>
    %302 = vector.shape_cast %301 : vector<16x32xbf16> to vector<2x8x32xbf16>
    %303 = vector.extract_strided_slice %250 {offsets = [0, 64], sizes = [16, 32], strides = [1, 1]} : vector<16x128xbf16> to vector<16x32xbf16>
    %304 = vector.shape_cast %303 : vector<16x32xbf16> to vector<2x8x32xbf16>
    "tpu.trace_start"() <{level = 10 : i32, message = "bqd,bkd->bqk"}> : () -> ()
    %cst_91 = arith.constant dense<0.000000e+00> : vector<2x8x8xf32>
    %305 = tpu.matmul %300, %302, %cst_91 {dimension_numbers = #tpu.dot_dimension_numbers<[2], [2], [1], [1], [0, 0, 0, 1, 1, 1], [0], [0]>} : vector<2x8x32xbf16>, vector<2x8x32xbf16>, vector<2x8x8xf32> -> vector<2x8x8xf32>
    "tpu.trace_stop"() : () -> ()
    %cst_92 = arith.constant 0.176776692 : f32
    %306 = vector.broadcast %cst_92 : f32 to vector<2x8x8xf32>
    %307 = arith.mulf %305, %306 : vector<2x8x8xf32>
    %308 = vector.broadcast %5 : vector<2x1x8xf32> to vector<2x8x8xf32>
    %309 = arith.addf %307, %308 : vector<2x8x8xf32>
    %cst_93 = arith.constant dense<0xFF800000> : vector<2x8xf32>
    %310 = vector.multi_reduction <maximumf>, %309, %cst_93 [2] : vector<2x8x8xf32> to vector<2x8xf32>
    %311 = vector.shape_cast %310 : vector<2x8xf32> to vector<2x8x1xf32>
    %312 = vector.broadcast %311 : vector<2x8x1xf32> to vector<2x8x8xf32>
    %313 = arith.subf %309, %312 : vector<2x8x8xf32>
    %314 = math.exp %313 : vector<2x8x8xf32>
    %cst_94 = arith.constant dense<0.000000e+00> : vector<2x8xf32>
    %315 = vector.multi_reduction <add>, %314, %cst_94 [2] : vector<2x8x8xf32> to vector<2x8xf32>
    %316 = vector.shape_cast %315 : vector<2x8xf32> to vector<2x8x1xf32>
    %317 = tpu.reciprocal %316 {approx = true} : vector<2x8x1xf32> -> vector<2x8x1xf32>
    %318 = vector.broadcast %317 : vector<2x8x1xf32> to vector<2x8x8xf32>
    %319 = arith.mulf %314, %318 : vector<2x8x8xf32>
    %320 = arith.truncf %319 : vector<2x8x8xf32> to vector<2x8x8xbf16>
    "tpu.trace_start"() <{level = 10 : i32, message = "bqk,bkd->bqd"}> : () -> ()
    %cst_95 = arith.constant dense<0.000000e+00> : vector<2x8x32xf32>
    %321 = tpu.matmul %320, %304, %cst_95 {dimension_numbers = #tpu.dot_dimension_numbers<[2], [1], [1], [2], [0, 0, 0, 1, 1, 2], [0], [0]>} : vector<2x8x8xbf16>, vector<2x8x32xbf16>, vector<2x8x32xf32> -> vector<2x8x32xf32>
    "tpu.trace_stop"() : () -> ()
    %322 = vector.shape_cast %321 : vector<2x8x32xf32> to vector<16x32xf32>
    %323 = vector.extract_strided_slice %246 {offsets = [0, 96], sizes = [16, 32], strides = [1, 1]} : vector<16x128xbf16> to vector<16x32xbf16>
    %324 = vector.shape_cast %323 : vector<16x32xbf16> to vector<2x8x32xbf16>
    %325 = vector.extract_strided_slice %248 {offsets = [0, 96], sizes = [16, 32], strides = [1, 1]} : vector<16x128xbf16> to vector<16x32xbf16>
    %326 = vector.shape_cast %325 : vector<16x32xbf16> to vector<2x8x32xbf16>
    %327 = vector.extract_strided_slice %250 {offsets = [0, 96], sizes = [16, 32], strides = [1, 1]} : vector<16x128xbf16> to vector<16x32xbf16>
    %328 = vector.shape_cast %327 : vector<16x32xbf16> to vector<2x8x32xbf16>
    "tpu.trace_start"() <{level = 10 : i32, message = "bqd,bkd->bqk"}> : () -> ()
    %cst_96 = arith.constant dense<0.000000e+00> : vector<2x8x8xf32>
    %329 = tpu.matmul %324, %326, %cst_96 {dimension_numbers = #tpu.dot_dimension_numbers<[2], [2], [1], [1], [0, 0, 0, 1, 1, 1], [0], [0]>} : vector<2x8x32xbf16>, vector<2x8x32xbf16>, vector<2x8x8xf32> -> vector<2x8x8xf32>
    "tpu.trace_stop"() : () -> ()
    %cst_97 = arith.constant 0.176776692 : f32
    %330 = vector.broadcast %cst_97 : f32 to vector<2x8x8xf32>
    %331 = arith.mulf %329, %330 : vector<2x8x8xf32>
    %332 = vector.broadcast %5 : vector<2x1x8xf32> to vector<2x8x8xf32>
    %333 = arith.addf %331, %332 : vector<2x8x8xf32>
    %cst_98 = arith.constant dense<0xFF800000> : vector<2x8xf32>
    %334 = vector.multi_reduction <maximumf>, %333, %cst_98 [2] : vector<2x8x8xf32> to vector<2x8xf32>
    %335 = vector.shape_cast %334 : vector<2x8xf32> to vector<2x8x1xf32>
    %336 = vector.broadcast %335 : vector<2x8x1xf32> to vector<2x8x8xf32>
    %337 = arith.subf %333, %336 : vector<2x8x8xf32>
    %338 = math.exp %337 : vector<2x8x8xf32>
    %cst_99 = arith.constant dense<0.000000e+00> : vector<2x8xf32>
    %339 = vector.multi_reduction <add>, %338, %cst_99 [2] : vector<2x8x8xf32> to vector<2x8xf32>
    %340 = vector.shape_cast %339 : vector<2x8xf32> to vector<2x8x1xf32>
    %341 = tpu.reciprocal %340 {approx = true} : vector<2x8x1xf32> -> vector<2x8x1xf32>
    %342 = vector.broadcast %341 : vector<2x8x1xf32> to vector<2x8x8xf32>
    %343 = arith.mulf %338, %342 : vector<2x8x8xf32>
    %344 = arith.truncf %343 : vector<2x8x8xf32> to vector<2x8x8xbf16>
    "tpu.trace_start"() <{level = 10 : i32, message = "bqk,bkd->bqd"}> : () -> ()
    %cst_100 = arith.constant dense<0.000000e+00> : vector<2x8x32xf32>
    %345 = tpu.matmul %344, %328, %cst_100 {dimension_numbers = #tpu.dot_dimension_numbers<[2], [1], [1], [2], [0, 0, 0, 1, 1, 2], [0], [0]>} : vector<2x8x8xbf16>, vector<2x8x32xbf16>, vector<2x8x32xf32> -> vector<2x8x32xf32>
    "tpu.trace_stop"() : () -> ()
    %346 = vector.shape_cast %345 : vector<2x8x32xf32> to vector<16x32xf32>
    %347 = tpu.concatenate %274, %298, %322, %346 in 1 : vector<16x32xf32>, vector<16x32xf32>, vector<16x32xf32>, vector<16x32xf32> -> vector<16x128xf32>
    %c1_101 = arith.constant 1 : index
    %c0_102 = arith.constant 0 : index
    %c0_103 = arith.constant 0 : index
    %348 = vector.load %arg6[%c1_101, %c0_102, %c0_103] : memref<2x128x128xbf16, #tpu.memory_space<vmem>>, vector<1x128x128xbf16>
    %349 = vector.shape_cast %348 : vector<1x128x128xbf16> to vector<128x128xbf16>
    %350 = arith.truncf %347 : vector<16x128xf32> to vector<16x128xbf16>
    %cst_104 = arith.constant dense<0.000000e+00> : vector<16x128xf32>
    %351 = tpu.matmul %350, %349, %cst_104 {dimension_numbers = #tpu.dot_dimension_numbers<[1], [0], [0], [1], [0, 0, 1, 1], [], []>} : vector<16x128xbf16>, vector<128x128xbf16>, vector<16x128xf32> -> vector<16x128xf32>
    %c12 = arith.constant 12 : index
    %c0_105 = arith.constant 0 : index
    %352 = vector.load %arg4[%c12, %c0_105] : memref<24x512xf32, #tpu.memory_space<vmem>>, vector<1x128xf32>
    %353 = vector.broadcast %352 : vector<1x128xf32> to vector<16x128xf32>
    %354 = arith.addf %351, %353 : vector<16x128xf32>
    %355 = arith.addf %237, %354 : vector<16x128xf32>
    %c13 = arith.constant 13 : index
    %c0_106 = arith.constant 0 : index
    %356 = vector.load %arg4[%c13, %c0_106] : memref<24x512xf32, #tpu.memory_space<vmem>>, vector<1x128xf32>
    %c14 = arith.constant 14 : index
    %c0_107 = arith.constant 0 : index
    %357 = vector.load %arg4[%c14, %c0_107] : memref<24x512xf32, #tpu.memory_space<vmem>>, vector<1x128xf32>
    %cst_108 = arith.constant dense<0.000000e+00> : vector<16xf32>
    %358 = vector.multi_reduction <add>, %355, %cst_108 [1] : vector<16x128xf32> to vector<16xf32>
    %359 = vector.shape_cast %358 : vector<16xf32> to vector<16x1xf32>
    %cst_109 = arith.constant 1.280000e+02 : f32
    %360 = vector.broadcast %cst_109 : f32 to vector<16x1xf32>
    %361 = arith.divf %359, %360 : vector<16x1xf32>
    %362 = vector.broadcast %361 : vector<16x1xf32> to vector<16x128xf32>
    %363 = arith.subf %355, %362 : vector<16x128xf32>
    %364 = arith.mulf %363, %363 : vector<16x128xf32>
    %cst_110 = arith.constant dense<0.000000e+00> : vector<16xf32>
    %365 = vector.multi_reduction <add>, %364, %cst_110 [1] : vector<16x128xf32> to vector<16xf32>
    %366 = vector.shape_cast %365 : vector<16xf32> to vector<16x1xf32>
    %cst_111 = arith.constant 1.280000e+02 : f32
    %367 = vector.broadcast %cst_111 : f32 to vector<16x1xf32>
    %368 = arith.divf %366, %367 : vector<16x1xf32>
    %369 = vector.broadcast %361 : vector<16x1xf32> to vector<16x128xf32>
    %370 = arith.subf %355, %369 : vector<16x128xf32>
    %cst_112 = arith.constant 9.99999996E-13 : f32
    %371 = vector.broadcast %cst_112 : f32 to vector<16x1xf32>
    %372 = arith.addf %368, %371 : vector<16x1xf32>
    %373 = math.rsqrt %372 : vector<16x1xf32>
    %374 = vector.broadcast %373 : vector<16x1xf32> to vector<16x128xf32>
    %375 = arith.mulf %370, %374 : vector<16x128xf32>
    %376 = vector.broadcast %356 : vector<1x128xf32> to vector<16x128xf32>
    %377 = arith.mulf %375, %376 : vector<16x128xf32>
    %378 = vector.broadcast %357 : vector<1x128xf32> to vector<16x128xf32>
    %379 = arith.addf %377, %378 : vector<16x128xf32>
    %c1_113 = arith.constant 1 : index
    %c0_114 = arith.constant 0 : index
    %c0_115 = arith.constant 0 : index
    %380 = vector.load %arg7[%c1_113, %c0_114, %c0_115] : memref<2x128x512xbf16, #tpu.memory_space<vmem>>, vector<1x128x512xbf16>
    %381 = vector.shape_cast %380 : vector<1x128x512xbf16> to vector<128x512xbf16>
    %382 = arith.truncf %379 : vector<16x128xf32> to vector<16x128xbf16>
    %cst_116 = arith.constant dense<0.000000e+00> : vector<16x512xf32>
    %383 = tpu.matmul %382, %381, %cst_116 {dimension_numbers = #tpu.dot_dimension_numbers<[1], [0], [0], [1], [0, 0, 1, 1], [], []>} : vector<16x128xbf16>, vector<128x512xbf16>, vector<16x512xf32> -> vector<16x512xf32>
    %c15 = arith.constant 15 : index
    %c0_117 = arith.constant 0 : index
    %384 = vector.load %arg4[%c15, %c0_117] : memref<24x512xf32, #tpu.memory_space<vmem>>, vector<1x512xf32>
    %385 = vector.broadcast %384 : vector<1x512xf32> to vector<16x512xf32>
    %386 = arith.addf %383, %385 : vector<16x512xf32>
    %387 = arith.mulf %386, %386 : vector<16x512xf32>
    %388 = arith.mulf %386, %387 : vector<16x512xf32>
    %cst_118 = arith.constant 4.471500e-02 : f32
    %389 = vector.broadcast %cst_118 : f32 to vector<16x512xf32>
    %390 = arith.mulf %389, %388 : vector<16x512xf32>
    %391 = arith.addf %386, %390 : vector<16x512xf32>
    %cst_119 = arith.constant 0.797884583 : f32
    %392 = vector.broadcast %cst_119 : f32 to vector<16x512xf32>
    %393 = arith.mulf %392, %391 : vector<16x512xf32>
    %394 = math.tanh %393 : vector<16x512xf32>
    %cst_120 = arith.constant 1.000000e+00 : f32
    %395 = vector.broadcast %cst_120 : f32 to vector<16x512xf32>
    %396 = arith.addf %395, %394 : vector<16x512xf32>
    %cst_121 = arith.constant 5.000000e-01 : f32
    %397 = vector.broadcast %cst_121 : f32 to vector<16x512xf32>
    %398 = arith.mulf %397, %396 : vector<16x512xf32>
    %399 = arith.mulf %386, %398 : vector<16x512xf32>
    %c1_122 = arith.constant 1 : index
    %c0_123 = arith.constant 0 : index
    %c0_124 = arith.constant 0 : index
    %400 = vector.load %arg8[%c1_122, %c0_123, %c0_124] : memref<2x512x128xbf16, #tpu.memory_space<vmem>>, vector<1x512x128xbf16>
    %401 = vector.shape_cast %400 : vector<1x512x128xbf16> to vector<512x128xbf16>
    %402 = arith.truncf %399 : vector<16x512xf32> to vector<16x512xbf16>
    %cst_125 = arith.constant dense<0.000000e+00> : vector<16x128xf32>
    %403 = tpu.matmul %402, %401, %cst_125 {dimension_numbers = #tpu.dot_dimension_numbers<[1], [0], [0], [1], [0, 0, 1, 1], [], []>} : vector<16x512xbf16>, vector<512x128xbf16>, vector<16x128xf32> -> vector<16x128xf32>
    %c16 = arith.constant 16 : index
    %c0_126 = arith.constant 0 : index
    %404 = vector.load %arg4[%c16, %c0_126] : memref<24x512xf32, #tpu.memory_space<vmem>>, vector<1x128xf32>
    %405 = vector.broadcast %404 : vector<1x128xf32> to vector<16x128xf32>
    %406 = arith.addf %403, %405 : vector<16x128xf32>
    %407 = arith.addf %379, %406 : vector<16x128xf32>
    %c17 = arith.constant 17 : index
    %c0_127 = arith.constant 0 : index
    %408 = vector.load %arg4[%c17, %c0_127] : memref<24x512xf32, #tpu.memory_space<vmem>>, vector<1x128xf32>
    %c18 = arith.constant 18 : index
    %c0_128 = arith.constant 0 : index
    %409 = vector.load %arg4[%c18, %c0_128] : memref<24x512xf32, #tpu.memory_space<vmem>>, vector<1x128xf32>
    %cst_129 = arith.constant dense<0.000000e+00> : vector<16xf32>
    %410 = vector.multi_reduction <add>, %407, %cst_129 [1] : vector<16x128xf32> to vector<16xf32>
    %411 = vector.shape_cast %410 : vector<16xf32> to vector<16x1xf32>
    %cst_130 = arith.constant 1.280000e+02 : f32
    %412 = vector.broadcast %cst_130 : f32 to vector<16x1xf32>
    %413 = arith.divf %411, %412 : vector<16x1xf32>
    %414 = vector.broadcast %413 : vector<16x1xf32> to vector<16x128xf32>
    %415 = arith.subf %407, %414 : vector<16x128xf32>
    %416 = arith.mulf %415, %415 : vector<16x128xf32>
    %cst_131 = arith.constant dense<0.000000e+00> : vector<16xf32>
    %417 = vector.multi_reduction <add>, %416, %cst_131 [1] : vector<16x128xf32> to vector<16xf32>
    %418 = vector.shape_cast %417 : vector<16xf32> to vector<16x1xf32>
    %cst_132 = arith.constant 1.280000e+02 : f32
    %419 = vector.broadcast %cst_132 : f32 to vector<16x1xf32>
    %420 = arith.divf %418, %419 : vector<16x1xf32>
    %421 = vector.broadcast %413 : vector<16x1xf32> to vector<16x128xf32>
    %422 = arith.subf %407, %421 : vector<16x128xf32>
    %cst_133 = arith.constant 9.99999996E-13 : f32
    %423 = vector.broadcast %cst_133 : f32 to vector<16x1xf32>
    %424 = arith.addf %420, %423 : vector<16x1xf32>
    %425 = math.rsqrt %424 : vector<16x1xf32>
    %426 = vector.broadcast %425 : vector<16x1xf32> to vector<16x128xf32>
    %427 = arith.mulf %422, %426 : vector<16x128xf32>
    %428 = vector.broadcast %408 : vector<1x128xf32> to vector<16x128xf32>
    %429 = arith.mulf %427, %428 : vector<16x128xf32>
    %430 = vector.broadcast %409 : vector<1x128xf32> to vector<16x128xf32>
    %431 = arith.addf %429, %430 : vector<16x128xf32>
    %432 = vector.shape_cast %431 : vector<16x128xf32> to vector<2x8x128xf32>
    %433 = vector.shape_cast %0 : vector<2x8xf32> to vector<2x8x1xf32>
    %434 = vector.broadcast %433 : vector<2x8x1xf32> to vector<2x8x128xf32>
    %435 = arith.mulf %432, %434 : vector<2x8x128xf32>
    %cst_134 = arith.constant dense<0.000000e+00> : vector<2x128xf32>
    %436 = vector.multi_reduction <add>, %435, %cst_134 [1] : vector<2x8x128xf32> to vector<2x128xf32>
    %cst_135 = arith.constant dense<0.000000e+00> : vector<2xf32>
    %437 = vector.multi_reduction <add>, %0, %cst_135 [1] : vector<2x8xf32> to vector<2xf32>
    %438 = vector.shape_cast %437 : vector<2xf32> to vector<2x1xf32>
    %cst_136 = arith.constant 1.000000e+00 : f32
    %439 = vector.broadcast %cst_136 : f32 to vector<2x1xf32>
    %440 = arith.maximumf %438, %439 : vector<2x1xf32>
    %441 = vector.broadcast %440 : vector<2x1xf32> to vector<2x128xf32>
    %442 = arith.divf %436, %441 : vector<2x128xf32>
    %c0_137 = arith.constant 0 : index
    %c0_138 = arith.constant 0 : index
    %443 = vector.load %arg9[%c0_137, %c0_138] : memref<2x128xf32, #tpu.memory_space<vmem>>, vector<2x128xf32>
    tpu.vector_store %arg9[%c0_137, %c0_138], %442 {strides = array<i32>} : memref<2x128xf32, #tpu.memory_space<vmem>>, vector<2x128xf32>,
    return
  }
}

</mosaic_0001>

<bundles_post_ra>
// kernel: pearl_small_forward.1
= control target key start
LH: loop header
LB: loop body
LE: loop exit
PB: predicated region body
PF: predicated region fallthrough
CT: control target
= control target key end

     0   :  { %14 = vsyncpa [#allocation3], 0  ;;  %s5360_s0 = inlined_call_operand.vmem [shape: s32[16,1], index: 0, kind: input, shape index: {}]   ;;  %s5361_s1 = inlined_call_operand.vmem [shape: f32[2,8], index: 1, kind: input, shape index: {}]   ;;  %s5362_s2 = inlined_call_operand.hbm [shape: f32[128,128], index: 2, kind: input, shape index: {}]   ;;  %s5363_s3 = inlined_call_operand.hbm [shape: f32[128,128], index: 3, kind: input, shape index: {}]   ;;  %s5364_s4 = inlined_call_operand.hbm [shape: f32[24,512], index: 4, kind: input, shape index: {}]   ;;  %s5365_s5 = inlined_call_operand.hbm [shape: bf16[2,128,384], index: 5, kind: input, shape index: {}]   ;;  %s5366_s6 = inlined_call_operand.hbm [shape: bf16[2,128,128], index: 6, kind: input, shape index: {}]   ;;  %s5367_s7 = inlined_call_operand.hbm [shape: bf16[2,128,512], index: 7, kind: input, shape index: {}]   ;;  %s5368_s8 = inlined_call_operand.hbm [shape: bf16[2,512,128], index: 8, kind: input, shape index: {}]   ;;  %s5369_s9 = inlined_call_operand.hbm [shape: f32[2,128], index: 9, kind: output, shape index: {}]  }
   0x1   :  { %15 = vsyncpa [#allocation6], 0 }
   0x2   :  { %16 = vsyncpa [#allocation9], 0 }
   0x3   :  { %17 = vsyncpa [#allocation12], 0 }
   0x4   :  { %18 = vsyncpa [#allocation4], 0  ;;  %s40_s11 = sshll.u32 %s5363_s3, 4  ;;  %s4834_s12 = smov [#allocation5]   ;;  %s41_s11 = int_to_ptr.hbm [resolvable:$true] %s40_s11 }
   0x5   :  { %s42_s13 = sshll.u32 %s4834_s12, 4  ;;  %s66_s16 = sshll.u32 %s5365_s5, 4  ;;  %s43_s13 = int_to_ptr.vmem [resolvable:$true] %s42_s13  ;;  %s67_s16 = int_to_ptr.hbm [resolvable:$true] %s66_s16 }
   0x6   :  { %s4835_s17 = smov 128   ;;  %s4836_s18 = smov 8  }
   0x7   :  { %48 = dma.hbm_to_vmem [thread:$0]  %s41_s11, 2048, %s43_s13, [#allocation6], %s4835_s17, %s4835_s17, %s4836_s18  }
   0x8   :  { %s4837_s19 = smov [#allocation8]   ;;  %s4838_s21 = smov 192  }
   0x9   :  { %s68_s20 = sshll.u32 %s4837_s19, 4  ;;  %s4839_s22 = smov 12   ;;  %s69_s20 = int_to_ptr.vmem [resolvable:$true] %s68_s20 }
   0xa   :  { %74 = dma.hbm_to_vmem [thread:$0]  %s67_s16, 6144, %s69_s20, [#allocation9], %s4838_s21, %s4838_s21, %s4839_s22  }
   0xb   :  { %s92_s24 = sshll.u32 %s5367_s7, 4  ;;  %s4840_s25 = smov [#allocation11]   ;;  %s93_s24 = int_to_ptr.hbm [resolvable:$true] %s92_s24 }
   0xc   :  { %s94_s26 = sshll.u32 %s4840_s25, 4  ;;  %s27_s28 = sshll.u32 %s5362_s2, 4  ;;  %s95_s26 = int_to_ptr.vmem [resolvable:$true] %s94_s26  ;;  %s28_s28 = int_to_ptr.hbm [resolvable:$true] %s27_s28 }
   0xd   :  { %s4841_s29 = smov 256   ;;  %s4842_s30 = smov 16  }
   0xe   :  { %100 = dma.hbm_to_vmem [thread:$0]  %s93_s24, 8192, %s95_s26, [#allocation12], %s4841_s29, %s4841_s29, %s4842_s30  }
   0xf   :  { %s4843_s10 = smov [#allocation2]   ;;  %s53_s14 = sshll.u32 %s5364_s4, 4  ;;  %s54_s14 = int_to_ptr.hbm [resolvable:$true] %s53_s14 }
  0x10   :  { %s29_s11 = sshll.u32 %s4843_s10, 4  ;;  %s4844_s7 = smov [#allocation7]   ;;  %s30_s11 = int_to_ptr.vmem [resolvable:$true] %s29_s11 }
  0x11   :  { %35 = dma.hbm_to_vmem [thread:$0]  %s28_s28, 2048, %s30_s11, [#allocation3], %s4835_s17, %s4835_s17, %s4836_s18  }
  0x12   :  { %s55_s15 = sshll.u32 %s4844_s7, 4  ;;  %s79_s2 = sshll.u32 %s5366_s6, 4  ;;  %s56_s15 = int_to_ptr.vmem [resolvable:$true] %s55_s15  ;;  %s80_s2 = int_to_ptr.hbm [resolvable:$true] %s79_s2 }
  0x13   :  { %s4845_s20 = smov 512   ;;  %s4846_s21 = smov 32  }
  0x14   :  { %61 = dma.hbm_to_vmem [thread:$0]  %s54_s14, 1536, %s56_s15, [#allocation6], %s4845_s20, %s4845_s20, %s4846_s21  }
  0x15   :  { %s4847_s22 = smov [#allocation10]   ;;  %s4848_s3 = smov 64  }
  0x16   :  { %s81_s23 = sshll.u32 %s4847_s22, 4  ;;  %s4849_s4 = smov 4   ;;  %s82_s23 = int_to_ptr.vmem [resolvable:$true] %s81_s23 }
  0x17   :  { %87 = dma.hbm_to_vmem [thread:$0]  %s80_s2, 2048, %s82_s23, [#allocation9], %s4848_s3, %s4848_s3, %s4849_s4  }
  0x18   :  { %s105_s24 = sshll.u32 %s5368_s8, 4  ;;  %s4850_s25 = smov [#allocation13]   ;;  %s106_s24 = int_to_ptr.hbm [resolvable:$true] %s105_s24 }
  0x19   :  { %s107_s6 = sshll.u32 %s4850_s25, 4  ;;  %s108_s6 = int_to_ptr.vmem [resolvable:$true] %s107_s6 }
  0x1a   :  { %113 = dma.hbm_to_vmem [thread:$0]  %s106_s24, 8192, %s108_s6, [#allocation12], %s4848_s3, %s4848_s3, %s4849_s4  }
  0x1b   :  { %4824 = dma.done.wait [#allocation3], 2048  }
  0x1c   :  { %4825 = vsyncadd [#allocation3], 4294965248 }
  0x1d   :  { %4826 = dma.done.wait [#allocation6], 3584  }
  0x1e   :  { %4827 = vsyncadd [#allocation6], 4294963712 }
  0x1f   :  { %4828 = dma.done.wait [#allocation9], 8192  }
  0x20   :  { %4829 = vsyncadd [#allocation9], 4294959104 }
  0x21   :  { %4830 = dma.done.wait [#allocation12], 16384  }
  0x22   :  { %4831 = vsyncadd [#allocation12], 4294950912  ;;  %v4851_v0 = vmov 0   ;;  %v152_v1 = vlaneseq  ;;  %v150_v2 = vld [vmem:[%s5360_s0] sm:$0xff]  ;;  %v181_v3 = vld [vmem:[#allocation2 + $0x78] sm:$0xff]  ;;  %v4852_v23 = vmov 1.0  }
  0x23   :  { %4476 = vset.pattern.permute.xlu0 %v4851_v0  ;;  %183 = vmatpush.msra.mxu0 %v181_v3  ;;  %v180_v5 = vld [vmem:[#allocation2 + $0x70] sm:$0xff]  ;;  %v179_v6 = vld [vmem:[#allocation2 + $0x68] sm:$0xff]  ;;  %v178_v7 = vld [vmem:[#allocation2 + $0x60] sm:$0xff]  ;;  %v4853_v33 = vmov 128.0   ;;  %vm480_vm9 = vcmask 261120   ;;  %vm557_vm10 = vcmask 1043456  }
  0x24   :  { %v3365_v4 = vshrl.u32 %v152_v1, 7  ;;  %155 = vperm.xlu0 %4476, %v150_v2   ;;  %v151_v8 = vld [vmem:[%s5360_s0 + $0x8] sm:$0xff]  ;;  %v177_v9 = vld [vmem:[#allocation2 + $0x58] sm:$0xff]  ;;  %v176_v10 = vld [vmem:[#allocation2 + $0x50] sm:$0xff]  ;;  %v153_v21 = vand.u32 127, %v152_v1  ;;  %4509 = vrcp.f32 %v4853_v33  ;;  %s4854_s0 = smov 96  }
  0x25   :  { %184 = vmatpush.msra.mxu0 %v180_v5  ;;  %v175_v11 = vld [vmem:[#allocation2 + $0x48] sm:$0xff]  ;;  %v174_v12 = vld [vmem:[#allocation2 + $0x40] sm:$0xff]  ;;  %v173_v13 = vld [vmem:[#allocation2 + $0x38] sm:$0xff]  ;;  %vm529_vm11 = vcmask 64512   ;;  %vm985_vm12 = vcmask 523264   ;;  %vm988_vm13 = vcmask 785408  }
  0x26   :  { %4508 = vset.pattern.permute.xlu1 %v3365_v4  ;;  %v172_v14 = vld [vmem:[#allocation2 + $0x30] sm:$0xff]  ;;  %v171_v15 = vld [vmem:[#allocation2 + $0x28] sm:$0xff]  ;;  %v170_v16 = vld [vmem:[#allocation2 + $0x20] sm:$0xff]  ;;  %s3444_s14 = sshll.u32 %s5369_s9, 4  ;;  %s3445_s14 = int_to_ptr.hbm [resolvable:$true] %s3444_s14 }
  0x27   :  { %185 = vmatpush.msra.mxu0 %v179_v6  ;;  %v169_v17 = vld [vmem:[#allocation2 + $0x18] sm:$0xff]  ;;  %v168_v18 = vld [vmem:[#allocation2 + $0x10] sm:$0xff]  ;;  %v167_v19 = vld [vmem:[#allocation2 + $0x8] sm:$0xff] }
  0x28   :  { %v166_v20 = vld [vmem:[#allocation2] sm:$0xff]  ;;  %v3548_v48 = vld [vmem:[#allocation8 + $0xa8] sm:$0xf]  ;;  %v4284_v49 = vld [vmem:[#allocation8 + $0xb0] sm:$0xf0] }
  0x29   :  { %186 = vmatpush.msra.mxu0 %v178_v7  ;;  %v182_v25 = vld [vmem:[#allocation5] sm:$0xff]  ;;  %v4283_v50 = vld [vmem:[#allocation8 + $0xac] sm:$0xf]  ;;  %v3549_v51 = vor.u32 %v4284_v49, %v3548_v48  ;;  %v3550_v52 = vld [vmem:[#allocation8 + $0xb4] sm:$0xf0] }
  0x2a   :  { %v206_v27 = vld [vmem:[#allocation7 + $0x2] ss:$0 sm:$0xff]  ;;  %v4510_v34 = vpop.eup %4509  ;;  %v3556_v53 = vld [vmem:[#allocation8 + $0xb0] sm:$0xf]  ;;  %v4285_v54 = vld [vmem:[#allocation8 + $0xb8] sm:$0xf0]  ;;  %v3553_v55 = vor.u32 %v4283_v50, %v3550_v52 }
  0x2b   :  { %187 = vmatpush.msra.mxu0 %v177_v9  ;;  %v216_v35 = vmul.f32 128.0, %v4510_v34  ;;  %vm220_vm2 = vweird.f32 %v4510_v34  ;;  %v3557_v56 = vor.u32 %v4285_v54, %v3556_v53  ;;  %432 = vmatpush.bf16.msra.mxu1 %v3549_v51  ;;  %v3536_v57 = vld [vmem:[#allocation8 + $0x90] sm:$0xf]  ;;  %v4281_v58 = vld [vmem:[#allocation8 + $0x98] sm:$0xf0] }
  0x2c   :  { %158 = vperm.xlu0 %4476, %v151_v8   ;;  %446 = vmatpush.bf16.msra.mxu2 %v3553_v55  ;;  %v4280_v59 = vld [vmem:[#allocation8 + $0x94] sm:$0xf]  ;;  %v3537_v60 = vor.u32 %v4281_v58, %v3536_v57  ;;  %v3538_v61 = vld [vmem:[#allocation8 + $0x9c] sm:$0xf0]  ;;  %v3544_v62 = vld [vmem:[#allocation8 + $0x98] sm:$0xf] }
  0x2d   :  { %188 = vmatpush.msra.mxu0 %v176_v10  ;;  %v217_v36 = vsub.f32 1.0, %v216_v35  ;;  %460 = vmatpush.bf16.msra.mxu3 %v3557_v56  ;;  %v4282_v63 = vld [vmem:[#allocation8 + $0xa0] sm:$0xf0]  ;;  %v3541_v0 = vor.u32 %v4280_v59, %v3538_v61  ;;  %v3524_v2 = vld [vmem:[#allocation8 + $0x78] sm:$0xf] }
  0x2e   :  { %v3545_v1 = vor.u32 %v4282_v63, %v3544_v62  ;;  %v4278_v3 = vld [vmem:[#allocation8 + $0x80] sm:$0xf0]  ;;  %v3526_v6 = vld [vmem:[#allocation8 + $0x84] sm:$0xf0]  ;;  %v3532_v7 = vld [vmem:[#allocation8 + $0x80] sm:$0xf] }
  0x2f   :  { %189 = vmatpush.msra.mxu0 %v175_v11  ;;  %v218_v37 = vmul.f32 %v4510_v34, %v217_v36  ;;  %433 = vmatpush.bf16.msra.mxu1 %v3537_v60  ;;  %v3525_v5 = vor.u32 %v4278_v3, %v3524_v2  ;;  %v4279_v8 = vld [vmem:[#allocation8 + $0x88] sm:$0xf0]  ;;  %v3512_v11 = vld [vmem:[#allocation8 + $0x60] sm:$0xf]  ;;  %v4270_v35 = vld [vmem:[#allocation8 + $0x40] sm:$0xf0] }
  0x30   :  { %447 = vmatpush.bf16.msra.mxu2 %v3541_v0  ;;  %v3533_v10 = vor.u32 %v4279_v8, %v3532_v7  ;;  %v3490_v33 = vld [vmem:[#allocation8 + $0x3c] sm:$0xf0]  ;;  %v4263_v51 = vld [vmem:[#allocation8 + $0x8] sm:$0xf0]  ;;  %v4262_v52 = vld [vmem:[#allocation8 + $0x4] sm:$0xf] }
  0x31   :  { %190 = vmatpush.msra.mxu0 %v174_v12  ;;  %v219_v38 = vadd.f32 %v4510_v34, %v218_v37  ;;  %461 = vmatpush.bf16.msra.mxu3 %v3545_v1  ;;  %v4275_v12 = vld [vmem:[#allocation8 + $0x68] sm:$0xf0]  ;;  %v3464_v50 = vld [vmem:[#allocation8] sm:$0xf]  ;;  %v3466_v55 = vld [vmem:[#allocation8 + $0xc] sm:$0xf0] }
  0x32   :  { %v3465_v54 = vor.u32 %v4263_v51, %v3464_v50  ;;  %v3472_v56 = vld [vmem:[#allocation8 + $0x8] sm:$0xf]  ;;  %v4264_v57 = vld [vmem:[#allocation8 + $0x10] sm:$0xf0]  ;;  %v3469_v59 = vor.u32 %v4262_v52, %v3466_v55 }
  0x33   :  { %191 = vmatpush.msra.mxu0 %v173_v13  ;;  %v4938_v39 = vsel %vm220_vm2, %v4510_v34, %v219_v38  ;;  %434 = vmatpush.bf16.msra.mxu1 %v3525_v5  ;;  %v4274_v13 = vld [vmem:[#allocation8 + $0x64] sm:$0xf]  ;;  %v3496_v34 = vld [vmem:[#allocation8 + $0x38] sm:$0xf]  ;;  %v3473_v60 = vor.u32 %v4264_v57, %v3472_v56 }
  0x34   :  { %4507 = vset.pattern.permute.xlu0 %v3365_v4  ;;  %v4277_v4 = vld [vmem:[#allocation8 + $0x7c] sm:$0xf]  ;;  %v3497_v37 = vor.u32 %v4270_v35, %v3496_v34  ;;  %v3476_v38 = vld [vmem:[#allocation8 + $0x18] sm:$0xf] }
  0x35   :  { %192 = vmatpush.msra.mxu0 %v172_v14  ;;  %v3529_v9 = vor.u32 %v4277_v4, %v3526_v6  ;;  %462 = vmatpush.bf16.msra.mxu3 %v3533_v10  ;;  %v3513_v14 = vor.u32 %v4275_v12, %v3512_v11 }
  0x37   :  { %193 = vmatpush.msra.mxu0 %v171_v15  ;;  %448 = vmatpush.bf16.msra.mxu2 %v3529_v9  ;;  %v3514_v15 = vld [vmem:[#allocation8 + $0x6c] sm:$0xf0] }
  0x38   :  { %435 = vmatpush.bf16.msra.mxu1 %v3513_v14 }
  0x39   :  { %194 = vmatpush.msra.mxu0 %v170_v16  ;;  %v3520_v16 = vld [vmem:[#allocation8 + $0x68] sm:$0xf] }
  0x3b   :  { %195 = vmatpush.msra.mxu0 %v169_v17  ;;  %v4276_v17 = vld [vmem:[#allocation8 + $0x70] sm:$0xf0] }
  0x3d   :  { %196 = vmatpush.msra.mxu0 %v168_v18  ;;  %v3517_v18 = vor.u32 %v4274_v13, %v3514_v15  ;;  %v209_v15 = vld [vmem:[#allocation7] ss:$0 sm:$0xff] }
  0x3f   :  { %197 = vmatpush.msra.mxu0 %v167_v19  ;;  %v3521_v19 = vor.u32 %v4276_v17, %v3520_v16  ;;  %449 = vmatpush.bf16.msra.mxu2 %v3517_v18 }
  0x41   :  { %198 = vmatpush.msra.mxu0 %v166_v20  ;;  %463 = vmatpush.bf16.msra.mxu3 %v3521_v19  ;;  %v3500_v20 = vld [vmem:[#allocation8 + $0x48] sm:$0xf]  ;;  %v210_v19 = vld [vmem:[#allocation7 + $0x1] ss:$0 sm:$0xff] }
  0x96   :  { %v156_v22 = vpop.permute.xlu0 %155 }
  0x97   :  { %vm160_vm0 = vcmp.eq.s32.totalorder %v153_v21, %v156_v22  ;;  %v4271_v22 = vld [vmem:[#allocation8 + $0x4c] sm:$0xf] }
  0x98   :  { %3460 = vmatmul.msk.f32.vlgmr.msra.gmra.mxu0 %vm160_vm0, %v4852_v23 }
  0x9e   :  { %v159_v24 = vpop.permute.xlu0 %158 }
  0x9f   :  { %vm161_vm1 = vcmp.eq.s32.totalorder %v153_v21, %v159_v24  ;;  %v4272_v21 = vld [vmem:[#allocation8 + $0x50] sm:$0xf0]  ;;  %v3502_v24 = vld [vmem:[#allocation8 + $0x54] sm:$0xf0] }
  0xa0   :  { %3461 = vmatmul.msk.f32.gmra.mxu0 %vm161_vm1, %v4852_v23  ;;  %v3501_v23 = vor.u32 %v4272_v21, %v3500_v20 }
  0xa2   :  { %436 = vmatpush.bf16.msra.mxu1 %v3501_v23 }
 0x115   :  { %v200_v26 = vpop.f32.mrf.mxu0 }
 0x116   :  { %v201_v28 = vadd.f32 %v200_v26, %v182_v25  ;;  %v4273_v26 = vld [vmem:[#allocation8 + $0x58] sm:$0xf0] }
 0x118   :  { %v207_v29 = vadd.f32 %v206_v27, %v201_v28 }
 0x11a   :  { %211 = vadd.xlane.f32.xlu1 %v207_v29 }
 0x11d   :  { %v203_v30 = vpop.f32.mrf.mxu0 }
 0x11e   :  { %v204_v31 = vadd.f32 %v203_v30, %v182_v25  ;;  %v3508_v25 = vld [vmem:[#allocation8 + $0x50] sm:$0xf]  ;;  %v4269_v30 = vld [vmem:[#allocation8 + $0x38] sm:$0xf0] }
 0x11f   :  { %v3509_v28 = vor.u32 %v4273_v26, %v3508_v25 }
 0x120   :  { %v208_v32 = vadd.f32 %v206_v27, %v204_v31  ;;  %v3505_v27 = vor.u32 %v4271_v22, %v3502_v24  ;;  %v4268_v31 = vld [vmem:[#allocation8 + $0x34] sm:$0xf] }
 0x121   :  { %464 = vmatpush.bf16.msra.mxu3 %v3509_v28  ;;  %v3493_v36 = vor.u32 %v4268_v31, %v3490_v33 }
 0x122   :  { %213 = vadd.xlane.f32.xlu1 %v208_v32  ;;  %450 = vmatpush.bf16.msra.mxu2 %v3505_v27 }
 0x125   :  { %465 = vmatpush.bf16.msra.mxu3 %v3497_v37 }
 0x126   :  { %451 = vmatpush.bf16.msra.mxu2 %v3493_v36 }
 0x18d   :  { %v212_v40 = vpop.xlane.xlu1 %211 }
 0x18e   :  { %v222_v41 = vmul.f32 %v4938_v39, %v212_v40  ;;  %v4266_v40 = vld [vmem:[#allocation8 + $0x20] sm:$0xf0] }
 0x190   :  { %v4941_v42 = vsub.f32 %v207_v29, %v222_v41  ;;  %v3488_v29 = vld [vmem:[#allocation8 + $0x30] sm:$0xf]  ;;  %v4265_v41 = vld [vmem:[#allocation8 + $0x1c] sm:$0xf] }
 0x192   :  { %v226_v43 = vmul.f32 %v4941_v42, %v4941_v42 }
 0x194   :  { %228 = vadd.xlane.f32.xlu2 %v226_v43  ;;  %v3477_v43 = vor.u32 %v4266_v40, %v3476_v38 }
 0x195   :  { %v214_v44 = vpop.xlane.xlu1 %213 }
 0x196   :  { %v223_v45 = vmul.f32 %v4938_v39, %v214_v44  ;;  %v3478_v44 = vld [vmem:[#allocation8 + $0x24] sm:$0xf0] }
 0x197   :  { %v3481_v48 = vor.u32 %v4265_v41, %v3478_v44 }
 0x198   :  { %v4946_v46 = vsub.f32 %v208_v32, %v223_v45  ;;  %v3489_v32 = vor.u32 %v4269_v30, %v3488_v29  ;;  %v3484_v45 = vld [vmem:[#allocation8 + $0x20] sm:$0xf] }
 0x199   :  { %452 = vmatpush.bf16.msra.mxu2 %v3481_v48 }
 0x19a   :  { %v227_v47 = vmul.f32 %v4946_v46, %v4946_v46  ;;  %437 = vmatpush.bf16.msra.mxu1 %v3489_v32 }
 0x19c   :  { %230 = vadd.xlane.f32.xlu2 %v227_v47  ;;  %v4267_v47 = vld [vmem:[#allocation8 + $0x28] sm:$0xf0] }
 0x19d   :  { %v3485_v49 = vor.u32 %v4267_v47, %v3484_v45  ;;  %453 = vmatpush.bf16.msra.mxu2 %v3469_v59 }
 0x19e   :  { %438 = vmatpush.bf16.msra.mxu1 %v3477_v43 }
 0x19f   :  { %466 = vmatpush.bf16.msra.mxu3 %v3485_v49 }
 0x1a2   :  { %439 = vmatpush.bf16.msra.mxu1 %v3465_v54 }
 0x1a3   :  { %467 = vmatpush.bf16.msra.mxu3 %v3473_v60 }
 0x207   :  { %v229_v53 = vpop.xlane.xlu2 %228 }
 0x208   :  { %v232_v58 = vmul.f32 %v229_v53, %v4938_v39 }
 0x20a   :  { %v234_v61 = vadd.f32 1e-12, %v232_v58 }
 0x20c   :  { %4511 = vrsqrt.f32 %v234_v61  ;;  %vm242_vm4 = vweird.f32 %v234_v61 }
 0x20f   :  { %v231_v62 = vpop.xlane.xlu2 %230 }
 0x210   :  { %v233_v63 = vmul.f32 %v231_v62, %v4938_v39  ;;  %v143_v62 = vld [vmem:[%s5361_s1] sm:$0x3] }
 0x212   :  { %v4512_v0 = vpop.eup %4511  ;;  %v235_v1 = vadd.f32 1e-12, %v233_v63  ;;  %v3457_v63 = vadd.f32 -1.0, %v143_v62 }
 0x213   :  { %v237_v2 = vmul.f32 %v4512_v0, %v234_v61  ;;  %vm243_vm3 = vweird.f32 %v4512_v0 }
 0x214   :  { %4513 = vrsqrt.f32 %v235_v1  ;;  %vm244_vm5 = vmor %vm242_vm4, %vm243_vm3  ;;  %vm252_vm7 = vweird.f32 %v235_v1 }
 0x215   :  { %v238_v3 = vmul.f32 %v4512_v0, %v237_v2 }
 0x217   :  { %v239_v4 = vmul.f32 0.5, %v238_v3  ;;  %v148_v3 = vmul.f32 1e+09, %v3457_v63 }
 0x219   :  { %v240_v5 = vsub.f32 1.5, %v239_v4 }
 0x21a   :  { %v4514_v6 = vpop.eup %4513 }
 0x21b   :  { %v241_v7 = vmul.f32 %v4512_v0, %v240_v5  ;;  %v247_v8 = vmul.f32 %v4514_v6, %v235_v1  ;;  %vm253_vm6 = vweird.f32 %v4514_v6  ;;  %v4990_v5 = vperm.slane %v148_v3, 0 }
 0x21c   :  { %vm254_vm8 = vmor %vm252_vm7, %vm253_vm6 }
 0x21d   :  { %v248_v9 = vmul.f32 %v4514_v6, %v247_v8  ;;  %v245_v10 = vsel %vm244_vm5, %v4512_v0, %v241_v7 }
 0x21e   :  { %v256_v13 = vmul.f32 %v245_v10, %v4941_v42  ;;  %v296_v42 = vld [vmem:[#allocation7 + $0x3] ss:$8 sm:$0x7] }
 0x21f   :  { %v249_v11 = vmul.f32 0.5, %v248_v9  ;;  %v298_v24 = vperm.slane %v296_v42, 0  ;;  %v299_v28 = vperm.slane %v296_v42, 1 }
 0x220   :  { %v258_v18 = vmul.f32 %v256_v13, %v209_v15 }
 0x221   :  { %v250_v12 = vsub.f32 1.5, %v249_v11 }
 0x222   :  { %v4954_v21 = vadd.f32 %v258_v18, %v210_v19 }
 0x223   :  { %v251_v14 = vmul.f32 %v4514_v6, %v250_v12  ;;  %v146_v12 = vrot.slane %v3457_v63, 1 }
 0x225   :  { %v255_v16 = vsel %vm254_vm8, %v4514_v6, %v251_v14  ;;  %v149_v18 = vmul.f32 1e+09, %v146_v12 }
 0x226   :  { %v257_v17 = vmul.f32 %v255_v16, %v4946_v46  ;;  %v300_v46 = vperm.slane %v296_v42, 2 }
 0x228   :  { %v259_v20 = vmul.f32 %v257_v17, %v209_v15 }
 0x22a   :  { %v4956_v22 = vadd.f32 %v259_v20, %v210_v19  ;;  %v4999_v20 = vperm.slane %v149_v18, 0 }
 0x22c   :  { %v294_v23 = vpack.c.bf16 %v4956_v22, %v4954_v21 }
 0x22e   :  { %440 = vmatmul.bf16.vlgmr.msra.gmra.mxu1 %v294_v23  ;;  %454 = vmatmul.bf16.vlgmr.msra.gmra.mxu2 %v294_v23 }
 0x22f   :  { %468 = vmatmul.bf16.vlgmr.msra.gmra.mxu3 %v294_v23 }
 0x2ab   :  { %v441_v25 = vpop.f32.mrf.mxu1 }
 0x2ac   :  { %v442_v26 = vadd.f32 %v441_v25, %v298_v24 }
 0x2ae   :  { %v474_v27 = vpack.c.bf16 %v442_v26, %v442_v26 }
 0x2b0   :  { %v594_v29 = vunpack.c.l.b16 %v474_v27 }
 0x2b1   :  { %v455_v30 = vpop.f32.mrf.mxu2 }
 0x2b2   :  { %v595_v31 = vpack.c.b16 %v594_v29, %v594_v29  ;;  %v456_v32 = vadd.f32 %v455_v30, %v299_v28  ;;  %v469_v33 = vpop.f32.mrf.mxu3 }
 0x2b3   :  { %v470_v34 = vadd.f32 %v469_v33, %v300_v46  ;;  %v443_v35 = vpop.f32.mrf.mxu1 }
 0x2b4   :  { %v476_v36 = vpack.c.bf16 %v456_v32, %v456_v32  ;;  %v444_v37 = vadd.f32 %v443_v35, %v298_v24  ;;  %596 = vrot.lane.b32.xlu2 %v595_v31, %s4854_s0 }
 0x2b5   :  { %v4961_v38 = vpack.c.bf16 %v470_v34, %v470_v34 }
 0x2b6   :  { %v599_v40 = vunpack.c.l.b16 %v476_v36  ;;  %v485_v41 = vsel %vm480_vm9, %v476_v36, 0  ;;  %v475_v45 = vpack.c.bf16 %v444_v37, %v444_v37 }
 0x2b7   :  { %494 = vmatpush.bf16.xpose.msrb.mxu1 %v485_v41  ;;  %v559_v43 = vsel %vm557_vm10, %v4961_v38, 0 }
 0x2b8   :  { %v600_v44 = vpack.c.b16 %v599_v40, %v599_v40  ;;  %568 = vmatpush.bf16.msrb.mxu2 %v559_v43  ;;  %v623_v51 = vunpack.c.l.b16 %v475_v45 }
 0x2b9   :  { %v457_v47 = vpop.f32.mrf.mxu2 }
 0x2ba   :  { %v458_v48 = vadd.f32 %v457_v47, %v299_v28  ;;  %v471_v49 = vpop.f32.mrf.mxu3  ;;  %601 = vrot.lane.b32.xlu0 %v600_v44, %s4854_s0  ;;  %v624_v58 = vpack.c.b16 %v623_v51, %v623_v51  ;;  %v680_v51 = vunpack.c.l.b16 %v4961_v38 }
 0x2bb   :  { %v472_v50 = vadd.f32 %v471_v49, %v300_v46 }
 0x2bc   :  { %v477_v52 = vpack.c.bf16 %v458_v48, %v458_v48  ;;  %727 = vrot.lane.b32.xlu2 %v595_v31, %s4848_s3 }
 0x2bd   :  { %v4968_v53 = vpack.c.bf16 %v472_v50, %v472_v50 }
 0x2be   :  { %v628_v54 = vunpack.c.l.b16 %v477_v52  ;;  %3558 = vmatmul.msk.bf16.vlgmr.msrb.gmra.mxu1 %vm480_vm9, %v474_v27  ;;  %v504_v55 = vsel %vm480_vm9, %v477_v52, 0 }
 0x2bf   :  { %513 = vmatpush.bf16.xpose.msra.mxu1 %v504_v55  ;;  %v578_v56 = vsel %vm557_vm10, %v4968_v53, 0  ;;  %v5018_v55 = vpack.c.b16 %v680_v51, %v680_v51 }
 0x2c0   :  { %587 = vmatpush.bf16.msrb.mxu3 %v578_v56  ;;  %v629_v57 = vpack.c.b16 %v628_v54, %v628_v54 }
 0x2c2   :  { %630 = vrot.lane.b32.xlu1 %v629_v57, %s4854_s0  ;;  %625 = vrot.lane.b32.xlu0 %v624_v58, %s4854_s0 }
 0x2c4   :  { %868 = vrot.lane.b32.xlu2 %v629_v57, %s4846_s21 }
 0x2ca   :  { %750 = vrot.lane.b32.xlu1 %v624_v58, %s4848_s3  ;;  %729 = vrot.lane.b32.xlu0 %v600_v44, %s4848_s3 }
 0x2ce   :  { %3559 = vmatmul.msk.bf16.vlgmr.msra.gmra.mxu1 %vm480_vm9, %v475_v45 }
 0x2d2   :  { %752 = vrot.lane.b32.xlu0 %v629_v57, %s4848_s3  ;;  %843 = vrot.lane.b32.xlu1 %v595_v31, %s4846_s21 }
 0x2da   :  { %845 = vrot.lane.b32.xlu0 %v600_v44, %s4846_s21 }
 0x2e2   :  { %866 = vrot.lane.b32.xlu0 %v624_v58, %s4846_s21 }
 0x30e   :  { %v597_v61 = vpop.permute.xlu2 %596 }
 0x316   :  { %v728_v4 = vpop.permute.xlu2 %727 }
 0x31e   :  { %v869_v13 = vpop.permute.xlu2 %868 }
 0x31f   :  { %v874_v17 = vsel %vm480_vm9, %v869_v13, 0 }
 0x32c   :  { %v602_v59 = vpop.permute.xlu0 %601 }
 0x32d   :  { %v607_v60 = vsel %vm480_vm9, %v602_v59, 0 }
 0x32e   :  { %616 = vmatpush.bf16.xpose.msrb.mxu0 %v607_v60 }
 0x334   :  { %v631_v0 = vpop.permute.xlu1 %630  ;;  %v626_v1 = vpop.permute.xlu0 %625 }
 0x335   :  { %v636_v2 = vsel %vm480_vm9, %v631_v0, 0  ;;  %3562 = vmatmul.msk.bf16.vlgmr.msrb.gmra.mxu0 %vm480_vm9, %v597_v61 }
 0x336   :  { %645 = vmatpush.bf16.xpose.msrb.mxu1 %v636_v2 }
 0x33b   :  { %v496_v6 = vpop.f32.mrf.mxu1 }
 0x33c   :  { %v519_v7 = vmul.f32 0.17677669, %v496_v6  ;;  %v730_v8 = vpop.permute.xlu0 %729  ;;  %v751_v19 = vpop.permute.xlu1 %750 }
 0x33d   :  { %v735_v9 = vsel %vm480_vm9, %v730_v8, 0  ;;  %3563 = vmatmul.msk.bf16.vlgmr.msrb.gmra.mxu1 %vm480_vm9, %v626_v1 }
 0x33e   :  { %744 = vmatpush.bf16.xpose.msra.mxu0 %v735_v9  ;;  %v527_v10 = vadd.f32 %v4990_v5, %v519_v7 }
 0x340   :  { %v530_v11 = vsel %vm529_vm11, %v527_v10, -inf }
 0x341   :  { %531 = vmax.xlane.f32.xlu2 %v530_v11 }
 0x343   :  { %v498_v14 = vpop.f32.mrf.mxu1 }
 0x344   :  { %v753_v15 = vpop.permute.xlu0 %752  ;;  %v844_v46 = vpop.permute.xlu1 %843 }
 0x345   :  { %v758_v16 = vsel %vm480_vm9, %v753_v15, 0  ;;  %3566 = vmatmul.msk.bf16.vlgmr.msra.gmra.mxu0 %vm480_vm9, %v728_v4  ;;  %v704_v4 = vunpack.c.l.b16 %v4968_v53 }
 0x346   :  { %767 = vmatpush.bf16.xpose.msra.mxu1 %v758_v16 }
 0x347   :  { %v705_v8 = vpack.c.b16 %v704_v4, %v704_v4 }
 0x34b   :  { %v515_v23 = vpop.f32.mrf.mxu1 }
 0x34c   :  { %v520_v42 = vmul.f32 0.17677669, %v515_v23  ;;  %v846_v24 = vpop.permute.xlu0 %845 }
 0x34d   :  { %v851_v25 = vsel %vm480_vm9, %v846_v24, 0  ;;  %3567 = vmatmul.msk.bf16.vlgmr.msra.gmra.mxu1 %vm480_vm9, %v751_v19 }
 0x34e   :  { %883 = vmatpush.bf16.xpose.msrb.mxu1 %v874_v17  ;;  %860 = vmatpush.bf16.xpose.msrb.mxu0 %v851_v25  ;;  %v528_v26 = vadd.f32 %v4999_v20, %v520_v42 }
 0x350   :  { %v533_v27 = vsel %vm529_vm11, %v528_v26, -inf }
 0x351   :  { %534 = vmax.xlane.f32.xlu1 %v533_v27 }
 0x353   :  { %v517_v28 = vpop.f32.mrf.mxu1 }
 0x354   :  { %v867_v29 = vpop.permute.xlu0 %866 }
 0x355   :  { %3570 = vmatmul.msk.bf16.vlgmr.msrb.gmra.mxu0 %vm480_vm9, %v844_v46 }
 0x35d   :  { %3571 = vmatmul.msk.bf16.vlgmr.msrb.gmra.mxu1 %vm480_vm9, %v867_v29 }
 0x3b2   :  { %v618_v30 = vpop.f32.mrf.mxu0 }
 0x3b3   :  { %v651_v31 = vmul.f32 0.17677669, %v618_v30 }
 0x3b4   :  { %v532_v32 = vpop.xlane.xlu2 %531 }
 0x3b5   :  { %v653_v33 = vadd.f32 %v651_v31, %v4990_v5  ;;  %v536_v34 = vsub.f32 %v527_v10, %v532_v32 }
 0x3b7   :  { %v655_v35 = vsel %vm529_vm11, %v653_v33, -inf  ;;  %v538_v36 = vmul.f32 1.442695, %v536_v34 }
 0x3b8   :  { %656 = vmax.xlane.f32.xlu0 %v655_v35 }
 0x3b9   :  { %4515 = vpow2.f32 %v538_v36 }
 0x3ba   :  { %v620_v37 = vpop.f32.mrf.mxu0  ;;  %v647_v40 = vpop.f32.mrf.mxu1 }
 0x3bb   :  { %v652_v41 = vmul.f32 0.17677669, %v647_v40 }
 0x3bd   :  { %v654_v43 = vadd.f32 %v652_v41, %v4999_v20 }
 0x3bf   :  { %v658_v44 = vsel %vm529_vm11, %v654_v43, -inf  ;;  %v5011_v49 = vpop.eup %4515 }
 0x3c0   :  { %659 = vmax.xlane.f32.xlu2 %v658_v44  ;;  %v542_v52 = vsel %vm529_vm11, %v5011_v49, 0.0 }
 0x3c2   :  { %v649_v45 = vpop.f32.mrf.mxu1  ;;  %v746_v47 = vpop.f32.mrf.mxu0 }
 0x3c3   :  { %v773_v48 = vmul.f32 0.17677669, %v746_v47 }
 0x3c4   :  { %v535_v3 = vpop.xlane.xlu1 %534 }
 0x3c5   :  { %v775_v50 = vadd.f32 %v773_v48, %v4990_v5  ;;  %v537_v7 = vsub.f32 %v528_v26, %v535_v3 }
 0x3c7   :  { %v777_v54 = vsel %vm529_vm11, %v775_v50, -inf  ;;  %v540_v9 = vmul.f32 1.442695, %v537_v7 }
 0x3c8   :  { %543 = vadd.xlane.f32.xlu2 %v542_v52  ;;  %778 = vmax.xlane.f32.xlu1 %v777_v54 }
 0x3c9   :  { %4517 = vpow2.f32 %v540_v9 }
 0x3ca   :  { %v748_v56 = vpop.f32.mrf.mxu0  ;;  %v769_v57 = vpop.f32.mrf.mxu1 }
 0x3cb   :  { %v774_v58 = vmul.f32 0.17677669, %v769_v57 }
 0x3cc   :  { %682 = vrot.lane.b32.xlu0 %v5018_v55, %s4854_s0 }
 0x3cd   :  { %v776_v59 = vadd.f32 %v774_v58, %v4999_v20 }
 0x3cf   :  { %v780_v60 = vsel %vm529_vm11, %v776_v59, -inf  ;;  %v4518_v10 = vpop.eup %4517 }
 0x3d0   :  { %781 = vmax.xlane.f32.xlu2 %v780_v60  ;;  %v545_v12 = vsel %vm529_vm11, %v4518_v10, 0.0 }
 0x3d2   :  { %v771_v38 = vpop.f32.mrf.mxu1  ;;  %v862_v61 = vpop.f32.mrf.mxu0 }
 0x3d3   :  { %v889_v11 = vmul.f32 0.17677669, %v862_v61 }
 0x3d5   :  { %v891_v13 = vadd.f32 %v889_v11, %v4990_v5 }
 0x3d7   :  { %v893_v14 = vsel %vm529_vm11, %v891_v13, -inf }
 0x3da   :  { %v864_v62 = vpop.f32.mrf.mxu0  ;;  %v885_v63 = vpop.f32.mrf.mxu1 }
 0x3db   :  { %v890_v0 = vmul.f32 0.17677669, %v885_v63 }
 0x3dd   :  { %v892_v1 = vadd.f32 %v890_v0, %v4999_v20 }
 0x3df   :  { %v896_v2 = vsel %vm529_vm11, %v892_v1, -inf }
 0x3e0   :  { %897 = vmax.xlane.f32.xlu1 %v896_v2 }
 0x3e2   :  { %v887_v6 = vpop.f32.mrf.mxu1 }
 0x3e8   :  { %822 = vrot.lane.b32.xlu2 %v705_v8, %s4848_s3 }
 0x3f6   :  { %546 = vadd.xlane.f32.xlu0 %v545_v12 }
 0x3fe   :  { %894 = vmax.xlane.f32.xlu0 %v893_v14 }
 0x412   :  { %801 = vrot.lane.b32.xlu0 %v5018_v55, %s4848_s3 }
 0x42b   :  { %v657_v53 = vpop.xlane.xlu0 %656 }
 0x42c   :  { %v661_v15 = vsub.f32 %v653_v33, %v657_v53 }
 0x42e   :  { %v663_v16 = vmul.f32 1.442695, %v661_v15 }
 0x430   :  { %4519 = vpow2.f32 %v663_v16 }
 0x433   :  { %v660_v17 = vpop.xlane.xlu2 %659 }
 0x434   :  { %v662_v18 = vsub.f32 %v654_v43, %v660_v17 }
 0x436   :  { %v4520_v19 = vpop.eup %4519  ;;  %v665_v23 = vmul.f32 1.442695, %v662_v18 }
 0x437   :  { %v667_v42 = vsel %vm529_vm11, %v4520_v19, 0.0 }
 0x438   :  { %4521 = vpow2.f32 %v665_v23  ;;  %668 = vadd.xlane.f32.xlu1 %v667_v42 }
 0x43b   :  { %v544_v24 = vpop.xlane.xlu2 %543  ;;  %v779_v25 = vpop.xlane.xlu1 %778 }
 0x43c   :  { %4523 = vrcp.f32 %v544_v24  ;;  %v783_v26 = vsub.f32 %v775_v50, %v779_v25 }
 0x43e   :  { %v4522_v27 = vpop.eup %4521  ;;  %v785_v28 = vmul.f32 1.442695, %v783_v26  ;;  %v683_v46 = vpop.permute.xlu0 %682 }
 0x43f   :  { %v688_v29 = vsel %vm557_vm10, %v683_v46, 0  ;;  %v670_v30 = vsel %vm529_vm11, %v4522_v27, 0.0 }
 0x440   :  { %4525 = vpow2.f32 %v785_v28  ;;  %697 = vmatpush.bf16.msra.mxu2 %v688_v29  ;;  %671 = vadd.xlane.f32.xlu2 %v670_v30 }
 0x442   :  { %v4524_v31 = vpop.eup %4523 }
 0x443   :  { %v550_v32 = vmul.f32 %v4524_v31, %v5011_v49  ;;  %v782_v33 = vpop.xlane.xlu2 %781 }
 0x444   :  { %v784_v34 = vsub.f32 %v776_v59, %v782_v33 }
 0x445   :  { %v552_v35 = vpack.c.bf16 %v550_v32, %v550_v32 }
 0x446   :  { %v4526_v36 = vpop.eup %4525  ;;  %v787_v37 = vmul.f32 1.442695, %v784_v34 }
 0x447   :  { %3560 = vmatmul.msk.bf16.vlgmr.msrb.gmra.mxu2 %vm529_vm11, %v552_v35  ;;  %v789_v40 = vsel %vm529_vm11, %v4526_v36, 0.0 }
 0x448   :  { %4527 = vpow2.f32 %v787_v37  ;;  %790 = vadd.xlane.f32.xlu2 %v789_v40 }
 0x44b   :  { %v823_v61 = vpop.permute.xlu2 %822 }
 0x44c   :  { %v828_v12 = vsel %vm557_vm10, %v823_v61, 0 }
 0x44e   :  { %v4528_v41 = vpop.eup %4527 }
 0x44f   :  { %v792_v43 = vsel %vm529_vm11, %v4528_v41, 0.0 }
 0x450   :  { %793 = vadd.xlane.f32.xlu2 %v792_v43 }
 0x451   :  { %706 = vrot.lane.b32.xlu1 %v705_v8, %s4854_s0 }
 0x453   :  { %v898_v44 = vpop.xlane.xlu1 %897 }
 0x454   :  { %v900_v45 = vsub.f32 %v892_v1, %v898_v44 }
 0x456   :  { %v903_v47 = vmul.f32 1.442695, %v900_v45 }
 0x458   :  { %4529 = vpow2.f32 %v903_v47 }
 0x45e   :  { %v4530_v48 = vpop.eup %4529 }
 0x45f   :  { %v908_v49 = vsel %vm529_vm11, %v4530_v48, 0.0 }
 0x460   :  { %909 = vadd.xlane.f32.xlu0 %v908_v49 }
 0x468   :  { %917 = vrot.lane.b32.xlu2 %v5018_v55, %s4846_s21 }
 0x469   :  { %v547_v50 = vpop.xlane.xlu0 %546 }
 0x46a   :  { %4531 = vrcp.f32 %v547_v50 }
 0x470   :  { %v4532_v51 = vpop.eup %4531  ;;  %938 = vrot.lane.b32.xlu2 %v705_v8, %s4846_s21 }
 0x471   :  { %v551_v52 = vmul.f32 %v4532_v51, %v4518_v10  ;;  %v895_v54 = vpop.xlane.xlu0 %894 }
 0x472   :  { %v899_v56 = vsub.f32 %v891_v13, %v895_v54  ;;  %v4293_v54 = vld [vmem:[#allocation10 + $0x38] sm:$0xff] }
 0x473   :  { %v553_v57 = vpack.c.bf16 %v551_v52, %v551_v52  ;;  %1057 = vmatpush.bf16.msra.mxu0 %v4293_v54  ;;  %v3714_v54 = vld [vmem:[#allocation11 + $0xd8] sm:$0xf0] }
 0x474   :  { %v901_v58 = vmul.f32 1.442695, %v899_v56  ;;  %v4292_v56 = vld [vmem:[#allocation10 + $0x30] sm:$0xff] }
 0x475   :  { %3561 = vmatmul.msk.bf16.vlgmr.msrb.gmra.mxu3 %vm529_vm11, %v553_v57  ;;  %v4291_v57 = vld [vmem:[#allocation10 + $0x28] sm:$0xff] }
 0x476   :  { %4533 = vpow2.f32 %v901_v58  ;;  %v4290_v58 = vld [vmem:[#allocation10 + $0x20] sm:$0xff] }
 0x477   :  { %1058 = vmatpush.bf16.msra.mxu0 %v4292_v56 }
 0x47b   :  { %1059 = vmatpush.bf16.msra.mxu0 %v4291_v57  ;;  %v3688_v57 = vld [vmem:[#allocation11 + $0xa0] sm:$0xf] }
 0x47c   :  { %v4534_v59 = vpop.eup %4533 }
 0x47d   :  { %v905_v60 = vsel %vm529_vm11, %v4534_v59, 0.0 }
 0x47e   :  { %906 = vadd.xlane.f32.xlu1 %v905_v60  ;;  %v4288_v60 = vld [vmem:[#allocation10 + $0x10] sm:$0xff] }
 0x47f   :  { %1060 = vmatpush.bf16.msra.mxu0 %v4290_v58  ;;  %v4316_v58 = vld [vmem:[#allocation11 + $0xac] sm:$0xf0] }
 0x484   :  { %v802_v38 = vpop.permute.xlu0 %801 }
 0x485   :  { %v807_v55 = vsel %vm557_vm10, %v802_v38, 0  ;;  %v4287_v38 = vld [vmem:[#allocation10 + $0x8] sm:$0xff] }
 0x486   :  { %816 = vmatpush.bf16.msrb.mxu2 %v807_v55  ;;  %v4286_v55 = vld [vmem:[#allocation10] sm:$0xff] }
 0x4ab   :  { %v669_v62 = vpop.xlane.xlu1 %668 }
 0x4ac   :  { %4535 = vrcp.f32 %v669_v62 }
 0x4b2   :  { %v4536_v63 = vpop.eup %4535 }
 0x4b3   :  { %v675_v0 = vmul.f32 %v4536_v63, %v4520_v19  ;;  %v672_v1 = vpop.xlane.xlu2 %671 }
 0x4b4   :  { %4537 = vrcp.f32 %v672_v1 }
 0x4b5   :  { %v677_v2 = vpack.c.bf16 %v675_v0, %v675_v0 }
 0x4b7   :  { %3564 = vmatmul.msk.bf16.vlgmr.msra.gmra.mxu2 %vm529_vm11, %v677_v2 }
 0x4ba   :  { %v4538_v4 = vpop.eup %4537 }
 0x4bb   :  { %v791_v3 = vpop.xlane.xlu2 %790  ;;  %v676_v7 = vmul.f32 %v4538_v4, %v4522_v27 }
 0x4bc   :  { %4539 = vrcp.f32 %v791_v3 }
 0x4bd   :  { %v678_v14 = vpack.c.bf16 %v676_v7, %v676_v7 }
 0x4c2   :  { %v4540_v6 = vpop.eup %4539 }
 0x4c3   :  { %v797_v8 = vmul.f32 %v4540_v6, %v4526_v36  ;;  %v794_v9 = vpop.xlane.xlu2 %793  ;;  %v707_v10 = vpop.permute.xlu1 %706 }
 0x4c4   :  { %v712_v11 = vsel %vm557_vm10, %v707_v10, 0  ;;  %4541 = vrcp.f32 %v794_v9 }
 0x4c5   :  { %v799_v13 = vpack.c.bf16 %v797_v8, %v797_v8  ;;  %721 = vmatpush.bf16.msra.mxu3 %v712_v11 }
 0x4c7   :  { %3568 = vmatmul.msk.bf16.vlgmr.msrb.gmra.mxu2 %vm529_vm11, %v799_v13 }
 0x4c8   :  { %3565 = vmatmul.msk.bf16.vlgmr.msra.gmra.mxu3 %vm529_vm11, %v678_v14  ;;  %v1008_v14 = vld [vmem:[#allocation7 + $0x4] ss:$0 sm:$0xff] }
 0x4c9   :  { %837 = vmatpush.bf16.msrb.mxu3 %v828_v12 }
 0x4ca   :  { %v5053_v53 = vpop.f32.mrf.mxu2  ;;  %v4542_v17 = vpop.eup %4541 }
 0x4cb   :  { %v918_v15 = vpop.permute.xlu2 %917  ;;  %v798_v18 = vmul.f32 %v4542_v17, %v4528_v41 }
 0x4cc   :  { %v923_v16 = vsel %vm557_vm10, %v918_v15, 0 }
 0x4cd   :  { %932 = vmatpush.bf16.msra.mxu2 %v923_v16  ;;  %v800_v24 = vpack.c.bf16 %v798_v18, %v798_v18 }
 0x4d2   :  { %v572_v19 = vpop.f32.mrf.mxu2 }
 0x4d3   :  { %v939_v23 = vpop.permute.xlu2 %938  ;;  %v910_v25 = vpop.xlane.xlu0 %909 }
 0x4d4   :  { %v944_v42 = vsel %vm557_vm10, %v939_v23, 0  ;;  %4543 = vrcp.f32 %v910_v25 }
 0x4d5   :  { %953 = vmatpush.bf16.msra.mxu3 %v944_v42 }
 0x4d8   :  { %3569 = vmatmul.msk.bf16.vlgmr.msrb.gmra.mxu3 %vm529_vm11, %v800_v24 }
 0x4da   :  { %v4544_v26 = vpop.eup %4543 }
 0x4db   :  { %v914_v27 = vmul.f32 %v4544_v26, %v4530_v48 }
 0x4dd   :  { %v916_v28 = vpack.c.bf16 %v914_v27, %v914_v27 }
 0x4e8   :  { %3573 = vmatmul.msk.bf16.vlgmr.msra.gmra.mxu3 %vm529_vm11, %v916_v28 }
 0x4f1   :  { %v907_v46 = vpop.xlane.xlu1 %906 }
 0x4f2   :  { %4545 = vrcp.f32 %v907_v46  ;;  %v4324_v46 = vld [vmem:[#allocation11 + $0xec] sm:$0xf0] }
 0x4f8   :  { %v4546_v29 = vpop.eup %4545  ;;  %v589_v30 = vpop.f32.mrf.mxu3 }
 0x4f9   :  { %v913_v31 = vmul.f32 %v4546_v29, %v4534_v59  ;;  %v4289_v59 = vld [vmem:[#allocation10 + $0x18] sm:$0xff]  ;;  %v4322_v29 = vld [vmem:[#allocation11 + $0xe4] sm:$0xf] }
 0x4fa   :  { %1061 = vmatpush.bf16.msra.mxu0 %v4289_v59  ;;  %v4314_v59 = vld [vmem:[#allocation11 + $0xa4] sm:$0xf] }
 0x4fb   :  { %v915_v32 = vpack.c.bf16 %v913_v31, %v913_v31  ;;  %v3722_v31 = vld [vmem:[#allocation11 + $0xf0] sm:$0xf0] }
 0x4fd   :  { %3572 = vmatmul.msk.bf16.vlgmr.msra.gmra.mxu2 %vm529_vm11, %v915_v32  ;;  %v3728_v32 = vld [vmem:[#allocation11 + $0xe8] sm:$0xf] }
 0x4fe   :  { %1062 = vmatpush.bf16.msra.mxu0 %v4288_v60  ;;  %v3689_v60 = vor.u32 %v4316_v58, %v3688_v57  ;;  %v3634_v57 = vld [vmem:[#allocation11 + $0x38] sm:$0xf0]  ;;  %v3608_v58 = vld [vmem:[#allocation11] sm:$0xf] }
 0x500   :  { %v591_v33 = vpop.f32.mrf.mxu3 }
 0x501   :  { %v4325_v33 = vld [vmem:[#allocation11 + $0xf4] sm:$0xf0] }
 0x502   :  { %1063 = vmatpush.bf16.msra.mxu0 %v4287_v38  ;;  %v3690_v38 = vld [vmem:[#allocation11 + $0xb0] sm:$0xf0] }
 0x506   :  { %1064 = vmatpush.bf16.msra.mxu0 %v4286_v55  ;;  %v3696_v55 = vld [vmem:[#allocation11 + $0xa8] sm:$0xf] }
 0x53a   :  { %v699_v34 = vpop.f32.mrf.mxu2 }
 0x542   :  { %v701_v35 = vpop.f32.mrf.mxu2 }
 0x543   :  { %v3729_v35 = vor.u32 %v4325_v33, %v3728_v32  ;;  %v3642_v32 = vld [vmem:[#allocation11 + $0x50] sm:$0xf0]  ;;  %v3648_v33 = vld [vmem:[#allocation11 + $0x48] sm:$0xf] }
 0x545   :  { %1351 = vmatpush.bf16.msrb.mxu3 %v3729_v35 }
 0x54a   :  { %v818_v36 = vpop.f32.mrf.mxu2 }
 0x54b   :  { %v723_v37 = vpop.f32.mrf.mxu3 }
 0x54c   :  { %v4477_v40 = vpack.i.bf16 %v723_v37, %v699_v34  ;;  %v3725_v34 = vor.u32 %v4322_v29, %v3722_v31  ;;  %v3730_v37 = vld [vmem:[#allocation11 + $0xf8] sm:$0xf0]  ;;  %v4304_v29 = vld [vmem:[#allocation11 + $0x4c] sm:$0xf0] }
 0x54e   :  { %4478 = vrot.lane.b32.xlu2 %v4477_v40, %s4846_s21  ;;  %1337 = vmatpush.bf16.msrb.mxu2 %v3725_v34  ;;  %v4305_v34 = vld [vmem:[#allocation11 + $0x54] sm:$0xf0] }
 0x552   :  { %v820_v41 = vpop.f32.mrf.mxu2 }
 0x553   :  { %v725_v43 = vpop.f32.mrf.mxu3  ;;  %v3704_v41 = vld [vmem:[#allocation11 + $0xc0] sm:$0xf] }
 0x554   :  { %v4320_v43 = vld [vmem:[#allocation11 + $0xcc] sm:$0xf0] }
 0x55b   :  { %v839_v44 = vpop.f32.mrf.mxu3 }
 0x55c   :  { %v4482_v45 = vpack.i.bf16 %v839_v44, %v818_v36  ;;  %v4323_v36 = vld [vmem:[#allocation11 + $0xec] sm:$0xf]  ;;  %v4318_v44 = vld [vmem:[#allocation11 + $0xc4] sm:$0xf] }
 0x55d   :  { %v3733_v40 = vor.u32 %v4323_v36, %v3730_v37  ;;  %v3649_v36 = vor.u32 %v4305_v34, %v3648_v33  ;;  %v4303_v37 = vld [vmem:[#allocation11 + $0x4c] sm:$0xf]  ;;  %v4357_v34 = vld [vmem:[#allocation13 + $0xf8] sm:$0xff] }
 0x55e   :  { %4483 = vrot.lane.b32.xlu1 %v4482_v45, %s4848_s3  ;;  %v3705_v45 = vor.u32 %v4320_v43, %v3704_v41  ;;  %v3624_v43 = vld [vmem:[#allocation11 + $0x20] sm:$0xf] }
 0x55f   :  { %1365 = vmatpush.bf16.msrb.mxu0 %v3733_v40  ;;  %v3650_v40 = vld [vmem:[#allocation11 + $0x58] sm:$0xf0] }
 0x560   :  { %v3653_v41 = vor.u32 %v4303_v37, %v3650_v40  ;;  %v4349_v37 = vld [vmem:[#allocation13 + $0xb8] sm:$0xff]  ;;  %v4331_v40 = vld [vmem:[#allocation13 + $0x28] sm:$0xff] }
 0x563   :  { %v841_v47 = vpop.f32.mrf.mxu3 }
 0x564   :  { %v3706_v47 = vld [vmem:[#allocation11 + $0xd0] sm:$0xf0] }
 0x56b   :  { %v955_v48 = vpop.f32.mrf.mxu3 }
 0x573   :  { %v957_v49 = vpop.f32.mrf.mxu3 }
 0x574   :  { %v4321_v49 = vld [vmem:[#allocation11 + $0xd4] sm:$0xf0] }
 0x580   :  { %v934_v50 = vpop.f32.mrf.mxu2 }
 0x581   :  { %v4487_v51 = vpack.i.bf16 %v955_v48, %v934_v50  ;;  %v3712_v48 = vld [vmem:[#allocation11 + $0xc8] sm:$0xf]  ;;  %v3709_v50 = vor.u32 %v4318_v44, %v3706_v47  ;;  %v4300_v44 = vld [vmem:[#allocation11 + $0x2c] sm:$0xf0] }
 0x582   :  { %v3625_v47 = vor.u32 %v4300_v44, %v3624_v43  ;;  %v4340_v43 = vld [vmem:[#allocation13 + $0x70] sm:$0xff] }
 0x583   :  { %4488 = vrot.lane.b32.xlu0 %v4487_v51, %s4854_s0  ;;  %v3713_v51 = vor.u32 %v4321_v49, %v3712_v48  ;;  %1338 = vmatpush.bf16.msrb.mxu2 %v3709_v50  ;;  %v3626_v48 = vld [vmem:[#allocation11 + $0x30] sm:$0xf0]  ;;  %v3632_v49 = vld [vmem:[#allocation11 + $0x28] sm:$0xf]  ;;  %v4301_v50 = vld [vmem:[#allocation11 + $0x34] sm:$0xf0] }
 0x584   :  { %v4348_v44 = vld [vmem:[#allocation13 + $0xb0] sm:$0xff] }
 0x585   :  { %1352 = vmatpush.bf16.msrb.mxu3 %v3713_v51 }
 0x588   :  { %v936_v52 = vpop.f32.mrf.mxu2 }
 0x589   :  { %v4319_v52 = vld [vmem:[#allocation11 + $0xcc] sm:$0xf] }
 0x58a   :  { %v3717_v56 = vor.u32 %v4319_v52, %v3714_v54  ;;  %v3633_v54 = vor.u32 %v4301_v50, %v3632_v49  ;;  %v4347_v49 = vld [vmem:[#allocation13 + $0xa8] sm:$0xff]  ;;  %v4329_v50 = vld [vmem:[#allocation13 + $0x18] sm:$0xff] }
 0x58c   :  { %1366 = vmatpush.bf16.msrb.mxu0 %v3717_v56  ;;  %v4299_v56 = vld [vmem:[#allocation11 + $0x2c] sm:$0xf] }
 0x5a8   :  { %v4479_v61 = vpop.permute.xlu2 %4478 }
 0x5a9   :  { %v4481_v63 = vunpack.i.h.bf16 %v4479_v61  ;;  %v4480_v0 = vunpack.i.l.bf16 %v4479_v61  ;;  %v4317_v61 = vld [vmem:[#allocation11 + $0xb4] sm:$0xf0] }
 0x5ab   :  { %v984_v4 = vsel %vm480_vm9, %v589_v30, %v4481_v63  ;;  %v983_v6 = vsel %vm480_vm9, %v5053_v53, %v4480_v0  ;;  %v3697_v63 = vor.u32 %v4317_v61, %v3696_v55  ;;  %v4315_v0 = vld [vmem:[#allocation11 + $0xac] sm:$0xf]  ;;  %v4294_v55 = vld [vmem:[#allocation11 + $0x4] sm:$0xf]  ;;  %v3610_v61 = vld [vmem:[#allocation11 + $0x10] sm:$0xf0] }
 0x5ad   :  { %1353 = vmatpush.bf16.msrb.mxu3 %v3697_v63  ;;  %v3613_v63 = vor.u32 %v4294_v55, %v3610_v61  ;;  %v4351_v55 = vld [vmem:[#allocation13 + $0xc8] sm:$0xff] }
 0x5d0   :  { %v4484_v62 = vpop.permute.xlu1 %4483 }
 0x5d1   :  { %v4486_v1 = vunpack.i.h.bf16 %v4484_v62  ;;  %v4485_v2 = vunpack.i.l.bf16 %v4484_v62  ;;  %v3693_v62 = vor.u32 %v4314_v59, %v3690_v38  ;;  %v4296_v38 = vld [vmem:[#allocation11 + $0xc] sm:$0xf0] }
 0x5d3   :  { %v987_v9 = vsel %vm985_vm12, %v984_v4, %v4486_v1  ;;  %v986_v10 = vsel %vm985_vm12, %v983_v6, %v4485_v2  ;;  %v3698_v1 = vld [vmem:[#allocation11 + $0xb8] sm:$0xf0]  ;;  %1339 = vmatpush.bf16.msrb.mxu2 %v3693_v62  ;;  %v4312_v4 = vld [vmem:[#allocation11 + $0x8c] sm:$0xf0]  ;;  %v4310_v6 = vld [vmem:[#allocation11 + $0x84] sm:$0xf]  ;;  %v3609_v62 = vor.u32 %v4296_v38, %v3608_v58 }
 0x5d4   :  { %v3701_v2 = vor.u32 %v4315_v0, %v3698_v1  ;;  %v3616_v0 = vld [vmem:[#allocation11 + $0x8] sm:$0xf]  ;;  %v4297_v1 = vld [vmem:[#allocation11 + $0x14] sm:$0xf0] }
 0x5d5   :  { %v5092_v58 = vld [vmem:[#allocation7 + $0x7] ss:$8 sm:$0xf] }
 0x5d6   :  { %1367 = vmatpush.bf16.msrb.mxu0 %v3701_v2  ;;  %v4295_v2 = vld [vmem:[#allocation11 + $0xc] sm:$0xf]  ;;  %v1155_v61 = vperm.slane %v5092_v58, 0 }
 0x5d7   :  { %v4327_v38 = vld [vmem:[#allocation13 + $0x8] sm:$0xff] }
 0x5f5   :  { %v4489_v3 = vpop.permute.xlu0 %4488 }
 0x5f6   :  { %v4491_v7 = vunpack.i.h.bf16 %v4489_v3  ;;  %v4490_v8 = vunpack.i.l.bf16 %v4489_v3  ;;  %v3672_v3 = vld [vmem:[#allocation11 + $0x80] sm:$0xf] }
 0x5f8   :  { %v989_v11 = vsel %vm988_vm13, %v986_v10, %v4490_v8  ;;  %v990_v12 = vsel %vm988_vm13, %v987_v9, %v4491_v7  ;;  %v3673_v7 = vor.u32 %v4312_v4, %v3672_v3  ;;  %v3674_v8 = vld [vmem:[#allocation11 + $0x90] sm:$0xf0]  ;;  %v3680_v9 = vld [vmem:[#allocation11 + $0x88] sm:$0xf]  ;;  %v4313_v10 = vld [vmem:[#allocation11 + $0x94] sm:$0xf0]  ;;  %v3617_v4 = vor.u32 %v4297_v1, %v3616_v0 }
 0x5f9   :  { %v1007_v13 = vpack.c.bf16 %v990_v12, %v989_v11  ;;  %v3677_v11 = vor.u32 %v4310_v6, %v3674_v8  ;;  %v3681_v12 = vor.u32 %v4313_v10, %v3680_v9  ;;  %v3618_v6 = vld [vmem:[#allocation11 + $0x18] sm:$0xf0]  ;;  %v4344_v0 = vld [vmem:[#allocation13 + $0x90] sm:$0xff] }
 0x5fb   :  { %1065 = vmatmul.bf16.vlgmr.msra.gmra.mxu0 %v1007_v13  ;;  %v4311_v13 = vld [vmem:[#allocation11 + $0x8c] sm:$0xf]  ;;  %1340 = vmatpush.bf16.msrb.mxu2 %v3677_v11 }
 0x5fc   :  { %1354 = vmatpush.bf16.msrb.mxu3 %v3681_v12 }
 0x678   :  { %v1066_v15 = vpop.f32.mrf.mxu0 }
 0x679   :  { %v1067_v16 = vadd.f32 %v1066_v15, %v1008_v14 }
 0x67b   :  { %v1071_v17 = vadd.f32 %v1067_v16, %v4954_v21  ;;  %v3656_v16 = vld [vmem:[#allocation11 + $0x60] sm:$0xf] }
 0x67d   :  { %1075 = vadd.xlane.f32.xlu2 %v1071_v17 }
 0x680   :  { %v1068_v18 = vpop.f32.mrf.mxu0 }
 0x681   :  { %v1069_v53 = vadd.f32 %v1068_v18, %v1008_v14  ;;  %v3682_v14 = vld [vmem:[#allocation11 + $0x98] sm:$0xf0]  ;;  %v4306_v18 = vld [vmem:[#allocation11 + $0x64] sm:$0xf] }
 0x682   :  { %v3685_v15 = vor.u32 %v4311_v13, %v3682_v14 }
 0x683   :  { %v1072_v19 = vadd.f32 %v1069_v53, %v4956_v22  ;;  %v3720_v22 = vld [vmem:[#allocation11 + $0xe0] sm:$0xf] }
 0x684   :  { %v3721_v30 = vor.u32 %v4324_v46, %v3720_v22  ;;  %1368 = vmatpush.bf16.msrb.mxu0 %v3685_v15  ;;  %v3640_v46 = vld [vmem:[#allocation11 + $0x40] sm:$0xf] }
 0x685   :  { %1077 = vadd.xlane.f32.xlu0 %v1072_v19  ;;  %v3641_v31 = vor.u32 %v4304_v29, %v3640_v46  ;;  %v1074_v29 = vld [vmem:[#allocation7 + $0x6] ss:$0 sm:$0xff] }
 0x686   :  { %1323 = vmatpush.bf16.msra.mxu1 %v3721_v30  ;;  %v4302_v30 = vld [vmem:[#allocation11 + $0x44] sm:$0xf] }
 0x687   :  { %v3645_v35 = vor.u32 %v4302_v30, %v3642_v32 }
 0x68a   :  { %1324 = vmatpush.bf16.msra.mxu1 %v3705_v45  ;;  %v4298_v45 = vld [vmem:[#allocation11 + $0x24] sm:$0xf] }
 0x68b   :  { %v3629_v52 = vor.u32 %v4298_v45, %v3626_v48  ;;  %v4330_v45 = vld [vmem:[#allocation13 + $0x20] sm:$0xff]  ;;  %v4339_v48 = vld [vmem:[#allocation13 + $0x68] sm:$0xff] }
 0x68e   :  { %1325 = vmatpush.bf16.msra.mxu1 %v3689_v60  ;;  %v3637_v60 = vor.u32 %v4299_v56, %v3634_v57  ;;  %v4328_v56 = vld [vmem:[#allocation13 + $0x10] sm:$0xff] }
 0x68f   :  { %v4352_v57 = vld [vmem:[#allocation13 + $0xd0] sm:$0xff] }
 0x692   :  { %1326 = vmatpush.bf16.msra.mxu1 %v3673_v7  ;;  %v3621_v7 = vor.u32 %v4295_v2, %v3618_v6  ;;  %v4326_v2 = vld [vmem:[#allocation13] sm:$0xff] }
 0x6f0   :  { %v1076_v23 = vpop.xlane.xlu2 %1075 }
 0x6f1   :  { %v1079_v42 = vmul.f32 %v1076_v23, %v4938_v39  ;;  %v3664_v23 = vld [vmem:[#allocation11 + $0x68] sm:$0xf] }
 0x6f3   :  { %v5073_v24 = vsub.f32 %v1071_v17, %v1079_v42  ;;  %v4308_v17 = vld [vmem:[#allocation11 + $0x6c] sm:$0xf0]  ;;  %v4309_v42 = vld [vmem:[#allocation11 + $0x74] sm:$0xf0] }
 0x6f4   :  { %v3657_v53 = vor.u32 %v4308_v17, %v3656_v16 }
 0x6f5   :  { %v1083_v25 = vmul.f32 %v5073_v24, %v5073_v24 }
 0x6f6   :  { %1327 = vmatpush.bf16.msra.mxu1 %v3657_v53 }
 0x6f7   :  { %1085 = vadd.xlane.f32.xlu1 %v1083_v25 }
 0x6f8   :  { %v1078_v26 = vpop.xlane.xlu0 %1077 }
 0x6f9   :  { %v1080_v27 = vmul.f32 %v1078_v26, %v4938_v39  ;;  %v3665_v26 = vor.u32 %v4309_v42, %v3664_v23 }
 0x6fa   :  { %1328 = vmatpush.bf16.msra.mxu1 %v3641_v31 }
 0x6fb   :  { %v5078_v28 = vsub.f32 %v1072_v19, %v1080_v27  ;;  %v3658_v19 = vld [vmem:[#allocation11 + $0x70] sm:$0xf0]  ;;  %v4307_v27 = vld [vmem:[#allocation11 + $0x6c] sm:$0xf]  ;;  %1355 = vmatpush.bf16.msrb.mxu3 %v3665_v26 }
 0x6fc   :  { %v3661_v25 = vor.u32 %v4306_v18, %v3658_v19 }
 0x6fd   :  { %v1084_v21 = vmul.f32 %v5078_v28, %v5078_v28 }
 0x6fe   :  { %1341 = vmatpush.bf16.msrb.mxu2 %v3661_v25  ;;  %1329 = vmatpush.bf16.msra.mxu1 %v3625_v47  ;;  %v4354_v47 = vld [vmem:[#allocation13 + $0xe0] sm:$0xff] }
 0x6ff   :  { %1087 = vadd.xlane.f32.xlu2 %v1084_v21  ;;  %v3666_v21 = vld [vmem:[#allocation11 + $0x78] sm:$0xf0]  ;;  %1356 = vmatpush.bf16.msrb.mxu3 %v3649_v36 }
 0x700   :  { %v3669_v22 = vor.u32 %v4307_v27, %v3666_v21  ;;  %v1073_v27 = vld [vmem:[#allocation7 + $0x5] ss:$0 sm:$0xff]  ;;  %v4341_v36 = vld [vmem:[#allocation13 + $0x78] sm:$0xff] }
 0x702   :  { %1369 = vmatpush.bf16.msrb.mxu0 %v3669_v22  ;;  %1342 = vmatpush.bf16.msrb.mxu2 %v3645_v35  ;;  %v4332_v35 = vld [vmem:[#allocation13 + $0x30] sm:$0xff] }
 0x703   :  { %1357 = vmatpush.bf16.msrb.mxu3 %v3633_v54  ;;  %1330 = vmatpush.bf16.msra.mxu1 %v3609_v62  ;;  %v4346_v54 = vld [vmem:[#allocation13 + $0xa0] sm:$0xff]  ;;  %v1158_v62 = vperm.slane %v5092_v58, 3 }
 0x706   :  { %1370 = vmatpush.bf16.msrb.mxu0 %v3653_v41  ;;  %1343 = vmatpush.bf16.msrb.mxu2 %v3629_v52  ;;  %v4355_v41 = vld [vmem:[#allocation13 + $0xe8] sm:$0xff]  ;;  %v4338_v52 = vld [vmem:[#allocation13 + $0x60] sm:$0xff] }
 0x707   :  { %1358 = vmatpush.bf16.msrb.mxu3 %v3617_v4 }
 0x70a   :  { %1371 = vmatpush.bf16.msrb.mxu0 %v3637_v60  ;;  %1344 = vmatpush.bf16.msrb.mxu2 %v3613_v63  ;;  %v4345_v60 = vld [vmem:[#allocation13 + $0x98] sm:$0xff]  ;;  %v4336_v63 = vld [vmem:[#allocation13 + $0x50] sm:$0xff] }
 0x70b   :  { %1740 = vmatpush.bf16.msra.mxu3 %v4349_v37 }
 0x70e   :  { %1372 = vmatpush.bf16.msrb.mxu0 %v3621_v7  ;;  %1726 = vmatpush.bf16.msra.mxu2 %v4341_v36 }
 0x70f   :  { %1741 = vmatpush.bf16.msra.mxu3 %v4348_v44 }
 0x712   :  { %1754 = vmatpush.bf16.msra.mxu0 %v4357_v34  ;;  %1727 = vmatpush.bf16.msra.mxu2 %v4340_v43 }
 0x713   :  { %1742 = vmatpush.bf16.msra.mxu3 %v4347_v49 }
 0x716   :  { %1728 = vmatpush.bf16.msra.mxu2 %v4339_v48 }
 0x717   :  { %1743 = vmatpush.bf16.msra.mxu3 %v4346_v54 }
 0x71a   :  { %1729 = vmatpush.bf16.msra.mxu2 %v4338_v52 }
 0x71b   :  { %1744 = vmatpush.bf16.msra.mxu3 %v4345_v60 }
 0x71f   :  { %1745 = vmatpush.bf16.msra.mxu3 %v4344_v0 }
 0x76a   :  { %v1086_v51 = vpop.xlane.xlu1 %1085 }
 0x76b   :  { %v1089_v59 = vmul.f32 %v1086_v51, %v4938_v39  ;;  %v4353_v51 = vld [vmem:[#allocation13 + $0xd8] sm:$0xff] }
 0x76d   :  { %v1091_v3 = vadd.f32 1e-12, %v1089_v59  ;;  %v4337_v59 = vld [vmem:[#allocation13 + $0x58] sm:$0xff] }
 0x76e   :  { %1730 = vmatpush.bf16.msra.mxu2 %v4337_v59 }
 0x76f   :  { %4547 = vrsqrt.f32 %v1091_v3  ;;  %vm1099_vm15 = vweird.f32 %v1091_v3 }
 0x772   :  { %v1088_v8 = vpop.xlane.xlu2 %1087  ;;  %1731 = vmatpush.bf16.msra.mxu2 %v4336_v63 }
 0x773   :  { %v1090_v9 = vmul.f32 %v1088_v8, %v4938_v39  ;;  %v4335_v8 = vld [vmem:[#allocation13 + $0x48] sm:$0xff] }
 0x775   :  { %v4548_v10 = vpop.eup %4547  ;;  %v1092_v11 = vadd.f32 1e-12, %v1090_v9  ;;  %v4343_v9 = vld [vmem:[#allocation13 + $0x88] sm:$0xff] }
 0x776   :  { %v1094_v12 = vmul.f32 %v4548_v10, %v1091_v3  ;;  %vm1100_vm14 = vweird.f32 %v4548_v10  ;;  %v4350_v3 = vld [vmem:[#allocation13 + $0xc0] sm:$0xff]  ;;  %1732 = vmatpush.bf16.msra.mxu2 %v4335_v8  ;;  %1746 = vmatpush.bf16.msra.mxu3 %v4343_v9 }
 0x777   :  { %4549 = vrsqrt.f32 %v1092_v11  ;;  %vm1101_vm0 = vmor %vm1099_vm15, %vm1100_vm14  ;;  %vm1109_vm2 = vweird.f32 %v1092_v11 }
 0x778   :  { %v1095_v13 = vmul.f32 %v4548_v10, %v1094_v12 }
 0x77a   :  { %v1096_v14 = vmul.f32 0.5, %v1095_v13  ;;  %v1157_v13 = vperm.slane %v5092_v58, 2 }
 0x77c   :  { %v1097_v15 = vsub.f32 1.5, %v1096_v14 }
 0x77d   :  { %v4550_v16 = vpop.eup %4549 }
 0x77e   :  { %v1098_v17 = vmul.f32 %v4548_v10, %v1097_v15  ;;  %v1104_v18 = vmul.f32 %v4550_v16, %v1092_v11  ;;  %vm1110_vm1 = vweird.f32 %v4550_v16  ;;  %v1156_v11 = vperm.slane %v5092_v58, 1 }
 0x77f   :  { %vm1111_vm3 = vmor %vm1109_vm2, %vm1110_vm1 }
 0x780   :  { %v1105_v53 = vmul.f32 %v4550_v16, %v1104_v18  ;;  %v1102_v19 = vsel %vm1101_vm0, %v4548_v10, %v1098_v17  ;;  %v4334_v17 = vld [vmem:[#allocation13 + $0x40] sm:$0xff]  ;;  %vm3391_vm0 = vcmask 58368  }
 0x781   :  { %v1113_v25 = vmul.f32 %v1102_v19, %v5073_v24  ;;  %v4333_v24 = vld [vmem:[#allocation13 + $0x38] sm:$0xff]  ;;  %v4342_v18 = vld [vmem:[#allocation13 + $0x80] sm:$0xff]  ;;  %1733 = vmatpush.bf16.msra.mxu2 %v4334_v17 }
 0x782   :  { %v1106_v23 = vmul.f32 0.5, %v1105_v53  ;;  %1712 = vmatpush.bf16.msrb.mxu1 %v4333_v24  ;;  %1747 = vmatpush.bf16.msra.mxu3 %v4342_v18 }
 0x783   :  { %v1115_v46 = vmul.f32 %v1113_v25, %v1073_v27 }
 0x784   :  { %v1107_v42 = vsub.f32 1.5, %v1106_v23 }
 0x785   :  { %v5086_v31 = vadd.f32 %v1115_v46, %v1074_v29 }
 0x786   :  { %v1108_v26 = vmul.f32 %v4550_v16, %v1107_v42  ;;  %1713 = vmatpush.bf16.msrb.mxu1 %v4332_v35 }
 0x788   :  { %v1112_v21 = vsel %vm1111_vm3, %v4550_v16, %v1108_v26 }
 0x789   :  { %v1114_v22 = vmul.f32 %v1112_v21, %v5078_v28  ;;  %v4356_v28 = vld [vmem:[#allocation13 + $0xf0] sm:$0xff] }
 0x78a   :  { %1755 = vmatpush.bf16.msra.mxu0 %v4356_v28  ;;  %1714 = vmatpush.bf16.msrb.mxu1 %v4331_v40 }
 0x78b   :  { %v1116_v30 = vmul.f32 %v1114_v22, %v1073_v27 }
 0x78d   :  { %v5088_v32 = vadd.f32 %v1116_v30, %v1074_v29 }
 0x78e   :  { %1756 = vmatpush.bf16.msra.mxu0 %v4355_v41  ;;  %1715 = vmatpush.bf16.msrb.mxu1 %v4330_v45 }
 0x78f   :  { %v1151_v33 = vpack.c.bf16 %v5088_v32, %v5086_v31 }
 0x791   :  { %1331 = vmatmul.bf16.vlgmr.msra.gmra.mxu1 %v1151_v33  ;;  %1345 = vmatmul.bf16.vlgmr.msrb.gmra.mxu2 %v1151_v33 }
 0x792   :  { %1359 = vmatmul.bf16.vlgmr.msrb.gmra.mxu3 %v1151_v33  ;;  %1373 = vmatmul.bf16.vlgmr.msrb.gmra.mxu0 %v1151_v33 }
 0x793   :  { %1757 = vmatpush.bf16.msra.mxu0 %v4354_v47  ;;  %1716 = vmatpush.bf16.msrb.mxu1 %v4329_v50 }
 0x797   :  { %1758 = vmatpush.bf16.msra.mxu0 %v4353_v51  ;;  %1717 = vmatpush.bf16.msrb.mxu1 %v4328_v56 }
 0x79b   :  { %1759 = vmatpush.bf16.msra.mxu0 %v4352_v57  ;;  %1718 = vmatpush.bf16.msrb.mxu1 %v4327_v38 }
 0x79f   :  { %1760 = vmatpush.bf16.msra.mxu0 %v4351_v55  ;;  %1719 = vmatpush.bf16.msrb.mxu1 %v4326_v2 }
 0x7a3   :  { %1761 = vmatpush.bf16.msra.mxu0 %v4350_v3 }
 0x80e   :  { %v1332_v1 = vpop.f32.mrf.mxu1 }
 0x80f   :  { %v5096_v4 = vadd.f32 %v1332_v1, %v1155_v61  ;;  %v1374_v6 = vpop.f32.mrf.mxu0 }
 0x810   :  { %v5098_v7 = vadd.f32 %v1374_v6, %v1158_v62 }
 0x811   :  { %v1379_v10 = vmul.f32 %v5096_v4, %v5096_v4 }
 0x812   :  { %v1382_v12 = vmul.f32 %v5098_v7, %v5098_v7 }
 0x813   :  { %v1387_v14 = vmul.f32 %v1379_v10, %v5096_v4 }
 0x814   :  { %v1390_v15 = vmul.f32 %v1382_v12, %v5098_v7  ;;  %v1346_v16 = vpop.f32.mrf.mxu2 }
 0x815   :  { %v1395_v53 = vmul.f32 0.044715, %v1387_v14  ;;  %v5108_v19 = vadd.f32 %v1346_v16, %v1156_v11  ;;  %v1360_v23 = vpop.f32.mrf.mxu3 }
 0x816   :  { %v1398_v42 = vmul.f32 0.044715, %v1390_v15  ;;  %v5110_v25 = vadd.f32 %v1360_v23, %v1157_v13  ;;  %v1334_v26 = vpop.f32.mrf.mxu1 }
 0x817   :  { %v1403_v27 = vadd.f32 %v1395_v53, %v5096_v4  ;;  %v1380_v21 = vmul.f32 %v5108_v19, %v5108_v19  ;;  %v5115_v22 = vadd.f32 %v1334_v26, %v1155_v61  ;;  %v1376_v46 = vpop.f32.mrf.mxu0 }
 0x818   :  { %v1406_v29 = vadd.f32 %v1398_v42, %v5098_v7  ;;  %v1381_v30 = vmul.f32 %v5110_v25, %v5110_v25  ;;  %v5120_v33 = vadd.f32 %v1376_v46, %v1158_v62 }
 0x819   :  { %v1411_v24 = vmul.f32 0.7978846, %v1403_v27  ;;  %v1388_v34 = vmul.f32 %v1380_v21, %v5108_v19  ;;  %v1383_v35 = vmul.f32 %v5115_v22, %v5115_v22 }
 0x81a   :  { %v1414_v28 = vmul.f32 0.7978846, %v1406_v29  ;;  %v1389_v36 = vmul.f32 %v1381_v30, %v5110_v25  ;;  %v1386_v37 = vmul.f32 %v5120_v33, %v5120_v33 }
 0x81b   :  { %v1396_v40 = vmul.f32 0.044715, %v1388_v34  ;;  %v1391_v41 = vmul.f32 %v1383_v35, %v5115_v22  ;;  %4551 = vtanh.f32 %v1411_v24 }
 0x81c   :  { %v1397_v43 = vmul.f32 0.044715, %v1389_v36  ;;  %v1394_v44 = vmul.f32 %v1386_v37, %v5120_v33  ;;  %v1348_v45 = vpop.f32.mrf.mxu2  ;;  %4553 = vtanh.f32 %v1414_v28 }
 0x81d   :  { %v1404_v47 = vadd.f32 %v1396_v40, %v5108_v19  ;;  %v1399_v48 = vmul.f32 0.044715, %v1391_v41  ;;  %v1349_v49 = vadd.f32 %v1348_v45, %v1156_v11  ;;  %v1362_v50 = vpop.f32.mrf.mxu3 }
 0x81e   :  { %v1405_v51 = vadd.f32 %v1397_v43, %v5110_v25  ;;  %v1402_v52 = vmul.f32 0.044715, %v1394_v44  ;;  %v1363_v54 = vadd.f32 %v1362_v50, %v1157_v13 }
 0x81f   :  { %v1412_v56 = vmul.f32 0.7978846, %v1404_v47  ;;  %v1407_v57 = vadd.f32 %v1399_v48, %v5115_v22  ;;  %v1384_v58 = vmul.f32 %v1349_v49, %v1349_v49 }
 0x820   :  { %v1413_v59 = vmul.f32 0.7978846, %v1405_v51  ;;  %v1410_v60 = vadd.f32 %v1402_v52, %v5120_v33  ;;  %v1385_v38 = vmul.f32 %v1363_v54, %v1363_v54  ;;  %v1519_v51 = vld [vmem:[#allocation7 + $0x20] ss:$0 sm:$0xff] }
 0x821   :  { %4555 = vtanh.f32 %v1412_v56  ;;  %v1415_v55 = vmul.f32 0.7978846, %v1407_v57  ;;  %v1392_v61 = vmul.f32 %v1384_v58, %v1349_v49  ;;  %v4552_v0 = vpop.eup %4551 }
 0x822   :  { %4557 = vtanh.f32 %v1413_v59  ;;  %v1418_v62 = vmul.f32 0.7978846, %v1410_v60  ;;  %v1393_v63 = vmul.f32 %v1385_v38, %v1363_v54  ;;  %v4554_v2 = vpop.eup %4553  ;;  %v1427_v8 = vadd.f32 1.0, %v4552_v0 }
 0x823   :  { %4559 = vtanh.f32 %v1415_v55  ;;  %v1400_v1 = vmul.f32 0.044715, %v1392_v61  ;;  %v1430_v11 = vadd.f32 1.0, %v4554_v2 }
 0x824   :  { %4561 = vtanh.f32 %v1418_v62  ;;  %v1401_v3 = vmul.f32 0.044715, %v1393_v63  ;;  %v1435_v17 = vmul.f32 0.5, %v1427_v8 }
 0x825   :  { %v1408_v6 = vadd.f32 %v1400_v1, %v1349_v49  ;;  %v1438_v53 = vmul.f32 0.5, %v1430_v11 }
 0x826   :  { %v1409_v9 = vadd.f32 %v1401_v3, %v1363_v54  ;;  %v1443_v46 = vmul.f32 %v1435_v17, %v5096_v4  ;;  %v4381_v17 = vld [vmem:[#allocation8 + $0x178] sm:$0xf0] }
 0x827   :  { %v4556_v10 = vpop.eup %4555  ;;  %v1416_v12 = vmul.f32 0.7978846, %v1408_v6  ;;  %v1446_v24 = vmul.f32 %v1438_v53, %v5098_v7 }
 0x828   :  { %v4558_v13 = vpop.eup %4557  ;;  %v1417_v14 = vmul.f32 0.7978846, %v1409_v9  ;;  %v1428_v42 = vadd.f32 1.0, %v4556_v10 }
 0x829   :  { %v4560_v15 = vpop.eup %4559  ;;  %4563 = vtanh.f32 %v1416_v12  ;;  %v1429_v27 = vadd.f32 1.0, %v4558_v13  ;;  %v4380_v12 = vld [vmem:[#allocation8 + $0x170] sm:$0xf0]  ;;  %v4379_v13 = vld [vmem:[#allocation8 + $0x16c] sm:$0xf] }
 0x82a   :  { %v4562_v16 = vpop.eup %4561  ;;  %v1431_v18 = vadd.f32 1.0, %v4560_v15  ;;  %4565 = vtanh.f32 %v1417_v14  ;;  %v1436_v28 = vmul.f32 0.5, %v1428_v42  ;;  %v3950_v15 = vld [vmem:[#allocation8 + $0x174] sm:$0xf0]  ;;  %v4377_v42 = vld [vmem:[#allocation8 + $0x158] sm:$0xf0] }
 0x82b   :  { %v1434_v23 = vadd.f32 1.0, %v4562_v16  ;;  %v1437_v40 = vmul.f32 0.5, %v1429_v27  ;;  %v3956_v16 = vld [vmem:[#allocation8 + $0x170] sm:$0xf] }
 0x82c   :  { %v1439_v26 = vmul.f32 0.5, %v1431_v18  ;;  %v1444_v4 = vmul.f32 %v1436_v28, %v5108_v19  ;;  %v3953_v18 = vor.u32 %v4379_v13, %v3950_v15  ;;  %v3957_v53 = vor.u32 %v4381_v17, %v3956_v16  ;;  %v4373_v28 = vld [vmem:[#allocation8 + $0x13c] sm:$0xf]  ;;  %v3864_v16 = vld [vmem:[#allocation8 + $0xc0] sm:$0xf] }
 0x82d   :  { %v1442_v21 = vmul.f32 0.5, %v1434_v23  ;;  %v3936_v23 = vld [vmem:[#allocation8 + $0x150] sm:$0xf]  ;;  %v4359_v17 = vld [vmem:[#allocation8 + $0xc8] sm:$0xf0] }
 0x82e   :  { %v1447_v29 = vmul.f32 %v1439_v26, %v5115_v22  ;;  %v1445_v22 = vmul.f32 %v1437_v40, %v5110_v25  ;;  %2001 = vmatpush.bf16.msrb.mxu2 %v3953_v18  ;;  %2015 = vmatpush.bf16.msrb.mxu3 %v3957_v53  ;;  %v4376_v26 = vld [vmem:[#allocation8 + $0x154] sm:$0xf]  ;;  %v3937_v27 = vor.u32 %v4377_v42, %v3936_v23  ;;  %v3932_v40 = vld [vmem:[#allocation8 + $0x140] sm:$0xf]  ;;  %v4358_v18 = vld [vmem:[#allocation8 + $0xc4] sm:$0xf] }
 0x82f   :  { %v4564_v30 = vpop.eup %4563  ;;  %v1450_v34 = vmul.f32 %v1442_v21, %v5120_v33  ;;  %v3938_v21 = vld [vmem:[#allocation8 + $0x15c] sm:$0xf0]  ;;  %v3865_v23 = vor.u32 %v4359_v17, %v3864_v16  ;;  %v3866_v42 = vld [vmem:[#allocation8 + $0xcc] sm:$0xf0] }
 0x830   :  { %v4566_v35 = vpop.eup %4565  ;;  %v1432_v36 = vadd.f32 1.0, %v4564_v30  ;;  %v1515_v37 = vpack.c.bf16 %v1447_v29, %v1443_v46  ;;  %v3944_v46 = vld [vmem:[#allocation8 + $0x158] sm:$0xf]  ;;  %v4378_v29 = vld [vmem:[#allocation8 + $0x160] sm:$0xf0]  ;;  %v3941_v30 = vor.u32 %v4376_v26, %v3938_v21  ;;  %v3869_v21 = vor.u32 %v4358_v18, %v3866_v42 }
 0x831   :  { %v1433_v41 = vadd.f32 1.0, %v4566_v35  ;;  %v1518_v43 = vpack.c.bf16 %v1450_v34, %v1446_v24  ;;  %v3945_v24 = vor.u32 %v4378_v29, %v3944_v46  ;;  %v3924_v34 = vld [vmem:[#allocation8 + $0x138] sm:$0xf]  ;;  %v4374_v35 = vld [vmem:[#allocation8 + $0x140] sm:$0xf0] }
 0x832   :  { %v1440_v44 = vmul.f32 0.5, %v1432_v36  ;;  %1720 = vmatmul.bf16.vlgmr.msrb.gmra.mxu1 %v1515_v37  ;;  %2002 = vmatpush.bf16.msrb.mxu2 %v3941_v30  ;;  %v3925_v36 = vor.u32 %v4374_v35, %v3924_v34  ;;  %v3926_v37 = vld [vmem:[#allocation8 + $0x144] sm:$0xf0] }
 0x833   :  { %v1441_v45 = vmul.f32 0.5, %v1433_v41  ;;  %1762 = vmatmul.bf16.vlgmr.msra.gmra.mxu0 %v1518_v43  ;;  %2016 = vmatpush.bf16.msrb.mxu3 %v3945_v24  ;;  %v4375_v41 = vld [vmem:[#allocation8 + $0x148] sm:$0xf0]  ;;  %v3929_v43 = vor.u32 %v4373_v28, %v3926_v37  ;;  %v3872_v26 = vld [vmem:[#allocation8 + $0xc8] sm:$0xf] }
 0x834   :  { %v1448_v47 = vmul.f32 %v1440_v44, %v1349_v49  ;;  %v3933_v44 = vor.u32 %v4375_v41, %v3932_v40 }
 0x835   :  { %v1449_v48 = vmul.f32 %v1441_v45, %v1363_v54  ;;  %v3912_v45 = vld [vmem:[#allocation8 + $0x120] sm:$0xf] }
 0x836   :  { %v1516_v7 = vpack.c.bf16 %v1448_v47, %v1444_v4  ;;  %2003 = vmatpush.bf16.msrb.mxu2 %v3929_v43  ;;  %v4371_v4 = vld [vmem:[#allocation8 + $0x128] sm:$0xf0]  ;;  %v4370_v47 = vld [vmem:[#allocation8 + $0x124] sm:$0xf] }
 0x837   :  { %v1517_v50 = vpack.c.bf16 %v1449_v48, %v1445_v22  ;;  %2017 = vmatpush.bf16.msrb.mxu3 %v3933_v44  ;;  %v3913_v22 = vor.u32 %v4371_v4, %v3912_v45  ;;  %v3914_v48 = vld [vmem:[#allocation8 + $0x12c] sm:$0xf0] }
 0x838   :  { %1734 = vmatmul.bf16.vlgmr.msra.gmra.mxu2 %v1516_v7  ;;  %v3920_v7 = vld [vmem:[#allocation8 + $0x128] sm:$0xf] }
 0x839   :  { %1748 = vmatmul.bf16.vlgmr.msra.gmra.mxu3 %v1517_v50  ;;  %v4372_v50 = vld [vmem:[#allocation8 + $0x130] sm:$0xf0] }
 0x8af   :  { %v1721_v33 = vpop.f32.mrf.mxu1 }
 0x8b0   :  { %v1722_v52 = vadd.f32 %v1721_v33, %v1519_v51  ;;  %v1763_v59 = vpop.f32.mrf.mxu0  ;;  %v3917_v33 = vor.u32 %v4370_v47, %v3914_v48 }
 0x8b2   :  { %2004 = vmatpush.bf16.msrb.mxu2 %v3917_v33 }
 0x8b7   :  { %v1723_v38 = vpop.f32.mrf.mxu1 }
 0x8b8   :  { %v1724_v61 = vadd.f32 %v1723_v38, %v1519_v51  ;;  %v1765_v63 = vpop.f32.mrf.mxu0  ;;  %v3921_v51 = vor.u32 %v4372_v50, %v3920_v7  ;;  %v4369_v38 = vld [vmem:[#allocation8 + $0x118] sm:$0xf0]  ;;  %v1770_v50 = vld [vmem:[#allocation7 + $0x21] ss:$0 sm:$0xff] }
 0x8ba   :  { %2018 = vmatpush.bf16.msrb.mxu3 %v3921_v51 }
 0x8bb   :  { %v1735_v56 = vpop.f32.mrf.mxu2 }
 0x8bc   :  { %v1736_v57 = vadd.f32 %v1735_v56, %v1722_v52  ;;  %v1749_v58 = vpop.f32.mrf.mxu3  ;;  %v3900_v52 = vld [vmem:[#allocation8 + $0x108] sm:$0xf]  ;;  %v4368_v56 = vld [vmem:[#allocation8 + $0x110] sm:$0xf0] }
 0x8be   :  { %v1750_v60 = vadd.f32 %v1749_v58, %v1736_v57  ;;  %v4367_v57 = vld [vmem:[#allocation8 + $0x10c] sm:$0xf]  ;;  %v3901_v58 = vor.u32 %v4368_v56, %v3900_v52  ;;  %v1771_v56 = vld [vmem:[#allocation7 + $0x22] ss:$0 sm:$0xff] }
 0x8c0   :  { %v1764_v55 = vadd.f32 %v1763_v59, %v1750_v60  ;;  %v3902_v59 = vld [vmem:[#allocation8 + $0x114] sm:$0xf0]  ;;  %v3908_v60 = vld [vmem:[#allocation8 + $0x110] sm:$0xf] }
 0x8c2   :  { %v1768_v19 = vadd.f32 %v1764_v55, %v5086_v31  ;;  %v3905_v55 = vor.u32 %v4367_v57, %v3902_v59 }
 0x8c3   :  { %v1737_v49 = vpop.f32.mrf.mxu2 }
 0x8c4   :  { %v1738_v25 = vadd.f32 %v1737_v49, %v1724_v61  ;;  %1772 = vadd.xlane.f32.xlu2 %v1768_v19  ;;  %v1751_v54 = vpop.f32.mrf.mxu3  ;;  %v3909_v61 = vor.u32 %v4369_v38, %v3908_v60  ;;  %2005 = vmatpush.bf16.msrb.mxu2 %v3905_v55  ;;  %v4365_v49 = vld [vmem:[#allocation8 + $0xf8] sm:$0xf0] }
 0x8c6   :  { %v1752_v62 = vadd.f32 %v1751_v54, %v1738_v25  ;;  %2019 = vmatpush.bf16.msrb.mxu3 %v3909_v61  ;;  %v4364_v25 = vld [vmem:[#allocation8 + $0xf4] sm:$0xf] }
 0x8c8   :  { %v1766_v0 = vadd.f32 %v1765_v63, %v1752_v62  ;;  %v3890_v62 = vld [vmem:[#allocation8 + $0xfc] sm:$0xf0]  ;;  %v3896_v63 = vld [vmem:[#allocation8 + $0xf8] sm:$0xf] }
 0x8ca   :  { %v1769_v1 = vadd.f32 %v1766_v0, %v5088_v32  ;;  %v3948_v32 = vld [vmem:[#allocation8 + $0x168] sm:$0xf]  ;;  %v4366_v0 = vld [vmem:[#allocation8 + $0x100] sm:$0xf0] }
 0x8cb   :  { %v3949_v14 = vor.u32 %v4380_v12, %v3948_v32  ;;  %v3884_v32 = vld [vmem:[#allocation8 + $0xe0] sm:$0xf]  ;;  %v4363_v12 = vld [vmem:[#allocation8 + $0xe8] sm:$0xf0] }
 0x8cc   :  { %1774 = vadd.xlane.f32.xlu2 %v1769_v1  ;;  %v3885_v15 = vor.u32 %v4363_v12, %v3884_v32 }
 0x8cd   :  { %1987 = vmatpush.bf16.msra.mxu1 %v3949_v14 }
 0x8d1   :  { %1988 = vmatpush.bf16.msra.mxu1 %v3937_v27  ;;  %v4360_v27 = vld [vmem:[#allocation8 + $0xd0] sm:$0xf0] }
 0x8d2   :  { %v3873_v46 = vor.u32 %v4360_v27, %v3872_v26 }
 0x8d5   :  { %1989 = vmatpush.bf16.msra.mxu1 %v3925_v36 }
 0x8d9   :  { %1990 = vmatpush.bf16.msra.mxu1 %v3913_v22 }
 0x8dd   :  { %1991 = vmatpush.bf16.msra.mxu1 %v3901_v58 }
 0x937   :  { %v1773_v2 = vpop.xlane.xlu2 %1772 }
 0x938   :  { %v1776_v3 = vmul.f32 %v1773_v2, %v4938_v39  ;;  %v3897_v2 = vor.u32 %v4366_v0, %v3896_v63 }
 0x93a   :  { %v5143_v6 = vsub.f32 %v1768_v19, %v1776_v3  ;;  %v3888_v19 = vld [vmem:[#allocation8 + $0xf0] sm:$0xf]  ;;  %2020 = vmatpush.bf16.msrb.mxu3 %v3897_v2  ;;  %v3876_v3 = vld [vmem:[#allocation8 + $0xd8] sm:$0xf] }
 0x93b   :  { %v3889_v54 = vor.u32 %v4365_v49, %v3888_v19 }
 0x93c   :  { %v1780_v8 = vmul.f32 %v5143_v6, %v5143_v6 }
 0x93d   :  { %1992 = vmatpush.bf16.msra.mxu1 %v3889_v54 }
 0x93e   :  { %1782 = vadd.xlane.f32.xlu0 %v1780_v8  ;;  %v4362_v8 = vld [vmem:[#allocation8 + $0xe0] sm:$0xf0]  ;;  %2021 = vmatpush.bf16.msrb.mxu3 %v3885_v15 }
 0x93f   :  { %v1775_v31 = vpop.xlane.xlu2 %1774 }
 0x940   :  { %v1777_v9 = vmul.f32 %v1775_v31, %v4938_v39  ;;  %v4361_v31 = vld [vmem:[#allocation8 + $0xdc] sm:$0xf] }
 0x942   :  { %v5148_v10 = vsub.f32 %v1769_v1, %v1777_v9  ;;  %v3893_v1 = vor.u32 %v4364_v25, %v3890_v62  ;;  %v3877_v9 = vor.u32 %v4362_v8, %v3876_v3  ;;  %2022 = vmatpush.bf16.msrb.mxu3 %v3873_v46 }
 0x944   :  { %v1781_v11 = vmul.f32 %v5148_v10, %v5148_v10  ;;  %2006 = vmatpush.bf16.msrb.mxu2 %v3893_v1  ;;  %1993 = vmatpush.bf16.msra.mxu1 %v3877_v9 }
 0x946   :  { %1784 = vadd.xlane.f32.xlu1 %v1781_v11  ;;  %v3878_v11 = vld [vmem:[#allocation8 + $0xe4] sm:$0xf0] }
 0x947   :  { %v3881_v14 = vor.u32 %v4361_v31, %v3878_v11 }
 0x948   :  { %1994 = vmatpush.bf16.msra.mxu1 %v3865_v23 }
 0x949   :  { %2007 = vmatpush.bf16.msrb.mxu2 %v3881_v14 }
 0x94d   :  { %2008 = vmatpush.bf16.msrb.mxu2 %v3869_v21 }
 0x9b1   :  { %v1783_v13 = vpop.xlane.xlu0 %1782 }
 0x9b2   :  { %v1786_v53 = vmul.f32 %v1783_v13, %v4938_v39 }
 0x9b4   :  { %v1788_v29 = vadd.f32 1e-12, %v1786_v53 }
 0x9b6   :  { %4567 = vrsqrt.f32 %v1788_v29  ;;  %vm1796_vm5 = vweird.f32 %v1788_v29 }
 0x9b9   :  { %v1785_v30 = vpop.xlane.xlu1 %1784 }
 0x9ba   :  { %v1787_v24 = vmul.f32 %v1785_v30, %v4938_v39 }
 0x9bc   :  { %v4568_v34 = vpop.eup %4567  ;;  %v1789_v35 = vadd.f32 1e-12, %v1787_v24 }
 0x9bd   :  { %v1791_v28 = vmul.f32 %v4568_v34, %v1788_v29  ;;  %vm1797_vm4 = vweird.f32 %v4568_v34 }
 0x9be   :  { %4569 = vrsqrt.f32 %v1789_v35  ;;  %vm1798_vm6 = vmor %vm1796_vm5, %vm1797_vm4  ;;  %vm1806_vm8 = vweird.f32 %v1789_v35 }
 0x9bf   :  { %v1792_v36 = vmul.f32 %v4568_v34, %v1791_v28 }
 0x9c1   :  { %v1793_v37 = vmul.f32 0.5, %v1792_v36 }
 0x9c3   :  { %v1794_v40 = vsub.f32 1.5, %v1793_v37 }
 0x9c4   :  { %v4570_v41 = vpop.eup %4569 }
 0x9c5   :  { %v1795_v43 = vmul.f32 %v4568_v34, %v1794_v40  ;;  %v1801_v44 = vmul.f32 %v4570_v41, %v1789_v35  ;;  %vm1807_vm7 = vweird.f32 %v4570_v41 }
 0x9c6   :  { %vm1808_vm14 = vmor %vm1806_vm8, %vm1807_vm7 }
 0x9c7   :  { %v1802_v45 = vmul.f32 %v4570_v41, %v1801_v44  ;;  %v1799_v4 = vsel %vm1798_vm6, %v4568_v34, %v1795_v43 }
 0x9c8   :  { %v1810_v48 = vmul.f32 %v1799_v4, %v5143_v6  ;;  %v1851_v6 = vld [vmem:[#allocation7 + $0x23] ss:$8 sm:$0x7] }
 0x9c9   :  { %v1803_v47 = vmul.f32 0.5, %v1802_v45  ;;  %v1853_v38 = vperm.slane %v1851_v6, 0  ;;  %v1854_v49 = vperm.slane %v1851_v6, 1 }
 0x9ca   :  { %v1812_v52 = vmul.f32 %v1810_v48, %v1770_v50 }
 0x9cb   :  { %v1804_v22 = vsub.f32 1.5, %v1803_v47 }
 0x9cc   :  { %v5156_v58 = vadd.f32 %v1812_v52, %v1771_v56 }
 0x9cd   :  { %v1805_v7 = vmul.f32 %v4570_v41, %v1804_v22 }
 0x9cf   :  { %v1809_v33 = vsel %vm1808_vm14, %v4570_v41, %v1805_v7 }
 0x9d0   :  { %v1811_v51 = vmul.f32 %v1809_v33, %v5148_v10  ;;  %v1855_v10 = vperm.slane %v1851_v6, 2 }
 0x9d2   :  { %v1813_v57 = vmul.f32 %v1811_v51, %v1770_v50 }
 0x9d4   :  { %v5158_v59 = vadd.f32 %v1813_v57, %v1771_v56 }
 0x9d6   :  { %v1849_v60 = vpack.c.bf16 %v5158_v59, %v5156_v58 }
 0x9d8   :  { %1995 = vmatmul.bf16.vlgmr.msra.gmra.mxu1 %v1849_v60  ;;  %2009 = vmatmul.bf16.vlgmr.msrb.gmra.mxu2 %v1849_v60 }
 0x9d9   :  { %2023 = vmatmul.bf16.vlgmr.msrb.gmra.mxu3 %v1849_v60 }
 0xa55   :  { %v1996_v55 = vpop.f32.mrf.mxu1 }
 0xa56   :  { %v1997_v61 = vadd.f32 %v1996_v55, %v1853_v38 }
 0xa58   :  { %v2029_v19 = vpack.c.bf16 %v1997_v61, %v1997_v61 }
 0xa5a   :  { %v2140_v25 = vunpack.c.l.b16 %v2029_v19 }
 0xa5b   :  { %v2010_v54 = vpop.f32.mrf.mxu2 }
 0xa5c   :  { %v2141_v62 = vpack.c.b16 %v2140_v25, %v2140_v25  ;;  %v2011_v63 = vadd.f32 %v2010_v54, %v1854_v49  ;;  %v2024_v0 = vpop.f32.mrf.mxu3 }
 0xa5d   :  { %v2025_v1 = vadd.f32 %v2024_v0, %v1855_v10  ;;  %v1998_v32 = vpop.f32.mrf.mxu1 }
 0xa5e   :  { %v2031_v2 = vpack.c.bf16 %v2011_v63, %v2011_v63  ;;  %2142 = vrot.lane.b32.xlu1 %v2141_v62, %s4854_s0  ;;  %v1999_v16 = vadd.f32 %v1998_v32, %v1853_v38 }
 0xa5f   :  { %v5163_v3 = vpack.c.bf16 %v2025_v1, %v2025_v1 }
 0xa60   :  { %v2039_v8 = vsel %vm480_vm9, %v2031_v2, 0  ;;  %v2145_v31 = vunpack.c.l.b16 %v2031_v2  ;;  %v2030_v26 = vpack.c.bf16 %v1999_v16, %v1999_v16 }
 0xa61   :  { %v2105_v9 = vsel %vm557_vm10, %v5163_v3, 0  ;;  %2048 = vmatpush.bf16.xpose.msrb.mxu0 %v2039_v8  ;;  %v2226_v2 = vunpack.c.l.b16 %v5163_v3 }
 0xa62   :  { %v2146_v11 = vpack.c.b16 %v2145_v31, %v2145_v31  ;;  %2114 = vmatpush.bf16.msra.mxu2 %v2105_v9  ;;  %v2169_v21 = vunpack.c.l.b16 %v2030_v26 }
 0xa63   :  { %v2012_v12 = vpop.f32.mrf.mxu2  ;;  %v5210_v32 = vpack.c.b16 %v2226_v2, %v2226_v2 }
 0xa64   :  { %v2013_v13 = vadd.f32 %v2012_v12, %v1854_v49  ;;  %v2026_v14 = vpop.f32.mrf.mxu3  ;;  %2147 = vrot.lane.b32.xlu2 %v2146_v11, %s4854_s0  ;;  %v2170_v46 = vpack.c.b16 %v2169_v21, %v2169_v21 }
 0xa65   :  { %v2027_v15 = vadd.f32 %v2026_v14, %v1855_v10 }
 0xa66   :  { %v2032_v17 = vpack.c.bf16 %v2013_v13, %v2013_v13  ;;  %2273 = vrot.lane.b32.xlu1 %v2141_v62, %s4848_s3 }
 0xa67   :  { %v5170_v18 = vpack.c.bf16 %v2027_v15, %v2027_v15 }
 0xa68   :  { %v2058_v53 = vsel %vm480_vm9, %v2032_v17, 0  ;;  %v2174_v23 = vunpack.c.l.b16 %v2032_v17  ;;  %3958 = vmatmul.msk.bf16.vlgmr.msrb.gmra.mxu0 %vm480_vm9, %v2029_v19 }
 0xa69   :  { %v2124_v42 = vsel %vm557_vm10, %v5170_v18, 0  ;;  %2067 = vmatpush.bf16.xpose.msrb.mxu1 %v2058_v53 }
 0xa6a   :  { %v2175_v27 = vpack.c.b16 %v2174_v23, %v2174_v23  ;;  %2133 = vmatpush.bf16.msra.mxu3 %v2124_v42 }
 0xa6c   :  { %2176 = vrot.lane.b32.xlu0 %v2175_v27, %s4854_s0  ;;  %2275 = vrot.lane.b32.xlu2 %v2146_v11, %s4848_s3 }
 0xa6e   :  { %2414 = vrot.lane.b32.xlu1 %v2175_v27, %s4846_s21 }
 0xa70   :  { %3959 = vmatmul.msk.bf16.vlgmr.msrb.gmra.mxu1 %vm480_vm9, %v2030_v26 }
 0xa74   :  { %2296 = vrot.lane.b32.xlu2 %v2170_v46, %s4848_s3  ;;  %2171 = vrot.lane.b32.xlu0 %v2170_v46, %s4854_s0 }
 0xa7c   :  { %2298 = vrot.lane.b32.xlu0 %v2175_v27, %s4848_s3  ;;  %2389 = vrot.lane.b32.xlu2 %v2141_v62, %s4846_s21 }
 0xa84   :  { %2391 = vrot.lane.b32.xlu0 %v2146_v11, %s4846_s21 }
 0xa8c   :  { %2412 = vrot.lane.b32.xlu0 %v2170_v46, %s4846_s21 }
 0xabe   :  { %v2148_v29 = vpop.permute.xlu2 %2147 }
 0xabf   :  { %v2153_v30 = vsel %vm480_vm9, %v2148_v29, 0 }
 0xac0   :  { %2162 = vmatpush.bf16.xpose.msra.mxu0 %v2153_v30 }
 0xac6   :  { %v2276_v24 = vpop.permute.xlu2 %2275 }
 0xac7   :  { %v2281_v34 = vsel %vm480_vm9, %v2276_v24, 0 }
 0xac8   :  { %2290 = vmatpush.bf16.xpose.msrb.mxu0 %v2281_v34 }
 0xace   :  { %v2297_v56 = vpop.permute.xlu2 %2296 }
 0xad0   :  { %v2143_v35 = vpop.permute.xlu1 %2142 }
 0xad1   :  { %3962 = vmatmul.msk.bf16.vlgmr.msra.gmra.mxu0 %vm480_vm9, %v2143_v35 }
 0xad6   :  { %v2390_v38 = vpop.permute.xlu2 %2389 }
 0xad8   :  { %v2274_v37 = vpop.permute.xlu1 %2273 }
 0xade   :  { %v2177_v28 = vpop.permute.xlu0 %2176 }
 0xadf   :  { %v2182_v36 = vsel %vm480_vm9, %v2177_v28, 0 }
 0xae0   :  { %2191 = vmatpush.bf16.xpose.msra.mxu1 %v2182_v36  ;;  %v2415_v4 = vpop.permute.xlu1 %2414  ;;  %v2250_v36 = vunpack.c.l.b16 %v5170_v18 }
 0xae1   :  { %3966 = vmatmul.msk.bf16.vlgmr.msrb.gmra.mxu0 %vm480_vm9, %v2274_v37  ;;  %v2420_v33 = vsel %vm480_vm9, %v2415_v4, 0 }
 0xae5   :  { %v2050_v40 = vpop.f32.mrf.mxu0 }
 0xae6   :  { %v2073_v41 = vmul.f32 0.17677669, %v2050_v40  ;;  %v2172_v43 = vpop.permute.xlu0 %2171 }
 0xae7   :  { %3963 = vmatmul.msk.bf16.vlgmr.msra.gmra.mxu1 %vm480_vm9, %v2172_v43 }
 0xae8   :  { %v2075_v44 = vadd.f32 %v2073_v41, %v4990_v5  ;;  %v5222_v41 = vpack.c.b16 %v2250_v36, %v2250_v36 }
 0xaea   :  { %v2077_v45 = vsel %vm529_vm11, %v2075_v44, -inf }
 0xaeb   :  { %2078 = vmax.xlane.f32.xlu1 %v2077_v45 }
 0xaed   :  { %v2052_v47 = vpop.f32.mrf.mxu0  ;;  %v2069_v22 = vpop.f32.mrf.mxu1 }
 0xaee   :  { %v2074_v48 = vmul.f32 0.17677669, %v2069_v22  ;;  %v2299_v7 = vpop.permute.xlu0 %2298 }
 0xaef   :  { %v2304_v50 = vsel %vm480_vm9, %v2299_v7, 0 }
 0xaf0   :  { %2313 = vmatpush.bf16.xpose.msrb.mxu1 %v2304_v50  ;;  %v2076_v51 = vadd.f32 %v2074_v48, %v4999_v20 }
 0xaf2   :  { %v2080_v52 = vsel %vm529_vm11, %v2076_v51, -inf }
 0xaf3   :  { %2081 = vmax.xlane.f32.xlu2 %v2080_v52 }
 0xaf5   :  { %v2071_v57 = vpop.f32.mrf.mxu1 }
 0xaf6   :  { %v2392_v60 = vpop.permute.xlu0 %2391 }
 0xaf7   :  { %v2397_v6 = vsel %vm480_vm9, %v2392_v60, 0  ;;  %3967 = vmatmul.msk.bf16.vlgmr.msrb.gmra.mxu1 %vm480_vm9, %v2297_v56 }
 0xaf8   :  { %2429 = vmatpush.bf16.xpose.msra.mxu1 %v2420_v33  ;;  %2406 = vmatpush.bf16.xpose.msra.mxu0 %v2397_v6 }
 0xafe   :  { %v2413_v55 = vpop.permute.xlu0 %2412 }
 0xaff   :  { %3970 = vmatmul.msk.bf16.vlgmr.msra.gmra.mxu0 %vm480_vm9, %v2390_v38 }
 0xb07   :  { %3971 = vmatmul.msk.bf16.vlgmr.msra.gmra.mxu1 %vm480_vm9, %v2413_v55 }
 0xb4e   :  { %v2164_v61 = vpop.f32.mrf.mxu0 }
 0xb4f   :  { %v2197_v19 = vmul.f32 0.17677669, %v2164_v61 }
 0xb51   :  { %v2199_v49 = vadd.f32 %v2197_v19, %v4990_v5 }
 0xb53   :  { %v2201_v10 = vsel %vm529_vm11, %v2199_v49, -inf }
 0xb54   :  { %2202 = vmax.xlane.f32.xlu0 %v2201_v10 }
 0xb56   :  { %v2166_v25 = vpop.f32.mrf.mxu0 }
 0xb5e   :  { %v2079_v54 = vpop.xlane.xlu1 %2078  ;;  %v2292_v62 = vpop.f32.mrf.mxu0 }
 0xb5f   :  { %v2319_v63 = vmul.f32 0.17677669, %v2292_v62  ;;  %v2083_v0 = vsub.f32 %v2075_v44, %v2079_v54 }
 0xb61   :  { %v5205_v1 = vadd.f32 %v2319_v63, %v4990_v5  ;;  %v2085_v31 = vmul.f32 1.442695, %v2083_v0 }
 0xb63   :  { %v2323_v8 = vsel %vm529_vm11, %v5205_v1, -inf  ;;  %4571 = vpow2.f32 %v2085_v31 }
 0xb64   :  { %v2193_v9 = vpop.f32.mrf.mxu1  ;;  %2324 = vmax.xlane.f32.xlu1 %v2323_v8 }
 0xb65   :  { %v2198_v11 = vmul.f32 0.17677669, %v2193_v9 }
 0xb66   :  { %v2294_v12 = vpop.f32.mrf.mxu0  ;;  %v2082_v21 = vpop.xlane.xlu2 %2081 }
 0xb67   :  { %v2200_v13 = vadd.f32 %v2198_v11, %v4999_v20  ;;  %v2084_v46 = vsub.f32 %v2076_v51, %v2082_v21 }
 0xb68   :  { %2228 = vrot.lane.b32.xlu0 %v5210_v32, %s4854_s0 }
 0xb69   :  { %v2204_v14 = vsel %vm529_vm11, %v2200_v13, -inf  ;;  %v4572_v15 = vpop.eup %4571  ;;  %v2087_v29 = vmul.f32 1.442695, %v2084_v46 }
 0xb6a   :  { %2205 = vmax.xlane.f32.xlu2 %v2204_v14  ;;  %v2089_v16 = vsel %vm529_vm11, %v4572_v15, 0.0 }
 0xb6b   :  { %4573 = vpow2.f32 %v2087_v29 }
 0xb6c   :  { %v2195_v3 = vpop.f32.mrf.mxu1 }
 0xb71   :  { %v4574_v40 = vpop.eup %4573 }
 0xb72   :  { %2090 = vadd.xlane.f32.xlu2 %v2089_v16  ;;  %v2092_v44 = vsel %vm529_vm11, %v4574_v40, 0.0 }
 0xb74   :  { %v2315_v17 = vpop.f32.mrf.mxu1 }
 0xb75   :  { %v2320_v53 = vmul.f32 0.17677669, %v2315_v17 }
 0xb77   :  { %v2322_v23 = vadd.f32 %v2320_v53, %v4999_v20 }
 0xb79   :  { %v2326_v42 = vsel %vm529_vm11, %v2322_v23, -inf }
 0xb7a   :  { %2327 = vmax.xlane.f32.xlu2 %v2326_v42 }
 0xb7c   :  { %v2317_v26 = vpop.f32.mrf.mxu1  ;;  %v2408_v27 = vpop.f32.mrf.mxu0 }
 0xb7d   :  { %v2435_v43 = vmul.f32 0.17677669, %v2408_v27 }
 0xb7f   :  { %v2437_v45 = vadd.f32 %v2435_v43, %v4990_v5 }
 0xb84   :  { %v2410_v30 = vpop.f32.mrf.mxu0  ;;  %v2431_v24 = vpop.f32.mrf.mxu1 }
 0xb85   :  { %v2436_v34 = vmul.f32 0.17677669, %v2431_v24 }
 0xb87   :  { %v2438_v35 = vadd.f32 %v2436_v34, %v4999_v20  ;;  %v2439_v20 = vsel %vm529_vm11, %v2437_v45, -inf }
 0xb89   :  { %v2442_v28 = vsel %vm529_vm11, %v2438_v35, -inf }
 0xb8a   :  { %2443 = vmax.xlane.f32.xlu1 %v2442_v28 }
 0xb8c   :  { %v2433_v37 = vpop.f32.mrf.mxu1 }
 0xb92   :  { %2368 = vrot.lane.b32.xlu2 %v5222_v41, %s4848_s3  ;;  %2093 = vadd.xlane.f32.xlu0 %v2092_v44 }
 0xb9a   :  { %2440 = vmax.xlane.f32.xlu0 %v2439_v20 }
 0xbae   :  { %2347 = vrot.lane.b32.xlu0 %v5210_v32, %s4848_s3 }
 0xbc7   :  { %v2203_v18 = vpop.xlane.xlu0 %2202 }
 0xbc8   :  { %v2207_v4 = vsub.f32 %v2199_v49, %v2203_v18 }
 0xbca   :  { %v2209_v47 = vmul.f32 1.442695, %v2207_v4 }
 0xbcc   :  { %4575 = vpow2.f32 %v2209_v47 }
 0xbd2   :  { %v4576_v22 = vpop.eup %4575 }
 0xbd3   :  { %v2213_v48 = vsel %vm529_vm11, %v4576_v22, 0.0 }
 0xbd4   :  { %2214 = vadd.xlane.f32.xlu1 %v2213_v48 }
 0xbd7   :  { %v2325_v33 = vpop.xlane.xlu1 %2324 }
 0xbd8   :  { %v2329_v52 = vsub.f32 %v5205_v1, %v2325_v33 }
 0xbda   :  { %v2229_v7 = vpop.permute.xlu0 %2228  ;;  %v2331_v57 = vmul.f32 1.442695, %v2329_v52 }
 0xbdb   :  { %v2234_v50 = vsel %vm557_vm10, %v2229_v7, 0 }
 0xbdc   :  { %2243 = vmatpush.bf16.msrb.mxu2 %v2234_v50 }
 0xbdd   :  { %v2206_v5 = vpop.xlane.xlu2 %2205 }
 0xbde   :  { %v2208_v51 = vsub.f32 %v2200_v13, %v2206_v5 }
 0xbe0   :  { %v2211_v56 = vmul.f32 1.442695, %v2208_v51 }
 0xbe2   :  { %4577 = vpow2.f32 %v2211_v56 }
 0xbe5   :  { %v2091_v60 = vpop.xlane.xlu2 %2090 }
 0xbe6   :  { %4579 = vrcp.f32 %v2091_v60 }
 0xbe7   :  { %4581 = vpow2.f32 %v2331_v57 }
 0xbe8   :  { %v4578_v6 = vpop.eup %4577 }
 0xbe9   :  { %v2216_v38 = vsel %vm529_vm11, %v4578_v6, 0.0 }
 0xbea   :  { %2217 = vadd.xlane.f32.xlu2 %v2216_v38 }
 0xbec   :  { %v4580_v55 = vpop.eup %4579 }
 0xbed   :  { %v2097_v61 = vmul.f32 %v4580_v55, %v4572_v15  ;;  %v2328_v19 = vpop.xlane.xlu2 %2327  ;;  %2252 = vrot.lane.b32.xlu1 %v5222_v41, %s4854_s0  ;;  %v4582_v49 = vpop.eup %4581 }
 0xbee   :  { %v2330_v10 = vsub.f32 %v2322_v23, %v2328_v19  ;;  %v2335_v62 = vsel %vm529_vm11, %v4582_v49, 0.0 }
 0xbef   :  { %v2099_v25 = vpack.c.bf16 %v2097_v61, %v2097_v61 }
 0xbf0   :  { %v2333_v54 = vmul.f32 1.442695, %v2330_v10 }
 0xbf1   :  { %3960 = vmatmul.msk.bf16.vlgmr.msra.gmra.mxu2 %vm529_vm11, %v2099_v25 }
 0xbf2   :  { %4583 = vpow2.f32 %v2333_v54  ;;  %2336 = vadd.xlane.f32.xlu2 %v2335_v62 }
 0xbf5   :  { %v2369_v29 = vpop.permute.xlu2 %2368 }
 0xbf6   :  { %v2374_v34 = vsel %vm557_vm10, %v2369_v29, 0 }
 0xbf8   :  { %v4584_v63 = vpop.eup %4583 }
 0xbf9   :  { %v2338_v0 = vsel %vm529_vm11, %v4584_v63, 0.0 }
 0xbfa   :  { %2339 = vadd.xlane.f32.xlu2 %v2338_v0 }
 0xbfd   :  { %v2444_v1 = vpop.xlane.xlu1 %2443 }
 0xbfe   :  { %v2446_v2 = vsub.f32 %v2438_v35, %v2444_v1 }
 0xc00   :  { %v2449_v8 = vmul.f32 1.442695, %v2446_v2 }
 0xc02   :  { %4585 = vpow2.f32 %v2449_v8 }
 0xc05   :  { %v2094_v31 = vpop.xlane.xlu0 %2093 }
 0xc06   :  { %4587 = vrcp.f32 %v2094_v31 }
 0xc08   :  { %v4586_v9 = vpop.eup %4585 }
 0xc09   :  { %v2454_v11 = vsel %vm529_vm11, %v4586_v9, 0.0 }
 0xc0a   :  { %2455 = vadd.xlane.f32.xlu0 %v2454_v11 }
 0xc0c   :  { %v4588_v12 = vpop.eup %4587 }
 0xc0d   :  { %v2098_v13 = vmul.f32 %v4588_v12, %v4574_v40  ;;  %v2441_v14 = vpop.xlane.xlu0 %2440  ;;  %v4389_v12 = vld [vmem:[#allocation10 + $0x78] sm:$0xff] }
 0xc0e   :  { %v2445_v3 = vsub.f32 %v2437_v45, %v2441_v14  ;;  %2602 = vmatpush.bf16.msrb.mxu0 %v4389_v12  ;;  %v4387_v14 = vld [vmem:[#allocation10 + $0x68] sm:$0xff]  ;;  %v4088_v12 = vld [vmem:[#allocation11 + $0x1a0] sm:$0xf] }
 0xc0f   :  { %v2100_v15 = vpack.c.bf16 %v2098_v13, %v2098_v13  ;;  %v4388_v13 = vld [vmem:[#allocation10 + $0x70] sm:$0xff] }
 0xc10   :  { %v2447_v16 = vmul.f32 1.442695, %v2445_v3  ;;  %v4386_v3 = vld [vmem:[#allocation10 + $0x60] sm:$0xff] }
 0xc11   :  { %3961 = vmatmul.msk.bf16.vlgmr.msra.gmra.mxu3 %vm529_vm11, %v2100_v15  ;;  %v4385_v15 = vld [vmem:[#allocation10 + $0x58] sm:$0xff] }
 0xc12   :  { %4589 = vpow2.f32 %v2447_v16  ;;  %2463 = vrot.lane.b32.xlu2 %v5210_v32, %s4846_s21  ;;  %2603 = vmatpush.bf16.msrb.mxu0 %v4388_v13  ;;  %v4384_v16 = vld [vmem:[#allocation10 + $0x50] sm:$0xff] }
 0xc13   :  { %v4412_v13 = vld [vmem:[#allocation11 + $0x1ac] sm:$0xf0] }
 0xc16   :  { %2604 = vmatpush.bf16.msrb.mxu0 %v4387_v14  ;;  %v4410_v14 = vld [vmem:[#allocation11 + $0x1a4] sm:$0xf] }
 0xc18   :  { %v4590_v17 = vpop.eup %4589 }
 0xc19   :  { %v2451_v53 = vsel %vm529_vm11, %v4590_v17, 0.0 }
 0xc1a   :  { %2484 = vrot.lane.b32.xlu2 %v5222_v41, %s4846_s21  ;;  %2452 = vadd.xlane.f32.xlu1 %v2451_v53  ;;  %v4382_v53 = vld [vmem:[#allocation10 + $0x40] sm:$0xff] }
 0xc1b   :  { %2605 = vmatpush.bf16.msrb.mxu0 %v4386_v3  ;;  %v4089_v3 = vor.u32 %v4412_v13, %v4088_v12  ;;  %v4008_v13 = vld [vmem:[#allocation11 + $0x100] sm:$0xf] }
 0xc1f   :  { %2606 = vmatpush.bf16.msrb.mxu0 %v4385_v15  ;;  %v4090_v15 = vld [vmem:[#allocation11 + $0x1b0] sm:$0xf0] }
 0xc20   :  { %v2348_v23 = vpop.permute.xlu0 %2347 }
 0xc21   :  { %v2353_v42 = vsel %vm557_vm10, %v2348_v23, 0 }
 0xc22   :  { %2362 = vmatpush.bf16.msra.mxu2 %v2353_v42 }
 0xc23   :  { %2607 = vmatpush.bf16.msrb.mxu0 %v4384_v16  ;;  %v4096_v16 = vld [vmem:[#allocation11 + $0x1a8] sm:$0xf] }
 0xc47   :  { %v2215_v26 = vpop.xlane.xlu1 %2214 }
 0xc48   :  { %4591 = vrcp.f32 %v2215_v26 }
 0xc4e   :  { %v4592_v27 = vpop.eup %4591 }
 0xc4f   :  { %v2221_v21 = vmul.f32 %v4592_v27, %v4576_v22 }
 0xc51   :  { %v2223_v46 = vpack.c.bf16 %v2221_v21, %v2221_v21 }
 0xc53   :  { %3964 = vmatmul.msk.bf16.vlgmr.msrb.gmra.mxu2 %vm529_vm11, %v2223_v46 }
 0xc5d   :  { %v2218_v32 = vpop.xlane.xlu2 %2217 }
 0xc5e   :  { %4593 = vrcp.f32 %v2218_v32 }
 0xc5f   :  { %v2253_v30 = vpop.permute.xlu1 %2252 }
 0xc60   :  { %v2258_v24 = vsel %vm557_vm10, %v2253_v30, 0 }
 0xc61   :  { %2267 = vmatpush.bf16.msrb.mxu3 %v2258_v24 }
 0xc64   :  { %v4594_v35 = vpop.eup %4593 }
 0xc65   :  { %2383 = vmatpush.bf16.msra.mxu3 %v2374_v34  ;;  %v2222_v28 = vmul.f32 %v4594_v35, %v4578_v6  ;;  %v2337_v36 = vpop.xlane.xlu2 %2336 }
 0xc66   :  { %4595 = vrcp.f32 %v2337_v36 }
 0xc67   :  { %v2224_v37 = vpack.c.bf16 %v2222_v28, %v2222_v28 }
 0xc69   :  { %3965 = vmatmul.msk.bf16.vlgmr.msrb.gmra.mxu3 %vm529_vm11, %v2224_v37 }
 0xc6c   :  { %v4596_v40 = vpop.eup %4595 }
 0xc6d   :  { %v2343_v41 = vmul.f32 %v4596_v40, %v4582_v49  ;;  %v2340_v43 = vpop.xlane.xlu2 %2339 }
 0xc6e   :  { %4597 = vrcp.f32 %v2340_v43 }
 0xc6f   :  { %v2345_v44 = vpack.c.bf16 %v2343_v41, %v2343_v41  ;;  %v2553_v41 = vld [vmem:[#allocation7 + $0x24] ss:$0 sm:$0xff] }
 0xc71   :  { %3968 = vmatmul.msk.bf16.vlgmr.msra.gmra.mxu2 %vm529_vm11, %v2345_v44 }
 0xc74   :  { %v4598_v45 = vpop.eup %4597  ;;  %v5253_v20 = vpop.f32.mrf.mxu2 }
 0xc75   :  { %v2344_v18 = vmul.f32 %v4598_v45, %v4584_v63  ;;  %v2464_v4 = vpop.permute.xlu2 %2463 }
 0xc76   :  { %v2469_v47 = vsel %vm557_vm10, %v2464_v4, 0 }
 0xc77   :  { %v2346_v22 = vpack.c.bf16 %v2344_v18, %v2344_v18  ;;  %2478 = vmatpush.bf16.msrb.mxu2 %v2469_v47 }
 0xc79   :  { %3969 = vmatmul.msk.bf16.vlgmr.msra.gmra.mxu3 %vm529_vm11, %v2346_v22 }
 0xc7c   :  { %v2118_v48 = vpop.f32.mrf.mxu2 }
 0xc7d   :  { %v2485_v7 = vpop.permute.xlu2 %2484  ;;  %v2456_v50 = vpop.xlane.xlu0 %2455 }
 0xc7e   :  { %v2490_v33 = vsel %vm557_vm10, %v2485_v7, 0  ;;  %4599 = vrcp.f32 %v2456_v50 }
 0xc7f   :  { %2499 = vmatpush.bf16.msrb.mxu3 %v2490_v33 }
 0xc84   :  { %v4600_v5 = vpop.eup %4599 }
 0xc85   :  { %v2460_v51 = vmul.f32 %v4600_v5, %v4586_v9 }
 0xc87   :  { %v2462_v52 = vpack.c.bf16 %v2460_v51, %v2460_v51  ;;  %v4420_v51 = vld [vmem:[#allocation11 + $0x1ec] sm:$0xf0] }
 0xc89   :  { %3973 = vmatmul.msk.bf16.vlgmr.msrb.gmra.mxu3 %vm529_vm11, %v2462_v52  ;;  %v4418_v52 = vld [vmem:[#allocation11 + $0x1e4] sm:$0xf] }
 0xc8d   :  { %v2453_v56 = vpop.xlane.xlu1 %2452 }
 0xc8e   :  { %4601 = vrcp.f32 %v2453_v56 }
 0xc94   :  { %v4602_v57 = vpop.eup %4601  ;;  %v2135_v60 = vpop.f32.mrf.mxu3 }
 0xc95   :  { %v2459_v6 = vmul.f32 %v4602_v57, %v4590_v17  ;;  %v4383_v17 = vld [vmem:[#allocation10 + $0x48] sm:$0xff]  ;;  %v4122_v57 = vld [vmem:[#allocation11 + $0x1f0] sm:$0xf0] }
 0xc96   :  { %2608 = vmatpush.bf16.msrb.mxu0 %v4383_v17  ;;  %v4413_v17 = vld [vmem:[#allocation11 + $0x1b4] sm:$0xf0] }
 0xc97   :  { %v2461_v38 = vpack.c.bf16 %v2459_v6, %v2459_v6  ;;  %v4421_v6 = vld [vmem:[#allocation11 + $0x1f4] sm:$0xf0] }
 0xc99   :  { %3972 = vmatmul.msk.bf16.vlgmr.msrb.gmra.mxu2 %vm529_vm11, %v2461_v38  ;;  %v4125_v38 = vor.u32 %v4418_v52, %v4122_v57  ;;  %v4048_v57 = vld [vmem:[#allocation11 + $0x148] sm:$0xf] }
 0xc9a   :  { %2609 = vmatpush.bf16.msrb.mxu0 %v4382_v53  ;;  %v4093_v53 = vor.u32 %v4410_v14, %v4090_v15  ;;  %v4392_v14 = vld [vmem:[#allocation11 + $0x10c] sm:$0xf0] }
 0xc9b   :  { %2883 = vmatpush.bf16.msra.mxu2 %v4125_v38 }
 0xc9c   :  { %v2137_v55 = vpop.f32.mrf.mxu3 }
 0xcd6   :  { %v2245_v61 = vpop.f32.mrf.mxu2 }
 0xcde   :  { %v2247_v19 = vpop.f32.mrf.mxu2 }
 0xcdf   :  { %v4130_v19 = vld [vmem:[#allocation11 + $0x1f8] sm:$0xf0] }
 0xcec   :  { %v2269_v49 = vpop.f32.mrf.mxu3 }
 0xced   :  { %v4492_v10 = vpack.i.bf16 %v2269_v49, %v2245_v61  ;;  %v4419_v61 = vld [vmem:[#allocation11 + $0x1ec] sm:$0xf] }
 0xcee   :  { %v4133_v49 = vor.u32 %v4419_v61, %v4130_v19  ;;  %v4050_v61 = vld [vmem:[#allocation11 + $0x158] sm:$0xf0] }
 0xcef   :  { %4493 = vrot.lane.b32.xlu2 %v4492_v10, %s4846_s21  ;;  %v4104_v10 = vld [vmem:[#allocation11 + $0x1c0] sm:$0xf] }
 0xcf0   :  { %2911 = vmatpush.bf16.msra.mxu0 %v4133_v49  ;;  %v4024_v49 = vld [vmem:[#allocation11 + $0x120] sm:$0xf] }
 0xcf4   :  { %v2271_v25 = vpop.f32.mrf.mxu3  ;;  %v2364_v54 = vpop.f32.mrf.mxu2 }
 0xcf5   :  { %v4416_v25 = vld [vmem:[#allocation11 + $0x1cc] sm:$0xf0] }
 0xcfc   :  { %v2366_v62 = vpop.f32.mrf.mxu2  ;;  %v2385_v63 = vpop.f32.mrf.mxu3 }
 0xcfd   :  { %v4497_v0 = vpack.i.bf16 %v2385_v63, %v2364_v54  ;;  %v4414_v54 = vld [vmem:[#allocation11 + $0x1c4] sm:$0xf]  ;;  %v4105_v62 = vor.u32 %v4416_v25, %v4104_v10  ;;  %v4106_v63 = vld [vmem:[#allocation11 + $0x1d0] sm:$0xf0]  ;;  %v4396_v10 = vld [vmem:[#allocation11 + $0x12c] sm:$0xf0] }
 0xcfe   :  { %v4394_v25 = vld [vmem:[#allocation11 + $0x124] sm:$0xf] }
 0xcff   :  { %4498 = vrot.lane.b32.xlu1 %v4497_v0, %s4848_s3  ;;  %v4112_v0 = vld [vmem:[#allocation11 + $0x1c8] sm:$0xf] }
 0xd04   :  { %v2387_v1 = vpop.f32.mrf.mxu3 }
 0xd05   :  { %v4417_v1 = vld [vmem:[#allocation11 + $0x1d4] sm:$0xf0] }
 0xd0c   :  { %v2501_v2 = vpop.f32.mrf.mxu3 }
 0xd14   :  { %v2503_v8 = vpop.f32.mrf.mxu3 }
 0xd15   :  { %v4113_v8 = vor.u32 %v4417_v1, %v4112_v0  ;;  %v4397_v0 = vld [vmem:[#allocation11 + $0x134] sm:$0xf0] }
 0xd1c   :  { %v2480_v31 = vpop.f32.mrf.mxu2 }
 0xd1d   :  { %v4502_v9 = vpack.i.bf16 %v2501_v2, %v2480_v31  ;;  %v4109_v2 = vor.u32 %v4414_v54, %v4106_v63  ;;  %v4415_v31 = vld [vmem:[#allocation11 + $0x1cc] sm:$0xf]  ;;  %v4025_v54 = vor.u32 %v4396_v10, %v4024_v49  ;;  %v4032_v63 = vld [vmem:[#allocation11 + $0x128] sm:$0xf]  ;;  %v4426_v49 = vld [vmem:[#allocation13 + $0x120] sm:$0xff] }
 0xd1e   :  { %v4450_v10 = vld [vmem:[#allocation13 + $0x1e0] sm:$0xff] }
 0xd1f   :  { %4503 = vrot.lane.b32.xlu0 %v4502_v9, %s4854_s0  ;;  %v4114_v9 = vld [vmem:[#allocation11 + $0x1d8] sm:$0xf0]  ;;  %2884 = vmatpush.bf16.msra.mxu2 %v4109_v2 }
 0xd23   :  { %2885 = vmatpush.bf16.msra.mxu2 %v4093_v53  ;;  %v4016_v53 = vld [vmem:[#allocation11 + $0x108] sm:$0xf] }
 0xd24   :  { %v2482_v11 = vpop.f32.mrf.mxu2 }
 0xd25   :  { %v4117_v11 = vor.u32 %v4415_v31, %v4114_v9  ;;  %v4395_v31 = vld [vmem:[#allocation11 + $0x12c] sm:$0xf]  ;;  %v4034_v9 = vld [vmem:[#allocation11 + $0x138] sm:$0xf0] }
 0xd26   :  { %v4037_v12 = vor.u32 %v4395_v31, %v4034_v9  ;;  %v5292_v31 = vld [vmem:[#allocation7 + $0x27] ss:$8 sm:$0xf] }
 0xd27   :  { %2912 = vmatpush.bf16.msra.mxu0 %v4117_v11  ;;  %v4433_v9 = vld [vmem:[#allocation13 + $0x158] sm:$0xff] }
 0xd49   :  { %v4494_v23 = vpop.permute.xlu2 %4493 }
 0xd4a   :  { %v4496_v26 = vunpack.i.h.bf16 %v4494_v23  ;;  %v4495_v27 = vunpack.i.l.bf16 %v4494_v23  ;;  %v4097_v23 = vor.u32 %v4413_v17, %v4096_v16  ;;  %v4009_v16 = vor.u32 %v4392_v14, %v4008_v13  ;;  %v4010_v17 = vld [vmem:[#allocation11 + $0x110] sm:$0xf0]  ;;  %v4447_v13 = vld [vmem:[#allocation13 + $0x1c8] sm:$0xff] }
 0xd4b   :  { %v2701_v14 = vperm.slane %v5292_v31, 0 }
 0xd4c   :  { %v2530_v32 = vsel %vm480_vm9, %v2135_v60, %v4496_v26  ;;  %v2529_v30 = vsel %vm480_vm9, %v5253_v20, %v4495_v27  ;;  %v4128_v60 = vld [vmem:[#allocation11 + $0x1e8] sm:$0xf]  ;;  %v4098_v26 = vld [vmem:[#allocation11 + $0x1b8] sm:$0xf0] }
 0xd4d   :  { %v4129_v55 = vor.u32 %v4421_v6, %v4128_v60  ;;  %v4401_v60 = vld [vmem:[#allocation11 + $0x154] sm:$0xf0] }
 0xd4e   :  { %v4049_v38 = vor.u32 %v4401_v60, %v4048_v57  ;;  %v4428_v57 = vld [vmem:[#allocation13 + $0x130] sm:$0xff] }
 0xd4f   :  { %2897 = vmatpush.bf16.msra.mxu3 %v4129_v55  ;;  %v4399_v55 = vld [vmem:[#allocation11 + $0x14c] sm:$0xf]  ;;  %v4452_v60 = vld [vmem:[#allocation13 + $0x1f0] sm:$0xff] }
 0xd50   :  { %v4053_v19 = vor.u32 %v4399_v55, %v4050_v61  ;;  %v4451_v55 = vld [vmem:[#allocation13 + $0x1e8] sm:$0xff]  ;;  %v4436_v61 = vld [vmem:[#allocation13 + $0x170] sm:$0xff] }
 0xd53   :  { %2898 = vmatpush.bf16.msra.mxu3 %v4113_v8  ;;  %v4033_v8 = vor.u32 %v4397_v0, %v4032_v63  ;;  %v4449_v63 = vld [vmem:[#allocation13 + $0x1d8] sm:$0xff]  ;;  %v4434_v0 = vld [vmem:[#allocation13 + $0x160] sm:$0xff] }
 0xd57   :  { %2899 = vmatpush.bf16.msra.mxu3 %v4097_v23 }
 0xd71   :  { %v4499_v42 = vpop.permute.xlu1 %4498 }
 0xd72   :  { %v4501_v21 = vunpack.i.h.bf16 %v4499_v42  ;;  %v4500_v46 = vunpack.i.l.bf16 %v4499_v42  ;;  %v4411_v42 = vld [vmem:[#allocation11 + $0x1ac] sm:$0xf] }
 0xd73   :  { %v4101_v27 = vor.u32 %v4411_v42, %v4098_v26  ;;  %v4393_v42 = vld [vmem:[#allocation11 + $0x114] sm:$0xf0]  ;;  %v4391_v26 = vld [vmem:[#allocation11 + $0x10c] sm:$0xf] }
 0xd74   :  { %v2532_v35 = vsel %vm985_vm12, %v2530_v32, %v4501_v21  ;;  %v2531_v28 = vsel %vm985_vm12, %v2529_v30, %v4500_v46  ;;  %v4072_v21 = vld [vmem:[#allocation11 + $0x180] sm:$0xf]  ;;  %v4408_v46 = vld [vmem:[#allocation11 + $0x18c] sm:$0xf0]  ;;  %v4074_v30 = vld [vmem:[#allocation11 + $0x190] sm:$0xf0] }
 0xd75   :  { %2913 = vmatpush.bf16.msra.mxu0 %v4101_v27  ;;  %v4073_v32 = vor.u32 %v4408_v46, %v4072_v21  ;;  %v4018_v27 = vld [vmem:[#allocation11 + $0x118] sm:$0xf0]  ;;  %v4017_v21 = vor.u32 %v4393_v42, %v4016_v53  ;;  %v4422_v53 = vld [vmem:[#allocation13 + $0x100] sm:$0xff] }
 0xd76   :  { %v4021_v46 = vor.u32 %v4391_v26, %v4018_v27 }
 0xd91   :  { %v4504_v29 = vpop.permute.xlu0 %4503 }
 0xd92   :  { %v4506_v24 = vunpack.i.h.bf16 %v4504_v29  ;;  %v4505_v34 = vunpack.i.l.bf16 %v4504_v29  ;;  %v4406_v29 = vld [vmem:[#allocation11 + $0x184] sm:$0xf] }
 0xd94   :  { %v2534_v36 = vsel %vm988_vm13, %v2532_v35, %v4506_v24  ;;  %v2533_v37 = vsel %vm988_vm13, %v2531_v28, %v4505_v34  ;;  %v4080_v24 = vld [vmem:[#allocation11 + $0x188] sm:$0xf]  ;;  %v4409_v34 = vld [vmem:[#allocation11 + $0x194] sm:$0xf0]  ;;  %v4077_v35 = vor.u32 %v4406_v29, %v4074_v30 }
 0xd95   :  { %v2552_v40 = vpack.c.bf16 %v2534_v36, %v2533_v37  ;;  %v4081_v28 = vor.u32 %v4409_v34, %v4080_v24  ;;  %v4407_v36 = vld [vmem:[#allocation11 + $0x18c] sm:$0xf]  ;;  %v4082_v37 = vld [vmem:[#allocation11 + $0x198] sm:$0xf0] }
 0xd96   :  { %2886 = vmatpush.bf16.msra.mxu2 %v4077_v35 }
 0xd97   :  { %2610 = vmatmul.bf16.vlgmr.msrb.gmra.mxu0 %v2552_v40  ;;  %v4085_v40 = vor.u32 %v4407_v36, %v4082_v37  ;;  %2900 = vmatpush.bf16.msra.mxu3 %v4081_v28 }
 0xd99   :  { %2914 = vmatpush.bf16.msra.mxu0 %v4085_v40 }
 0xe14   :  { %v2611_v43 = vpop.f32.mrf.mxu0 }
 0xe15   :  { %v2612_v44 = vadd.f32 %v2611_v43, %v2553_v41  ;;  %v4404_v43 = vld [vmem:[#allocation11 + $0x16c] sm:$0xf0] }
 0xe17   :  { %v2616_v45 = vadd.f32 %v2612_v44, %v5156_v58  ;;  %v4402_v44 = vld [vmem:[#allocation11 + $0x164] sm:$0xf] }
 0xe19   :  { %2620 = vadd.xlane.f32.xlu2 %v2616_v45 }
 0xe1c   :  { %v2613_v18 = vpop.f32.mrf.mxu0 }
 0xe1d   :  { %v2614_v20 = vadd.f32 %v2613_v18, %v2553_v41  ;;  %v4056_v41 = vld [vmem:[#allocation11 + $0x160] sm:$0xf]  ;;  %v4058_v18 = vld [vmem:[#allocation11 + $0x170] sm:$0xf0] }
 0xe1f   :  { %v2617_v4 = vadd.f32 %v2614_v20, %v5158_v59  ;;  %v4120_v59 = vld [vmem:[#allocation11 + $0x1e0] sm:$0xf]  ;;  %v4064_v20 = vld [vmem:[#allocation11 + $0x168] sm:$0xf] }
 0xe20   :  { %v4121_v56 = vor.u32 %v4420_v51, %v4120_v59  ;;  %v4400_v59 = vld [vmem:[#allocation11 + $0x14c] sm:$0xf0]  ;;  %v4398_v51 = vld [vmem:[#allocation11 + $0x144] sm:$0xf] }
 0xe21   :  { %2622 = vadd.xlane.f32.xlu0 %v2617_v4 }
 0xe22   :  { %2869 = vmatpush.bf16.msrb.mxu1 %v4121_v56  ;;  %v4042_v56 = vld [vmem:[#allocation11 + $0x150] sm:$0xf0] }
 0xe23   :  { %v4045_v6 = vor.u32 %v4398_v51, %v4042_v56  ;;  %v4453_v56 = vld [vmem:[#allocation13 + $0x1f8] sm:$0xff] }
 0xe26   :  { %2870 = vmatpush.bf16.msrb.mxu1 %v4105_v62  ;;  %v4026_v62 = vld [vmem:[#allocation11 + $0x130] sm:$0xf0] }
 0xe27   :  { %v4029_v2 = vor.u32 %v4394_v25, %v4026_v62  ;;  %v4435_v25 = vld [vmem:[#allocation13 + $0x168] sm:$0xff]  ;;  %v4425_v62 = vld [vmem:[#allocation13 + $0x118] sm:$0xff] }
 0xe2a   :  { %2871 = vmatpush.bf16.msrb.mxu1 %v4089_v3  ;;  %v4390_v3 = vld [vmem:[#allocation11 + $0x104] sm:$0xf] }
 0xe2b   :  { %v4013_v23 = vor.u32 %v4390_v3, %v4010_v17  ;;  %v2704_v3 = vperm.slane %v5292_v31, 3 }
 0xe2e   :  { %2872 = vmatpush.bf16.msrb.mxu1 %v4073_v32 }
 0xe8c   :  { %v2621_v47 = vpop.xlane.xlu2 %2620 }
 0xe8d   :  { %v2624_v22 = vmul.f32 %v2621_v47, %v4938_v39  ;;  %v4061_v47 = vor.u32 %v4402_v44, %v4058_v18 }
 0xe8f   :  { %v5273_v48 = vsub.f32 %v2616_v45, %v2624_v22  ;;  %v4057_v45 = vor.u32 %v4404_v43, %v4056_v41  ;;  %2887 = vmatpush.bf16.msra.mxu2 %v4061_v47 }
 0xe91   :  { %v2628_v7 = vmul.f32 %v5273_v48, %v5273_v48  ;;  %2873 = vmatpush.bf16.msrb.mxu1 %v4057_v45 }
 0xe93   :  { %2630 = vadd.xlane.f32.xlu1 %v2628_v7  ;;  %v4403_v7 = vld [vmem:[#allocation11 + $0x16c] sm:$0xf]  ;;  %2888 = vmatpush.bf16.msra.mxu2 %v4045_v6  ;;  %v4445_v6 = vld [vmem:[#allocation13 + $0x1b8] sm:$0xff] }
 0xe94   :  { %v2623_v50 = vpop.xlane.xlu0 %2622 }
 0xe95   :  { %v2625_v33 = vmul.f32 %v2623_v50, %v4938_v39  ;;  %v4066_v50 = vld [vmem:[#allocation11 + $0x178] sm:$0xf0] }
 0xe97   :  { %v5278_v5 = vsub.f32 %v2617_v4, %v2625_v33  ;;  %v4405_v4 = vld [vmem:[#allocation11 + $0x174] sm:$0xf0]  ;;  %v4069_v33 = vor.u32 %v4403_v7, %v4066_v50  ;;  %2889 = vmatpush.bf16.msra.mxu2 %v4029_v2  ;;  %v4424_v2 = vld [vmem:[#allocation13 + $0x110] sm:$0xff] }
 0xe98   :  { %v4065_v22 = vor.u32 %v4405_v4, %v4064_v20  ;;  %v2618_v4 = vld [vmem:[#allocation7 + $0x25] ss:$0 sm:$0xff] }
 0xe99   :  { %v2629_v58 = vmul.f32 %v5278_v5, %v5278_v5  ;;  %2915 = vmatpush.bf16.msra.mxu0 %v4069_v33  ;;  %v2619_v33 = vld [vmem:[#allocation7 + $0x26] ss:$0 sm:$0xff] }
 0xe9a   :  { %2901 = vmatpush.bf16.msra.mxu3 %v4065_v22 }
 0xe9b   :  { %2632 = vadd.xlane.f32.xlu2 %v2629_v58  ;;  %v4040_v58 = vld [vmem:[#allocation11 + $0x140] sm:$0xf]  ;;  %2890 = vmatpush.bf16.msra.mxu2 %v4013_v23 }
 0xe9c   :  { %v4041_v52 = vor.u32 %v4400_v59, %v4040_v58  ;;  %v4446_v23 = vld [vmem:[#allocation13 + $0x1c0] sm:$0xff] }
 0xe9d   :  { %2916 = vmatpush.bf16.msra.mxu0 %v4053_v19  ;;  %v4444_v19 = vld [vmem:[#allocation13 + $0x1b0] sm:$0xff] }
 0xe9e   :  { %2874 = vmatpush.bf16.msrb.mxu1 %v4041_v52  ;;  %2902 = vmatpush.bf16.msra.mxu3 %v4049_v38  ;;  %v4427_v38 = vld [vmem:[#allocation13 + $0x128] sm:$0xff] }
 0xea1   :  { %2917 = vmatpush.bf16.msra.mxu0 %v4037_v12  ;;  %v4423_v12 = vld [vmem:[#allocation13 + $0x108] sm:$0xff] }
 0xea2   :  { %2875 = vmatpush.bf16.msrb.mxu1 %v4025_v54  ;;  %2903 = vmatpush.bf16.msra.mxu3 %v4033_v8  ;;  %v4443_v54 = vld [vmem:[#allocation13 + $0x1a8] sm:$0xff]  ;;  %v4448_v8 = vld [vmem:[#allocation13 + $0x1d0] sm:$0xff] }
 0xea5   :  { %2918 = vmatpush.bf16.msra.mxu0 %v4021_v46  ;;  %v4439_v46 = vld [vmem:[#allocation13 + $0x188] sm:$0xff] }
 0xea6   :  { %2876 = vmatpush.bf16.msrb.mxu1 %v4009_v16  ;;  %2904 = vmatpush.bf16.msra.mxu3 %v4017_v21  ;;  %v4440_v16 = vld [vmem:[#allocation13 + $0x190] sm:$0xff]  ;;  %v4431_v21 = vld [vmem:[#allocation13 + $0x148] sm:$0xff] }
 0xea9   :  { %3301 = vmatpush.bf16.msrb.mxu0 %v4453_v56 }
 0xeaa   :  { %3287 = vmatpush.bf16.msrb.mxu3 %v4445_v6 }
 0xead   :  { %3302 = vmatpush.bf16.msrb.mxu0 %v4452_v60 }
 0xeae   :  { %3288 = vmatpush.bf16.msrb.mxu3 %v4444_v19 }
 0xeb1   :  { %3303 = vmatpush.bf16.msrb.mxu0 %v4451_v55 }
 0xeb2   :  { %3289 = vmatpush.bf16.msrb.mxu3 %v4443_v54 }
 0xeb5   :  { %3304 = vmatpush.bf16.msrb.mxu0 %v4450_v10 }
 0xeb9   :  { %3305 = vmatpush.bf16.msrb.mxu0 %v4449_v63 }
 0xebd   :  { %3306 = vmatpush.bf16.msrb.mxu0 %v4448_v8 }
 0xec1   :  { %3307 = vmatpush.bf16.msrb.mxu0 %v4447_v13 }
 0xec5   :  { %3308 = vmatpush.bf16.msrb.mxu0 %v4446_v23 }
 0xf06   :  { %v2631_v1 = vpop.xlane.xlu1 %2630 }
 0xf07   :  { %v2634_v11 = vmul.f32 %v2631_v1, %v4938_v39  ;;  %v4442_v1 = vld [vmem:[#allocation13 + $0x1a0] sm:$0xff] }
 0xf08   :  { %3290 = vmatpush.bf16.msrb.mxu3 %v4442_v1 }
 0xf09   :  { %v2636_v15 = vadd.f32 1e-12, %v2634_v11  ;;  %v4441_v11 = vld [vmem:[#allocation13 + $0x198] sm:$0xff] }
 0xf0b   :  { %4603 = vrsqrt.f32 %v2636_v15  ;;  %vm2644_vm10 = vweird.f32 %v2636_v15 }
 0xf0c   :  { %3291 = vmatpush.bf16.msrb.mxu3 %v4441_v11 }
 0xf0e   :  { %v2633_v29 = vpop.xlane.xlu2 %2632 }
 0xf0f   :  { %v2635_v32 = vmul.f32 %v2633_v29, %v4938_v39 }
 0xf10   :  { %3292 = vmatpush.bf16.msrb.mxu3 %v4440_v16 }
 0xf11   :  { %v4604_v30 = vpop.eup %4603  ;;  %v2637_v24 = vadd.f32 1e-12, %v2635_v32  ;;  %v2702_v32 = vperm.slane %v5292_v31, 1 }
 0xf12   :  { %v2639_v34 = vmul.f32 %v4604_v30, %v2636_v15  ;;  %vm2645_vm9 = vweird.f32 %v4604_v30  ;;  %v4432_v15 = vld [vmem:[#allocation13 + $0x150] sm:$0xff] }
 0xf13   :  { %4605 = vrsqrt.f32 %v2637_v24  ;;  %vm2646_vm11 = vmor %vm2644_vm10, %vm2645_vm9  ;;  %vm2654_vm13 = vweird.f32 %v2637_v24 }
 0xf14   :  { %v2640_v35 = vmul.f32 %v4604_v30, %v2639_v34  ;;  %3293 = vmatpush.bf16.msrb.mxu3 %v4439_v46 }
 0xf16   :  { %v2641_v28 = vmul.f32 0.5, %v2640_v35 }
 0xf18   :  { %v2642_v36 = vsub.f32 1.5, %v2641_v28 }
 0xf19   :  { %v4606_v37 = vpop.eup %4605 }
 0xf1a   :  { %v2643_v40 = vmul.f32 %v4604_v30, %v2642_v36  ;;  %v2649_v41 = vmul.f32 %v4606_v37, %v2637_v24  ;;  %vm2655_vm12 = vweird.f32 %v4606_v37  ;;  %v2703_v24 = vperm.slane %v5292_v31, 2  ;;  %v4430_v36 = vld [vmem:[#allocation13 + $0x140] sm:$0xff] }
 0xf1b   :  { %vm2656_vm15 = vmor %vm2654_vm13, %vm2655_vm12 }
 0xf1c   :  { %v2650_v43 = vmul.f32 %v4606_v37, %v2649_v41  ;;  %v2647_v44 = vsel %vm2646_vm11, %v4604_v30, %v2643_v40 }
 0xf1d   :  { %v2658_v20 = vmul.f32 %v2647_v44, %v5273_v48  ;;  %v4429_v48 = vld [vmem:[#allocation13 + $0x138] sm:$0xff] }
 0xf1e   :  { %v2651_v45 = vmul.f32 0.5, %v2650_v43  ;;  %3259 = vmatpush.bf16.msra.mxu1 %v4429_v48 }
 0xf1f   :  { %v2660_v7 = vmul.f32 %v2658_v20, %v2618_v4 }
 0xf20   :  { %v2652_v18 = vsub.f32 1.5, %v2651_v45 }
 0xf21   :  { %v5286_v59 = vadd.f32 %v2660_v7, %v2619_v33 }
 0xf22   :  { %v2653_v47 = vmul.f32 %v4606_v37, %v2652_v18  ;;  %3260 = vmatpush.bf16.msra.mxu1 %v4428_v57 }
 0xf24   :  { %v2657_v22 = vsel %vm2656_vm15, %v4606_v37, %v2653_v47  ;;  %v4438_v37 = vld [vmem:[#allocation13 + $0x180] sm:$0xff]  ;;  %vm3433_vm15 = vcmask 1041409  }
 0xf25   :  { %v2659_v50 = vmul.f32 %v2657_v22, %v5278_v5  ;;  %v4437_v5 = vld [vmem:[#allocation13 + $0x178] sm:$0xff]  ;;  %3294 = vmatpush.bf16.msrb.mxu3 %v4438_v37 }
 0xf26   :  { %3273 = vmatpush.bf16.msrb.mxu2 %v4437_v5  ;;  %3261 = vmatpush.bf16.msra.mxu1 %v4427_v38 }
 0xf27   :  { %v2661_v58 = vmul.f32 %v2659_v50, %v2618_v4 }
 0xf29   :  { %v5288_v51 = vadd.f32 %v2661_v58, %v2619_v33 }
 0xf2a   :  { %3274 = vmatpush.bf16.msrb.mxu2 %v4436_v61  ;;  %3262 = vmatpush.bf16.msra.mxu1 %v4426_v49 }
 0xf2b   :  { %v2697_v52 = vpack.c.bf16 %v5288_v51, %v5286_v59 }
 0xf2d   :  { %2877 = vmatmul.bf16.vlgmr.msrb.gmra.mxu1 %v2697_v52  ;;  %2891 = vmatmul.bf16.vlgmr.msra.gmra.mxu2 %v2697_v52 }
 0xf2e   :  { %2905 = vmatmul.bf16.vlgmr.msra.gmra.mxu3 %v2697_v52  ;;  %2919 = vmatmul.bf16.vlgmr.msra.gmra.mxu0 %v2697_v52 }
 0xf2f   :  { %3275 = vmatpush.bf16.msrb.mxu2 %v4435_v25  ;;  %3263 = vmatpush.bf16.msra.mxu1 %v4425_v62 }
 0xf33   :  { %3276 = vmatpush.bf16.msrb.mxu2 %v4434_v0  ;;  %3264 = vmatpush.bf16.msra.mxu1 %v4424_v2 }
 0xf37   :  { %3277 = vmatpush.bf16.msrb.mxu2 %v4433_v9  ;;  %3265 = vmatpush.bf16.msra.mxu1 %v4423_v12 }
 0xf3b   :  { %3278 = vmatpush.bf16.msrb.mxu2 %v4432_v15  ;;  %3266 = vmatpush.bf16.msra.mxu1 %v4422_v53 }
 0xf3f   :  { %3279 = vmatpush.bf16.msrb.mxu2 %v4431_v21 }
 0xf43   :  { %3280 = vmatpush.bf16.msrb.mxu2 %v4430_v36 }
 0xfaa   :  { %v2878_v17 = vpop.f32.mrf.mxu1 }
 0xfab   :  { %v5296_v42 = vadd.f32 %v2878_v17, %v2701_v14  ;;  %v2920_v26 = vpop.f32.mrf.mxu0 }
 0xfac   :  { %v5298_v27 = vadd.f32 %v2920_v26, %v2704_v3 }
 0xfad   :  { %v2925_v29 = vmul.f32 %v5296_v42, %v5296_v42 }
 0xfae   :  { %v2928_v30 = vmul.f32 %v5298_v27, %v5298_v27 }
 0xfaf   :  { %v2933_v34 = vmul.f32 %v2925_v29, %v5296_v42 }
 0xfb0   :  { %v2936_v35 = vmul.f32 %v2928_v30, %v5298_v27  ;;  %v2892_v28 = vpop.f32.mrf.mxu2 }
 0xfb1   :  { %v2941_v40 = vmul.f32 0.044715, %v2933_v34  ;;  %v5308_v41 = vadd.f32 %v2892_v28, %v2702_v32  ;;  %v2906_v43 = vpop.f32.mrf.mxu3 }
 0xfb2   :  { %v2944_v44 = vmul.f32 0.044715, %v2936_v35  ;;  %v5310_v45 = vadd.f32 %v2906_v43, %v2703_v24  ;;  %v2880_v18 = vpop.f32.mrf.mxu1 }
 0xfb3   :  { %v2949_v20 = vadd.f32 %v2941_v40, %v5296_v42  ;;  %v2926_v4 = vmul.f32 %v5308_v41, %v5308_v41  ;;  %v5315_v47 = vadd.f32 %v2880_v18, %v2701_v14  ;;  %v2922_v22 = vpop.f32.mrf.mxu0 }
 0xfb4   :  { %v2952_v7 = vadd.f32 %v2944_v44, %v5298_v27  ;;  %v2927_v50 = vmul.f32 %v5310_v45, %v5310_v45  ;;  %v5320_v33 = vadd.f32 %v2922_v22, %v2704_v3 }
 0xfb5   :  { %v2957_v58 = vmul.f32 0.7978846, %v2949_v20  ;;  %v2934_v52 = vmul.f32 %v2926_v4, %v5308_v41  ;;  %v2929_v48 = vmul.f32 %v5315_v47, %v5315_v47 }
 0xfb6   :  { %v2960_v56 = vmul.f32 0.7978846, %v2952_v7  ;;  %v2935_v57 = vmul.f32 %v2927_v50, %v5310_v45  ;;  %v2932_v60 = vmul.f32 %v5320_v33, %v5320_v33 }
 0xfb7   :  { %v2942_v5 = vmul.f32 0.044715, %v2934_v52  ;;  %v2937_v6 = vmul.f32 %v2929_v48, %v5315_v47  ;;  %4607 = vtanh.f32 %v2957_v58 }
 0xfb8   :  { %v2943_v38 = vmul.f32 0.044715, %v2935_v57  ;;  %v2940_v55 = vmul.f32 %v2932_v60, %v5320_v33  ;;  %v2894_v61 = vpop.f32.mrf.mxu2  ;;  %4609 = vtanh.f32 %v2960_v56 }
 0xfb9   :  { %v2950_v19 = vadd.f32 %v2942_v5, %v5308_v41  ;;  %v2945_v49 = vmul.f32 0.044715, %v2937_v6  ;;  %v2895_v10 = vadd.f32 %v2894_v61, %v2702_v32  ;;  %v2908_v25 = vpop.f32.mrf.mxu3 }
 0xfba   :  { %v2951_v54 = vadd.f32 %v2943_v38, %v5310_v45  ;;  %v2948_v62 = vmul.f32 0.044715, %v2940_v55  ;;  %v2909_v63 = vadd.f32 %v2908_v25, %v2703_v24 }
 0xfbb   :  { %v2958_v0 = vmul.f32 0.7978846, %v2950_v19  ;;  %v2953_v1 = vadd.f32 %v2945_v49, %v5315_v47  ;;  %v2930_v2 = vmul.f32 %v2895_v10, %v2895_v10 }
 0xfbc   :  { %v2959_v8 = vmul.f32 0.7978846, %v2951_v54  ;;  %v2956_v31 = vadd.f32 %v2948_v62, %v5320_v33  ;;  %v2931_v9 = vmul.f32 %v2909_v63, %v2909_v63 }
 0xfbd   :  { %4611 = vtanh.f32 %v2958_v0  ;;  %v2961_v11 = vmul.f32 0.7978846, %v2953_v1  ;;  %v2938_v12 = vmul.f32 %v2930_v2, %v2895_v10  ;;  %v4608_v3 = vpop.eup %4607  ;;  %v3066_v0 = vld [vmem:[#allocation7 + $0x40] ss:$0 sm:$0xff] }
 0xfbe   :  { %4613 = vtanh.f32 %v2959_v8  ;;  %v2964_v13 = vmul.f32 0.7978846, %v2956_v31  ;;  %v2939_v14 = vmul.f32 %v2931_v9, %v2909_v63  ;;  %v4610_v16 = vpop.eup %4609  ;;  %v2973_v23 = vadd.f32 1.0, %v4608_v3  ;;  %v4631_v3 = vld [vmem:[%s5361_s1] sm:$0x3]  ;;  %s4855_s1 = smov [#allocation14]  }
 0xfbf   :  { %4615 = vtanh.f32 %v2961_v11  ;;  %v2946_v15 = vmul.f32 0.044715, %v2938_v12  ;;  %v2976_v46 = vadd.f32 1.0, %v4610_v16  ;;  %s3442_s11 = sshll.u32 %s4855_s1, 4  ;;  %s3443_s11 = int_to_ptr.vmem [resolvable:$true] %s3442_s11 }
 0xfc0   :  { %4617 = vtanh.f32 %v2964_v13  ;;  %v2947_v17 = vmul.f32 0.044715, %v2939_v14  ;;  %v2981_v35 = vmul.f32 0.5, %v2973_v23 }
 0xfc1   :  { %v2954_v53 = vadd.f32 %v2946_v15, %v2895_v10  ;;  %v2984_v36 = vmul.f32 0.5, %v2976_v46  ;;  %v3392_v15 = vsel %vm3391_vm0, %v4631_v3, 0.0 }
 0xfc2   :  { %v2955_v26 = vadd.f32 %v2947_v17, %v2909_v63  ;;  %v2989_v20 = vmul.f32 %v2981_v35, %v5296_v42 }
 0xfc3   :  { %v4612_v21 = vpop.eup %4611  ;;  %v2962_v29 = vmul.f32 0.7978846, %v2954_v53  ;;  %v2992_v7 = vmul.f32 %v2984_v36, %v5298_v27 }
 0xfc4   :  { %v4614_v32 = vpop.eup %4613  ;;  %v2963_v30 = vmul.f32 0.7978846, %v2955_v26  ;;  %v2974_v40 = vadd.f32 1.0, %v4612_v21 }
 0xfc5   :  { %v4616_v24 = vpop.eup %4615  ;;  %4619 = vtanh.f32 %v2962_v29  ;;  %v2975_v44 = vadd.f32 1.0, %v4614_v32  ;;  %v3363_v29 = vperm.slane %v4631_v3, 0 }
 0xfc6   :  { %v4618_v34 = vpop.eup %4617  ;;  %v2977_v28 = vadd.f32 1.0, %v4616_v24  ;;  %4621 = vtanh.f32 %v2963_v30  ;;  %v2982_v52 = vmul.f32 0.5, %v2974_v40 }
 0xfc7   :  { %v2980_v37 = vadd.f32 1.0, %v4618_v34  ;;  %v2983_v57 = vmul.f32 0.5, %v2975_v44 }
 0xfc8   :  { %v2985_v43 = vmul.f32 0.5, %v2977_v28  ;;  %v2990_v42 = vmul.f32 %v2982_v52, %v5308_v41 }
 0xfc9   :  { %v2988_v18 = vmul.f32 0.5, %v2980_v37 }
 0xfca   :  { %v2993_v4 = vmul.f32 %v2985_v43, %v5315_v47  ;;  %v2991_v47 = vmul.f32 %v2983_v57, %v5310_v45 }
 0xfcb   :  { %v4620_v22 = vpop.eup %4619  ;;  %v2996_v50 = vmul.f32 %v2988_v18, %v5320_v33 }
 0xfcc   :  { %v4622_v58 = vpop.eup %4621  ;;  %v3062_v48 = vpack.c.bf16 %v2993_v4, %v2989_v20  ;;  %v2978_v56 = vadd.f32 1.0, %v4620_v22 }
 0xfcd   :  { %v3065_v60 = vpack.c.bf16 %v2996_v50, %v2992_v7  ;;  %v2979_v5 = vadd.f32 1.0, %v4622_v58  ;;  %v3317_v58 = vld [vmem:[#allocation7 + $0x41] ss:$0 sm:$0xff] }
 0xfce   :  { %v2986_v6 = vmul.f32 0.5, %v2978_v56  ;;  %3267 = vmatmul.bf16.vlgmr.msra.gmra.mxu1 %v3062_v48 }
 0xfcf   :  { %v2987_v38 = vmul.f32 0.5, %v2979_v5  ;;  %3309 = vmatmul.bf16.vlgmr.msrb.gmra.mxu0 %v3065_v60  ;;  %v3318_v60 = vld [vmem:[#allocation7 + $0x42] ss:$0 sm:$0xff] }
 0xfd0   :  { %v2994_v55 = vmul.f32 %v2986_v6, %v2895_v10 }
 0xfd1   :  { %v2995_v61 = vmul.f32 %v2987_v38, %v2909_v63 }
 0xfd2   :  { %v3063_v27 = vpack.c.bf16 %v2994_v55, %v2990_v42 }
 0xfd3   :  { %v3064_v19 = vpack.c.bf16 %v2995_v61, %v2991_v47 }
 0xfd4   :  { %3281 = vmatmul.bf16.vlgmr.msrb.gmra.mxu2 %v3063_v27 }
 0xfd5   :  { %3295 = vmatmul.bf16.vlgmr.msrb.gmra.mxu3 %v3064_v19 }
0x104b   :  { %v3268_v33 = vpop.f32.mrf.mxu1 }
0x104c   :  { %v3310_v54 = vpop.f32.mrf.mxu0  ;;  %v3269_v8 = vadd.f32 %v3268_v33, %v3066_v0 }
0x1053   :  { %v3270_v62 = vpop.f32.mrf.mxu1 }
0x1054   :  { %v3271_v1 = vadd.f32 %v3270_v62, %v3066_v0  ;;  %v3312_v11 = vpop.f32.mrf.mxu0 }
0x1057   :  { %v3282_v49 = vpop.f32.mrf.mxu2 }
0x1058   :  { %v3296_v25 = vpop.f32.mrf.mxu3  ;;  %v3283_v41 = vadd.f32 %v3282_v49, %v3269_v8 }
0x105a   :  { %v3297_v63 = vadd.f32 %v3296_v25, %v3283_v41 }
0x105c   :  { %v3311_v13 = vadd.f32 %v3310_v54, %v3297_v63 }
0x105e   :  { %v3315_v14 = vadd.f32 %v3311_v13, %v5286_v59  ;;  %v3370_v59 = vperm.slane %v4631_v3, 1 }
0x105f   :  { %v3284_v2 = vpop.f32.mrf.mxu2 }
0x1060   :  { %v3285_v31 = vadd.f32 %v3284_v2, %v3271_v1  ;;  %v3298_v9 = vpop.f32.mrf.mxu3 }
0x1062   :  { %v3299_v10 = vadd.f32 %v3298_v9, %v3285_v31 }
0x1064   :  { %v3313_v45 = vadd.f32 %v3312_v11, %v3299_v10 }
0x1066   :  { %v3316_v12 = vadd.f32 %v3313_v45, %v5288_v51 }
0x1068   :  { %3321 = vadd.xlane.f32.xlu2 %v3316_v12 }
0x1070   :  { %3319 = vadd.xlane.f32.xlu2 %v3315_v14 }
0x1078   :  { %3393 = vadd.xlane.f32.xlu2 %v3392_v15 }
0x10db   :  { %v3322_v16 = vpop.xlane.xlu2 %3321 }
0x10dc   :  { %v3324_v17 = vmul.f32 %v3322_v16, %v4938_v39 }
0x10de   :  { %v3326_v53 = vsub.f32 %v3316_v12, %v3324_v17 }
0x10e0   :  { %v3328_v23 = vmul.f32 %v3326_v53, %v3326_v53 }
0x10e2   :  { %3331 = vadd.xlane.f32.xlu0 %v3328_v23 }
0x10e3   :  { %v3320_v26 = vpop.xlane.xlu2 %3319 }
0x10e4   :  { %v3323_v51 = vmul.f32 %v3320_v26, %v4938_v39 }
0x10e6   :  { %v3325_v21 = vsub.f32 %v3315_v14, %v3323_v51 }
0x10e8   :  { %v3327_v46 = vmul.f32 %v3325_v21, %v3325_v21 }
0x10ea   :  { %3329 = vadd.xlane.f32.xlu1 %v3327_v46 }
0x10eb   :  { %v3394_v34 = vpop.xlane.xlu2 %3393 }
0x10ec   :  { %v5349_v36 = vmax.f32 %v3394_v34, 1.0 }
0x10ee   :  { %v3397_v18 = vrot.slane %v5349_v36, 1  ;;  %vm3405_vm9 = vweird.f32 %v5349_v36  ;;  %v3409_v17 = vand.u32 2147483647, %v5349_v36 }
0x10f0   :  { %vm3420_vm7 = vweird.f32 %v3397_v18  ;;  %v3426_v11 = vand.u32 2147483648, %v3397_v18  ;;  %v3424_v13 = vand.u32 2147483647, %v3397_v18  ;;  %vm3410_vm13 = vcmp.eq.f32.partialorder %v3409_v17, 8.507059e+37 }
0x10f2   :  { %v3427_v15 = vor.u32 1.1754944e-38, %v3426_v11  ;;  %vm3425_vm11 = vcmp.eq.f32.partialorder %v3424_v13, 8.507059e+37 }
0x10f6   :  { %3375 = vperm.xlu0 %4507, %v3370_v59  }
0x1103   :  { %3368 = vperm.xlu1 %4508, %v3363_v29  }
0x1155   :  { %v3332_v32 = vpop.xlane.xlu0 %3331 }
0x1156   :  { %v3334_v30 = vmul.f32 %v3332_v32, %v4938_v39 }
0x1158   :  { %v3336_v24 = vadd.f32 1e-12, %v3334_v30 }
0x115a   :  { %4623 = vrsqrt.f32 %v3336_v24  ;;  %vm3353_vm2 = vweird.f32 %v3336_v24 }
0x115d   :  { %v3330_v35 = vpop.xlane.xlu1 %3329 }
0x115e   :  { %v3333_v28 = vmul.f32 %v3330_v35, %v4938_v39 }
0x1160   :  { %v4624_v37 = vpop.eup %4623  ;;  %v3335_v40 = vadd.f32 1e-12, %v3333_v28 }
0x1161   :  { %v3348_v43 = vmul.f32 %v4624_v37, %v3336_v24  ;;  %vm3354_vm1 = vweird.f32 %v4624_v37 }
0x1162   :  { %4625 = vrsqrt.f32 %v3335_v40  ;;  %vm3355_vm3 = vmor %vm3353_vm2, %vm3354_vm1  ;;  %vm3343_vm5 = vweird.f32 %v3335_v40 }
0x1163   :  { %v3349_v44 = vmul.f32 %v4624_v37, %v3348_v43  ;;  %4627 = vrcp.f32 %v3397_v18 }
0x1164   :  { %4629 = vrcp.f32 %v5349_v36 }
0x1165   :  { %v3350_v20 = vmul.f32 0.5, %v3349_v44 }
0x1167   :  { %v3351_v4 = vsub.f32 1.5, %v3350_v20 }
0x1168   :  { %v4626_v22 = vpop.eup %4625  ;;  %v3376_v38 = vpop.permute.xlu0 %3375 }
0x1169   :  { %v3352_v7 = vmul.f32 %v4624_v37, %v3351_v4  ;;  %v3338_v50 = vmul.f32 %v4626_v22, %v3335_v40  ;;  %v4628_v56 = vpop.eup %4627  ;;  %vm3344_vm4 = vweird.f32 %v4626_v22 }
0x116a   :  { %v4630_v42 = vpop.eup %4629  ;;  %v3416_v47 = vmul.f32 %v4628_v56, %v3397_v18  ;;  %vm3345_vm6 = vmor %vm3343_vm5, %vm3344_vm4  ;;  %vm3421_vm8 = vweird.f32 %v4628_v56 }
0x116b   :  { %v3339_v39 = vmul.f32 %v4626_v22, %v3338_v50  ;;  %v3356_v52 = vsel %vm3355_vm3, %v4624_v37, %v3352_v7  ;;  %v3401_v19 = vmul.f32 %v4630_v42, %v5349_v36  ;;  %vm3422_vm14 = vmor %vm3420_vm7, %vm3421_vm8  ;;  %vm3406_vm10 = vweird.f32 %v4630_v42 }
0x116c   :  { %v3358_v48 = vmul.f32 %v3356_v52, %v3326_v53  ;;  %v3417_v25 = vsub.f32 1.0, %v3416_v47  ;;  %v3411_v53 = vand.u32 2147483648, %v5349_v36  ;;  %vm3407_vm12 = vmor %vm3405_vm9, %vm3406_vm10 }
0x116d   :  { %v3340_v57 = vmul.f32 0.5, %v3339_v39  ;;  %v3402_v1 = vsub.f32 1.0, %v3401_v19 }
0x116e   :  { %v3360_v5 = vmul.f32 %v3358_v48, %v3317_v58  ;;  %v3418_v31 = vmul.f32 %v4628_v56, %v3417_v25  ;;  %v3412_v59 = vor.u32 1.1754944e-38, %v3411_v53 }
0x116f   :  { %v3341_v6 = vsub.f32 1.5, %v3340_v57  ;;  %v3403_v45 = vmul.f32 %v4630_v42, %v3402_v1 }
0x1170   :  { %v3362_v55 = vadd.f32 %v3360_v5, %v3318_v60  ;;  %v3419_v12 = vadd.f32 %v4628_v56, %v3418_v31 }
0x1171   :  { %v3342_v61 = vmul.f32 %v4626_v22, %v3341_v6  ;;  %v3404_v16 = vadd.f32 %v4630_v42, %v3403_v45 }
0x1172   :  { %v3378_v27 = vmul.f32 %v3376_v38, %v3362_v55  ;;  %v3423_v26 = vsel %vm3422_vm14, %v4628_v56, %v3419_v12 }
0x1173   :  { %v3346_v33 = vsel %vm3345_vm6, %v4626_v22, %v3342_v61  ;;  %v3428_v46 = vsel %vm3425_vm11, %v3427_v15, %v3423_v26  ;;  %v3408_v30 = vsel %vm3407_vm12, %v4630_v42, %v3404_v16 }
0x1174   :  { %v3385_v49 = vrot.slane %v3378_v27, 4  ;;  %v3357_v54 = vmul.f32 %v3346_v33, %v3325_v21  ;;  %v3413_v34 = vsel %vm3410_vm13, %v3412_v59, %v3408_v30 }
0x1175   :  { %v3369_v2 = vpop.permute.xlu1 %3368 }
0x1176   :  { %v3386_v62 = vadd.f32 %v3385_v49, %v3378_v27  ;;  %v3359_v0 = vmul.f32 %v3357_v54, %v3317_v58 }
0x1178   :  { %v3387_v8 = vrot.slane %v3386_v62, 2  ;;  %v3361_v9 = vadd.f32 %v3359_v0, %v3318_v60 }
0x117a   :  { %v3388_v41 = vadd.f32 %v3387_v8, %v3386_v62  ;;  %v3377_v10 = vmul.f32 %v3369_v2, %v3361_v9 }
0x117c   :  { %v3389_v63 = vrot.slane %v3388_v41, 1  ;;  %v3379_v14 = vrot.slane %v3377_v10, 4 }
0x117e   :  { %v3380_v3 = vadd.f32 %v3379_v14, %v3377_v10  ;;  %v3390_v23 = vadd.f32 %v3389_v63, %v3388_v41 }
0x1180   :  { %v3381_v51 = vrot.slane %v3380_v3, 2  ;;  %v3429_v29 = vmul.f32 %v3428_v46, %v3390_v23 }
0x1182   :  { %v3382_v21 = vadd.f32 %v3381_v51, %v3380_v3  ;;  %v3432_v28 = vrot.slane %v3429_v29, 7 }
0x1184   :  { %v3383_v32 = vrot.slane %v3382_v21, 1 }
0x1186   :  { %v3384_v24 = vadd.f32 %v3383_v32, %v3382_v21 }
0x1188   :  { %v3414_v35 = vmul.f32 %v3413_v34, %v3384_v24 }
0x118a   :  { %v3434_v36 = vsel %vm3433_vm15, %v3432_v28, %v3414_v35 }
0x118b   :  { %3436 = vst [vmem:[#allocation14] sm:$0x3] %v3434_v36 }
0x118c   :  { %3447 = dma.vmem_to_hbm [thread:$0]  %s3443_s11, 32, %s3445_s14, [#allocation4]  }
0x118d   :  { %4832 = dma.done.wait [#allocation4], 32  }
0x118e   :  { %4833 = vsyncadd [#allocation4], 4294967264 }
0x118f   :  { %3452 = vsyncpa [#allocation3], 1 }
0x1190   :  { %3453 = vsyncpa [#allocation6], 1 }
0x1191   :  { %3454 = vsyncpa [#allocation9], 1 }
0x1192   :  { %3455 = vsyncpa [#allocation12], 1 }
0x1193   :  { %3456 = vsyncpa [#allocation4], 1 }

</bundles_post_ra>
